<compile_context>
chip_gen: v6e
topology: v6e:2x2x1
jax: 0.10.0
libtpu: 0.0.40
codegen_flags: <defaults>
</compile_context>

<pallas_src>
import functools

import jax
import jax.numpy as jnp
from jax import lax
from jax.experimental import pallas as pl
from jax.experimental.pallas import tpu as pltpu

EPS = 1e-5


def _bottleneck_kernel(x_ref, w1_ref, w2_ref, w3_ref, b1_ref, b2_ref, b3_ref,
                       o_ref, y1s_ref, im_ref, *, width, apron, compute_dtype):
    # x_ref : (1, H*W, Cin)  compute-dtype flat activations for one image
    # w1_ref: (Cin, Cm)      cdt, BN1 scale folded in
    # w2_ref: (9*Cm, Cm)     cdt, im2col weight layout, BN2 scale folded in
    # w3_ref: (Cm, Cout)     cdt, BN3 scale folded in
    # b*_ref: (1, C)         f32 folded BN biases
    # y1s_ref: (A + HW + A, 3*Cm) cdt  apron-padded staging (3 masked variants)
    # im_ref : (HW, 9*Cm)          cdt  im2col operand for the single conv2 dot
    HW = x_ref.shape[1]
    Cm = w1_ref.shape[1]
    A, W, cdt = apron, width, compute_dtype

    # ---- conv1 (1x1) + bn1 bias (scale folded into w1) -----------------------
    y1 = jnp.dot(x_ref[0], w1_ref[...], preferred_element_type=jnp.float32)
    y1 = y1 + b1_ref[...]                                      # (HW, Cm) f32

    # ---- W-boundary masks generated in-kernel (no (HW,2) DMA) ----------------
    # Masks are indexed by INPUT position and pre-applied, so every conv2 tap
    # below is a pure slice read.  Elementwise math stays f32 (v5e-friendly).
    col = lax.broadcasted_iota(jnp.int32, (HW, 1), 0) % W
    y1_l = y1 * (col != W - 1).astype(jnp.float32)   # feeds dx == -1 taps
    y1_r = y1 * (col != 0).astype(jnp.float32)       # feeds dx == +1 taps

    # ---- stage into apron-padded scratch (aligned interior store) ------------
    # Only the small aprons (conv2's spatial zero padding rows) are rewritten;
    # zeroing each step is required on megacore parts (per-core scratch copy).
    y1s_ref[0:A, :] = jnp.zeros((A, 3 * Cm), dtype=y1s_ref.dtype)
    y1s_ref[A + HW:A + HW + A, :] = jnp.zeros((A, 3 * Cm), dtype=y1s_ref.dtype)
    y1s_ref[A:A + HW, 0 * Cm:1 * Cm] = y1.astype(cdt)
    y1s_ref[A:A + HW, 1 * Cm:2 * Cm] = y1_l.astype(cdt)
    y1s_ref[A:A + HW, 2 * Cm:3 * Cm] = y1_r.astype(cdt)

    # ---- conv2 (3x3, stride 1, pad 1) as ONE K = 9*Cm matmul -----------------
    # Tap t=(dy,dx): shift dy*W+dx rows of the proper pre-masked variant;
    # out-of-image rows land in the zero aprons.  Written at lane offset t*Cm.
    for t in range(9):
        dy, dx = t // 3 - 1, t % 3 - 1
        s = dy * W + dx
        v = 0 if dx == 0 else (1 if dx == -1 else 2)
        im_ref[:, t * Cm:(t + 1) * Cm] = y1s_ref[A + s:A + s + HW,
                                                 v * Cm:(v + 1) * Cm]
    y2 = jnp.dot(im_ref[...], w2_ref[...], preferred_element_type=jnp.float32)
    y2 = y2 + b2_ref[...]                                      # (HW, Cm) f32

    # ---- conv3 (1x1) + bn3 bias ----------------------------------------------
    y3 = jnp.dot(y2.astype(cdt), w3_ref[...],
                 preferred_element_type=jnp.float32)
    y3 = y3 + b3_ref[...]                                      # (HW, Cout) f32

    # ---- residual add + final ReLU (x re-read here; identity: Cin == Cout) ---
    o_ref[0] = jnp.maximum(y3 + x_ref[0].astype(jnp.float32),
                           0.0).astype(o_ref.dtype)


def bottleneck_pallas(x_nchw, params, *, compute_dtype=jnp.bfloat16):
    """x_nchw: (N, Cin, H, W) float32.  Returns (N, Cout, H, W) float32."""
    w1, w2, w3, s1, b1, s2, b2, s3, b3 = params
    N, Cin, H, W = x_nchw.shape
    Cm = w1.shape[1]
    Cout = w3.shape[1]
    assert Cin == Cout, "no-downsample bottleneck requires Cin == Cout"
    HW = H * W
    A = max(8, ((W + 1 + 7) // 8) * 8)        # apron rows: 8-aligned, >= W + 1

    cdt = compute_dtype
    # Fold BN scales into the conv weights (per output column) in f32, then
    # cast once to the compute dtype.  Biases stay separate in f32.
    w1c = (w1 * s1).astype(cdt)                                 # (Cin, Cm)
    w2c = (w2.reshape(9 * Cm, Cm) * s2).astype(cdt)             # (9*Cm, Cm)
    w3c = (w3 * s3).astype(cdt)                                 # (Cm, Cout)

    # NCHW -> flat lane-dense (N, H*W, C), in compute dtype (halves DMA bytes).
    x_flat = jnp.transpose(x_nchw, (0, 2, 3, 1)).reshape(N, HW, Cin).astype(cdt)

    # Constant-index-map specs -> DMA'd once across the grid.
    full = lambda a: pl.BlockSpec(a.shape, lambda n: (0,) * a.ndim)

    kernel = functools.partial(_bottleneck_kernel,
                               width=W, apron=A, compute_dtype=cdt)

    out_flat = pl.pallas_call(
        kernel,
        out_shape=jax.ShapeDtypeStruct((N, HW, Cout), x_nchw.dtype),
        grid_spec=pltpu.PrefetchScalarGridSpec(
            num_scalar_prefetch=0,
            # Follow-up for large H*W*C: add a spatial row-block grid axis
            # (1-row halo via the apron scratch) for software-pipeline depth.
            grid=(N,),
            in_specs=[
                pl.BlockSpec((1, HW, Cin), lambda n: (n, 0, 0)),
                full(w1c), full(w2c), full(w3c),
                full(b1), full(b2), full(b3),
            ],
            out_specs=pl.BlockSpec((1, HW, Cout), lambda n: (n, 0, 0)),
            scratch_shapes=[
                pltpu.VMEM((A + HW + A, 3 * Cm), cdt),   # staging (3 variants)
                pltpu.VMEM((HW, 9 * Cm), cdt),           # im2col operand
            ],
        ),
        compiler_params=pltpu.CompilerParams(
            dimension_semantics=("parallel",),
            # 32 MiB: ample headroom everywhere; never the whole v7x VMEM.
            vmem_limit_bytes=32 * 1024 * 1024,
        ),
    )(x_flat, w1c, w2c, w3c, b1, b2, b3)

    return jnp.transpose(out_flat.reshape(N, H, W, Cout), (0, 3, 1, 2))


# ----------------------------------------------------------------------------
# Deterministic parameter construction (torch-style shapes), BN folding, and a
# pure-JAX reference implementation for validation.
# ----------------------------------------------------------------------------
def make_params(key, in_channels, out_channels):
    expansion = 4
    Cm = out_channels
    Cout = out_channels * expansion
    ks = jax.random.split(key, 15)

    # torch conv weight shapes (O, I, kH, kW), bias=False
    w1_t = 0.1 * jax.random.normal(ks[0], (Cm, in_channels, 1, 1), jnp.float32)
    w2_t = 0.1 * jax.random.normal(ks[1], (Cm, Cm, 3, 3), jnp.float32)
    w3_t = 0.1 * jax.random.normal(ks[2], (Cout, Cm, 1, 1), jnp.float32)

    def bn(kg, kb, km, kv, c):
        gamma = 1.0 + 0.1 * jax.random.normal(kg, (c,), jnp.float32)
        beta = 0.1 * jax.random.normal(kb, (c,), jnp.float32)
        mean = 0.1 * jax.random.normal(km, (c,), jnp.float32)
        var = 1.0 + 0.1 * jnp.abs(jax.random.normal(kv, (c,), jnp.float32))
        return gamma, beta, mean, var

    bn1 = bn(ks[3], ks[4], ks[5], ks[6], Cm)
    bn2 = bn(ks[7], ks[8], ks[9], ks[10], Cm)
    bn3 = bn(ks[11], ks[12], ks[13], ks[14], Cout)

    torch_params = dict(w1=w1_t, w2=w2_t, w3=w3_t, bn1=bn1, bn2=bn2, bn3=bn3)

    def fold(bnp):
        gamma, beta, mean, var = bnp
        scale = gamma / jnp.sqrt(var + EPS)
        bias = beta - mean * scale
        return scale[None, :], bias[None, :]

    s1, b1 = fold(bn1)
    s2, b2 = fold(bn2)
    s3, b3 = fold(bn3)

    # kernel-layout weights
    w1_k = jnp.transpose(w1_t[:, :, 0, 0], (1, 0))            # (Cin, Cm)
    w2_k = jnp.transpose(w2_t, (2, 3, 1, 0))                   # (ky, kx, ci, co)
    w3_k = jnp.transpose(w3_t[:, :, 0, 0], (1, 0))             # (Cm, Cout)

    kernel_params = (w1_k, w2_k, w3_k, s1, b1, s2, b2, s3, b3)
    return torch_params, kernel_params


def reference_forward(x, tp):
    dn = ("NCHW", "OIHW", "NCHW")

    def bn_apply(y, bnp):
        gamma, beta, mean, var = bnp
        sh = (1, -1, 1, 1)
        return (y - mean.reshape(sh)) / jnp.sqrt(var.reshape(sh) + EPS) \
            * gamma.reshape(sh) + beta.reshape(sh)

    y = lax.conv_general_dilated(x, tp["w1"], (1, 1), "VALID",
                                 dimension_numbers=dn)
    y = bn_apply(y, tp["bn1"])
    y = lax.conv_general_dilated(y, tp["w2"], (1, 1), ((1, 1), (1, 1)),
                                 dimension_numbers=dn)
    y = bn_apply(y, tp["bn2"])
    y = lax.conv_general_dilated(y, tp["w3"], (1, 1), "VALID",
                                 dimension_numbers=dn)
    y = bn_apply(y, tp["bn3"])
    return jnp.maximum(y + x, 0.0)


if __name__ == "__main__":
    key = jax.random.PRNGKey(0)
    k_x, k_p = jax.random.split(key)

    # in_channels must equal out_channels * expansion for the identity residual.
    N, out_channels, H, W = 2, 4, 16, 16
    in_channels = out_channels * 4        # 16

    x = jax.random.normal(k_x, (N, in_channels, H, W), jnp.float32)
    torch_params, kernel_params = make_params(k_p, in_channels, out_channels)

    ref = reference_forward(x, torch_params)

    # exact-semantics check: f32 matmul / activation path
    out_f32 = jax.block_until_ready(
        bottleneck_pallas(x, kernel_params, compute_dtype=jnp.float32))
    assert out_f32.shape == ref.shape
    err32 = float(jnp.max(jnp.abs(out_f32 - ref)))
    assert jnp.allclose(out_f32, ref, atol=1e-3, rtol=1e-3), \
        f"f32 max err {err32}"

    # default fast path: bf16 activations + MXU operands, f32 accumulation
    out_bf16 = jax.block_until_ready(bottleneck_pallas(x, kernel_params))
    errbf = float(jnp.max(jnp.abs(out_bf16 - ref)))
    assert jnp.allclose(out_bf16, ref, atol=5e-2, rtol=5e-2), \
        f"bf16 max err {errbf}"

    print("KERNEL_OK")
</pallas_src>

<mosaic_0001>
module attributes {stable_mosaic.version = 11 : i64} {
  func.func @_bottleneck_kernel(%arg0: i32, %arg1: memref<1x256x16xf32, #tpu.memory_space<vmem>>, %arg2: memref<16x4xf32, #tpu.memory_space<vmem>>, %arg3: memref<36x4xf32, #tpu.memory_space<vmem>>, %arg4: memref<4x16xf32, #tpu.memory_space<vmem>>, %arg5: memref<1x4xf32, #tpu.memory_space<vmem>>, %arg6: memref<1x4xf32, #tpu.memory_space<vmem>>, %arg7: memref<1x16xf32, #tpu.memory_space<vmem>>, %arg8: memref<1x256x16xf32, #tpu.memory_space<vmem>>, %arg9: memref<304x12xf32, #tpu.memory_space<vmem>>, %arg10: memref<256x36xf32, #tpu.memory_space<vmem>>) attributes {dimension_semantics = [#tpu.dimension_semantics<parallel>], iteration_bounds = array<i64: 2>, scalar_prefetch = 0 : i64, scratch_operands = 2 : i64, tpu.core_type = #tpu.core_type<tc>, window_params = [{transform_indices = @transform_0, window_bounds = array<i64: 1, 256, 16>}, {pipeline_mode = #tpu.pipeline_mode<synchronous>, transform_indices = @transform_1, window_bounds = array<i64: 16, 4>}, {pipeline_mode = #tpu.pipeline_mode<synchronous>, transform_indices = @transform_2, window_bounds = array<i64: 36, 4>}, {pipeline_mode = #tpu.pipeline_mode<synchronous>, transform_indices = @transform_3, window_bounds = array<i64: 4, 16>}, {pipeline_mode = #tpu.pipeline_mode<synchronous>, transform_indices = @transform_4, window_bounds = array<i64: 1, 4>}, {pipeline_mode = #tpu.pipeline_mode<synchronous>, transform_indices = @transform_5, window_bounds = array<i64: 1, 4>}, {pipeline_mode = #tpu.pipeline_mode<synchronous>, transform_indices = @transform_6, window_bounds = array<i64: 1, 16>}, {transform_indices = @transform_7, window_bounds = array<i64: 1, 256, 16>}]} {
    %c0 = arith.constant 0 : index
    %c0_0 = arith.constant 0 : index
    %c0_1 = arith.constant 0 : index
    %0 = vector.load %arg1[%c0, %c0_0, %c0_1] : memref<1x256x16xf32, #tpu.memory_space<vmem>>, vector<1x256x16xf32>
    %1 = vector.shape_cast %0 : vector<1x256x16xf32> to vector<256x16xf32>
    %c0_2 = arith.constant 0 : index
    %c0_3 = arith.constant 0 : index
    %2 = vector.load %arg2[%c0_2, %c0_3] : memref<16x4xf32, #tpu.memory_space<vmem>>, vector<16x4xf32>
    %cst = arith.constant dense<0.000000e+00> : vector<256x4xf32>
    %3 = tpu.matmul %1, %2, %cst {dimension_numbers = #tpu.dot_dimension_numbers<[1], [0], [0], [1], [0, 0, 1, 1], [], []>} : vector<256x16xf32>, vector<16x4xf32>, vector<256x4xf32> -> vector<256x4xf32>
    %c0_4 = arith.constant 0 : index
    %c0_5 = arith.constant 0 : index
    %4 = vector.load %arg5[%c0_4, %c0_5] : memref<1x4xf32, #tpu.memory_space<vmem>>, vector<1x4xf32>
    %5 = vector.broadcast %4 : vector<1x4xf32> to vector<256x4xf32>
    %6 = arith.addf %3, %5 : vector<256x4xf32>
    %7 = tpu.iota {dimensions = array<i32: 0>} : vector<256x1xi32>
    %c16_i32 = arith.constant 16 : i32
    %c0_i32 = arith.constant 0 : i32
    %8 = arith.cmpi eq, %c16_i32, %c0_i32 : i32
    %c1_i32 = arith.constant 1 : i32
    %9 = arith.select %8, %c1_i32, %c16_i32 : i32
    %10 = vector.broadcast %9 : i32 to vector<256x1xi32>
    %11 = arith.remsi %7, %10 : vector<256x1xi32>
    %c0_i32_6 = arith.constant 0 : i32
    %12 = vector.broadcast %c0_i32_6 : i32 to vector<256x1xi32>
    %13 = arith.cmpi ne, %11, %12 : vector<256x1xi32>
    %c0_i32_7 = arith.constant 0 : i32
    %14 = vector.broadcast %c0_i32_7 : i32 to vector<256x1xi32>
    %15 = arith.cmpi slt, %11, %14 : vector<256x1xi32>
    %c0_i32_8 = arith.constant 0 : i32
    %16 = arith.cmpi slt, %9, %c0_i32_8 : i32
    %17 = vector.broadcast %16 : i1 to vector<256x1xi1>
    %18 = vector.broadcast %17 : vector<256x1xi1> to vector<256x1xi1>
    %19 = arith.xori %15, %18 : vector<256x1xi1>
    %20 = arith.andi %19, %13 : vector<256x1xi1>
    %21 = vector.broadcast %9 : i32 to vector<256x1xi32>
    %22 = arith.addi %11, %21 : vector<256x1xi32>
    %23 = arith.select %20, %22, %11 : vector<256x1xi1>, vector<256x1xi32>
    %c15_i32 = arith.constant 15 : i32
    %24 = vector.broadcast %c15_i32 : i32 to vector<256x1xi32>
    %25 = arith.cmpi ne, %23, %24 : vector<256x1xi32>
    %26 = arith.extui %25 : vector<256x1xi1> to vector<256x1xi32>
    %27 = arith.sitofp %26 : vector<256x1xi32> to vector<256x1xf32>
    %28 = vector.broadcast %27 : vector<256x1xf32> to vector<256x4xf32>
    %29 = arith.mulf %6, %28 : vector<256x4xf32>
    %c0_i32_9 = arith.constant 0 : i32
    %30 = vector.broadcast %c0_i32_9 : i32 to vector<256x1xi32>
    %31 = arith.cmpi ne, %23, %30 : vector<256x1xi32>
    %32 = arith.extui %31 : vector<256x1xi1> to vector<256x1xi32>
    %33 = arith.sitofp %32 : vector<256x1xi32> to vector<256x1xf32>
    %34 = vector.broadcast %33 : vector<256x1xf32> to vector<256x4xf32>
    %35 = arith.mulf %6, %34 : vector<256x4xf32>
    %cst_10 = arith.constant 0.000000e+00 : f32
    %36 = vector.broadcast %cst_10 : f32 to vector<24x12xf32>
    %c0_11 = arith.constant 0 : index
    %c0_12 = arith.constant 0 : index
    %37 = vector.load %arg9[%c0_11, %c0_12] : memref<304x12xf32, #tpu.memory_space<vmem>>, vector<24x12xf32>
    tpu.vector_store %arg9[%c0_11, %c0_12], %36 {strides = array<i32>} : memref<304x12xf32, #tpu.memory_space<vmem>>, vector<24x12xf32>,
    %cst_13 = arith.constant 0.000000e+00 : f32
    %38 = vector.broadcast %cst_13 : f32 to vector<24x12xf32>
    %c280 = arith.constant 280 : index
    %c0_14 = arith.constant 0 : index
    %39 = vector.load %arg9[%c280, %c0_14] : memref<304x12xf32, #tpu.memory_space<vmem>>, vector<24x12xf32>
    tpu.vector_store %arg9[%c280, %c0_14], %38 {strides = array<i32>} : memref<304x12xf32, #tpu.memory_space<vmem>>, vector<24x12xf32>,
    %c24 = arith.constant 24 : index
    %c0_15 = arith.constant 0 : index
    %40 = vector.load %arg9[%c24, %c0_15] : memref<304x12xf32, #tpu.memory_space<vmem>>, vector<256x4xf32>
    tpu.vector_store %arg9[%c24, %c0_15], %6 {strides = array<i32>} : memref<304x12xf32, #tpu.memory_space<vmem>>, vector<256x4xf32>,
    %c24_16 = arith.constant 24 : index
    %c4 = arith.constant 4 : index
    %41 = vector.load %arg9[%c24_16, %c4] : memref<304x12xf32, #tpu.memory_space<vmem>>, vector<256x4xf32>
    tpu.vector_store %arg9[%c24_16, %c4], %29 {strides = array<i32>} : memref<304x12xf32, #tpu.memory_space<vmem>>, vector<256x4xf32>,
    %c24_17 = arith.constant 24 : index
    %c8 = arith.constant 8 : index
    %42 = vector.load %arg9[%c24_17, %c8] : memref<304x12xf32, #tpu.memory_space<vmem>>, vector<256x4xf32>
    tpu.vector_store %arg9[%c24_17, %c8], %35 {strides = array<i32>} : memref<304x12xf32, #tpu.memory_space<vmem>>, vector<256x4xf32>,
    %c7 = arith.constant 7 : index
    %c4_18 = arith.constant 4 : index
    %43 = vector.load %arg9[%c7, %c4_18] : memref<304x12xf32, #tpu.memory_space<vmem>>, vector<256x4xf32>
    %c0_19 = arith.constant 0 : index
    %c0_20 = arith.constant 0 : index
    %44 = vector.load %arg10[%c0_19, %c0_20] : memref<256x36xf32, #tpu.memory_space<vmem>>, vector<256x4xf32>
    tpu.vector_store %arg10[%c0_19, %c0_20], %43 {strides = array<i32>} : memref<256x36xf32, #tpu.memory_space<vmem>>, vector<256x4xf32>,
    %c8_21 = arith.constant 8 : index
    %c0_22 = arith.constant 0 : index
    %45 = vector.load %arg9[%c8_21, %c0_22] : memref<304x12xf32, #tpu.memory_space<vmem>>, vector<256x4xf32>
    %c0_23 = arith.constant 0 : index
    %c4_24 = arith.constant 4 : index
    %46 = vector.load %arg10[%c0_23, %c4_24] : memref<256x36xf32, #tpu.memory_space<vmem>>, vector<256x4xf32>
    tpu.vector_store %arg10[%c0_23, %c4_24], %45 {strides = array<i32>} : memref<256x36xf32, #tpu.memory_space<vmem>>, vector<256x4xf32>,
    %c9 = arith.constant 9 : index
    %c8_25 = arith.constant 8 : index
    %47 = vector.load %arg9[%c9, %c8_25] : memref<304x12xf32, #tpu.memory_space<vmem>>, vector<256x4xf32>
    %c0_26 = arith.constant 0 : index
    %c8_27 = arith.constant 8 : index
    %48 = vector.load %arg10[%c0_26, %c8_27] : memref<256x36xf32, #tpu.memory_space<vmem>>, vector<256x4xf32>
    tpu.vector_store %arg10[%c0_26, %c8_27], %47 {strides = array<i32>} : memref<256x36xf32, #tpu.memory_space<vmem>>, vector<256x4xf32>,
    %c23 = arith.constant 23 : index
    %c4_28 = arith.constant 4 : index
    %49 = vector.load %arg9[%c23, %c4_28] : memref<304x12xf32, #tpu.memory_space<vmem>>, vector<256x4xf32>
    %c0_29 = arith.constant 0 : index
    %c12 = arith.constant 12 : index
    %50 = vector.load %arg10[%c0_29, %c12] : memref<256x36xf32, #tpu.memory_space<vmem>>, vector<256x4xf32>
    tpu.vector_store %arg10[%c0_29, %c12], %49 {strides = array<i32>} : memref<256x36xf32, #tpu.memory_space<vmem>>, vector<256x4xf32>,
    %c24_30 = arith.constant 24 : index
    %c0_31 = arith.constant 0 : index
    %51 = vector.load %arg9[%c24_30, %c0_31] : memref<304x12xf32, #tpu.memory_space<vmem>>, vector<256x4xf32>
    %c0_32 = arith.constant 0 : index
    %c16 = arith.constant 16 : index
    %52 = vector.load %arg10[%c0_32, %c16] : memref<256x36xf32, #tpu.memory_space<vmem>>, vector<256x4xf32>
    tpu.vector_store %arg10[%c0_32, %c16], %51 {strides = array<i32>} : memref<256x36xf32, #tpu.memory_space<vmem>>, vector<256x4xf32>,
    %c25 = arith.constant 25 : index
    %c8_33 = arith.constant 8 : index
    %53 = vector.load %arg9[%c25, %c8_33] : memref<304x12xf32, #tpu.memory_space<vmem>>, vector<256x4xf32>
    %c0_34 = arith.constant 0 : index
    %c20 = arith.constant 20 : index
    %54 = vector.load %arg10[%c0_34, %c20] : memref<256x36xf32, #tpu.memory_space<vmem>>, vector<256x4xf32>
    tpu.vector_store %arg10[%c0_34, %c20], %53 {strides = array<i32>} : memref<256x36xf32, #tpu.memory_space<vmem>>, vector<256x4xf32>,
    %c39 = arith.constant 39 : index
    %c4_35 = arith.constant 4 : index
    %55 = vector.load %arg9[%c39, %c4_35] : memref<304x12xf32, #tpu.memory_space<vmem>>, vector<256x4xf32>
    %c0_36 = arith.constant 0 : index
    %c24_37 = arith.constant 24 : index
    %56 = vector.load %arg10[%c0_36, %c24_37] : memref<256x36xf32, #tpu.memory_space<vmem>>, vector<256x4xf32>
    tpu.vector_store %arg10[%c0_36, %c24_37], %55 {strides = array<i32>} : memref<256x36xf32, #tpu.memory_space<vmem>>, vector<256x4xf32>,
    %c40 = arith.constant 40 : index
    %c0_38 = arith.constant 0 : index
    %57 = vector.load %arg9[%c40, %c0_38] : memref<304x12xf32, #tpu.memory_space<vmem>>, vector<256x4xf32>
    %c0_39 = arith.constant 0 : index
    %c28 = arith.constant 28 : index
    %58 = vector.load %arg10[%c0_39, %c28] : memref<256x36xf32, #tpu.memory_space<vmem>>, vector<256x4xf32>
    tpu.vector_store %arg10[%c0_39, %c28], %57 {strides = array<i32>} : memref<256x36xf32, #tpu.memory_space<vmem>>, vector<256x4xf32>,
    %c41 = arith.constant 41 : index
    %c8_40 = arith.constant 8 : index
    %59 = vector.load %arg9[%c41, %c8_40] : memref<304x12xf32, #tpu.memory_space<vmem>>, vector<256x4xf32>
    %c0_41 = arith.constant 0 : index
    %c32 = arith.constant 32 : index
    %60 = vector.load %arg10[%c0_41, %c32] : memref<256x36xf32, #tpu.memory_space<vmem>>, vector<256x4xf32>
    tpu.vector_store %arg10[%c0_41, %c32], %59 {strides = array<i32>} : memref<256x36xf32, #tpu.memory_space<vmem>>, vector<256x4xf32>,
    %c0_42 = arith.constant 0 : index
    %c0_43 = arith.constant 0 : index
    %61 = vector.load %arg10[%c0_42, %c0_43] : memref<256x36xf32, #tpu.memory_space<vmem>>, vector<256x36xf32>
    %c0_44 = arith.constant 0 : index
    %c0_45 = arith.constant 0 : index
    %62 = vector.load %arg3[%c0_44, %c0_45] : memref<36x4xf32, #tpu.memory_space<vmem>>, vector<36x4xf32>
    %cst_46 = arith.constant dense<0.000000e+00> : vector<256x4xf32>
    %63 = tpu.matmul %61, %62, %cst_46 {dimension_numbers = #tpu.dot_dimension_numbers<[1], [0], [0], [1], [0, 0, 1, 1], [], []>} : vector<256x36xf32>, vector<36x4xf32>, vector<256x4xf32> -> vector<256x4xf32>
    %c0_47 = arith.constant 0 : index
    %c0_48 = arith.constant 0 : index
    %64 = vector.load %arg6[%c0_47, %c0_48] : memref<1x4xf32, #tpu.memory_space<vmem>>, vector<1x4xf32>
    %65 = vector.broadcast %64 : vector<1x4xf32> to vector<256x4xf32>
    %66 = arith.addf %63, %65 : vector<256x4xf32>
    %c0_49 = arith.constant 0 : index
    %c0_50 = arith.constant 0 : index
    %67 = vector.load %arg4[%c0_49, %c0_50] : memref<4x16xf32, #tpu.memory_space<vmem>>, vector<4x16xf32>
    %cst_51 = arith.constant dense<0.000000e+00> : vector<256x16xf32>
    %68 = tpu.matmul %66, %67, %cst_51 {dimension_numbers = #tpu.dot_dimension_numbers<[1], [0], [0], [1], [0, 0, 1, 1], [], []>} : vector<256x4xf32>, vector<4x16xf32>, vector<256x16xf32> -> vector<256x16xf32>
    %c0_52 = arith.constant 0 : index
    %c0_53 = arith.constant 0 : index
    %69 = vector.load %arg7[%c0_52, %c0_53] : memref<1x16xf32, #tpu.memory_space<vmem>>, vector<1x16xf32>
    %70 = vector.broadcast %69 : vector<1x16xf32> to vector<256x16xf32>
    %71 = arith.addf %68, %70 : vector<256x16xf32>
    %c0_54 = arith.constant 0 : index
    %c0_55 = arith.constant 0 : index
    %c0_56 = arith.constant 0 : index
    %72 = vector.load %arg1[%c0_54, %c0_55, %c0_56] : memref<1x256x16xf32, #tpu.memory_space<vmem>>, vector<1x256x16xf32>
    %73 = vector.shape_cast %72 : vector<1x256x16xf32> to vector<256x16xf32>
    %74 = arith.addf %71, %73 : vector<256x16xf32>
    %cst_57 = arith.constant 0.000000e+00 : f32
    %75 = vector.broadcast %cst_57 : f32 to vector<256x16xf32>
    %76 = arith.maximumf %74, %75 : vector<256x16xf32>
    %c0_58 = arith.constant 0 : index
    %c0_59 = arith.constant 0 : index
    %c0_60 = arith.constant 0 : index
    %77 = vector.load %arg8[%c0_58, %c0_59, %c0_60] : memref<1x256x16xf32, #tpu.memory_space<vmem>>, vector<1x256x16xf32>
    %78 = vector.shape_cast %77 : vector<1x256x16xf32> to vector<256x16xf32>
    %79 = vector.shape_cast %76 : vector<256x16xf32> to vector<1x256x16xf32>
    tpu.vector_store %arg8[%c0_58, %c0_59, %c0_60], %79 {strides = array<i32>} : memref<1x256x16xf32, #tpu.memory_space<vmem>>, vector<1x256x16xf32>,
    return
  }
  func.func @transform_0(%arg0: i32) -> (i32, i32, i32) {
    %c0_i32 = arith.constant 0 : i32
    %c0_i32_0 = arith.constant 0 : i32
    %c0_i32_1 = arith.constant 0 : i32
    return %arg0, %c0_i32, %c0_i32_0 : i32, i32, i32
  }
  func.func @transform_1(%arg0: i32) -> (i32, i32) {
    %c0_i32 = arith.constant 0 : i32
    %c0_i32_0 = arith.constant 0 : i32
    %c0_i32_1 = arith.constant 0 : i32
    return %c0_i32, %c0_i32_0 : i32, i32
  }
  func.func @transform_2(%arg0: i32) -> (i32, i32) {
    %c0_i32 = arith.constant 0 : i32
    %c0_i32_0 = arith.constant 0 : i32
    %c0_i32_1 = arith.constant 0 : i32
    return %c0_i32, %c0_i32_0 : i32, i32
  }
  func.func @transform_3(%arg0: i32) -> (i32, i32) {
    %c0_i32 = arith.constant 0 : i32
    %c0_i32_0 = arith.constant 0 : i32
    %c0_i32_1 = arith.constant 0 : i32
    return %c0_i32, %c0_i32_0 : i32, i32
  }
  func.func @transform_4(%arg0: i32) -> (i32, i32) {
    %c0_i32 = arith.constant 0 : i32
    %c0_i32_0 = arith.constant 0 : i32
    %c0_i32_1 = arith.constant 0 : i32
    return %c0_i32, %c0_i32_0 : i32, i32
  }
  func.func @transform_5(%arg0: i32) -> (i32, i32) {
    %c0_i32 = arith.constant 0 : i32
    %c0_i32_0 = arith.constant 0 : i32
    %c0_i32_1 = arith.constant 0 : i32
    return %c0_i32, %c0_i32_0 : i32, i32
  }
  func.func @transform_6(%arg0: i32) -> (i32, i32) {
    %c0_i32 = arith.constant 0 : i32
    %c0_i32_0 = arith.constant 0 : i32
    %c0_i32_1 = arith.constant 0 : i32
    return %c0_i32, %c0_i32_0 : i32, i32
  }
  func.func @transform_7(%arg0: i32) -> (i32, i32, i32) {
    %c0_i32 = arith.constant 0 : i32
    %c0_i32_0 = arith.constant 0 : i32
    %c0_i32_1 = arith.constant 0 : i32
    return %arg0, %c0_i32, %c0_i32_0 : i32, i32, i32
  }
}

</mosaic_0001>

<bundles_post_ra>
// kernel: tpu_custom_call.1
= control target key start
LH: loop header
LB: loop body
LE: loop exit
PB: predicated region body
PF: predicated region fallthrough
CT: control target
= control target key end

     0   :  { %s4657_s24 = smov 0   ;;  %s6140_s0 = inlined_call_operand.vmem [shape: f32[2,256,16], index: 0, kind: input, shape index: {}]   ;;  %s6141_s1 = inlined_call_operand.vmem [shape: f32[16,4], index: 1, kind: input, shape index: {}]   ;;  %s6142_s2 = inlined_call_operand.vmem [shape: f32[36,4], index: 2, kind: input, shape index: {}]   ;;  %s6143_s3 = inlined_call_operand.vmem [shape: f32[4,16], index: 3, kind: input, shape index: {}]   ;;  %s6144_s4 = inlined_call_operand.vmem [shape: f32[1,4], index: 4, kind: input, shape index: {}]   ;;  %s6145_s5 = inlined_call_operand.vmem [shape: f32[1,4], index: 5, kind: input, shape index: {}]   ;;  %s6146_s6 = inlined_call_operand.vmem [shape: f32[1,16], index: 6, kind: input, shape index: {}]   ;;  %s6147_s7 = inlined_call_operand.vmem [shape: f32[2,256,16], index: 7, kind: output, shape index: {}]  }
   0x1 LB: > { %s4168_s25 = sadd.s32 4294967295, %s4606_s24   ;;  %p4172_p0 = scmp.ge.s32.totalorder %s4606_s24, 1  ;;  %s4606_s24 = sphi %s4657_s24, %s17_s24  }
   0x2   : > { %p237_p1 = scmp.lt.s32.totalorder %s4606_s24, 3 }
   0x4   : > { %p238_p2 = pnand %p4172_p0, %p237_p1 }
   0x5   : > { %p269_p3 = scmp.lt.s32.totalorder (!%p238_p2), %s4168_s25, 1  ;;  %s4609_s11 = smov (!%p238_p2), 124  }
   0x6   : > { %241 = sbr.rel (%p238_p2) target bundleno = 1372 (0x55c), region = 48  ;;  %s4610_s12 = smov (!%p238_p2), 4  }
   0x7   : > { %s4611_s15 = smov (!%p238_p2), 8   ;;  %s4612_s16 = smov (!%p238_p2), 16  }
   0x8   : > { %s4613_s17 = smov (!%p238_p2), 12   ;;  %s4614_s18 = smov (!%p238_p2), 28  }
   0x9   : > { %s4615_s19 = smov (!%p238_p2), 20   ;;  %s4616_s20 = smov (!%p238_p2), 24  }
   0xb   : > { %v312_v0 = vld [vmem:[%s6141_s1 + $0x8] sm:$0xff]  ;;  %v311_v1 = vld [vmem:[%s6141_s1] sm:$0xff]  ;;  %vm1315_vm0 = vcmask 97280   ;;  %v4608_v2 = vmov 0.0   ;;  %s6155_s25 = smov (!%p269_p3, %s4168_s25), 1  ;;  %vm320_vm1 = vcmask 130048   ;;  %v642_v42 = vlaneseq }
   0xc   : > { %4418 = vmatprep.subr.mxu0 %v312_v0  ;;  %4578 = vmatprep.subr.mxu1 %v312_v0  ;;  %1317 = vst.msk [vmem:[#allocation2 + $0x8] sm:$0xff] %vm1315_vm0, %v4608_v2  ;;  %1318 = vst.msk [vmem:[#allocation2 + $0x10] sm:$0xff] %vm1315_vm0, %v4608_v2  ;;  %s4312_s30 = sshll.u32 %s6155_s25, 8  ;;  %vm1322_vm2 = vcmask 31744   ;;  %vm1483_vm3 = vcmask 64544  }
   0xd   : > { %1316 = vst.msk [vmem:[#allocation2] sm:$0xff] %vm1315_vm0, %v4608_v2  ;;  %1319 = vst.msk [vmem:[#allocation2 + $0x118] sm:$0xff] %vm1315_vm0, %v4608_v2  ;;  %4419 = vmatpush3.msra.mxu0 %v312_v0  ;;  %4580 = vmatpush3.msra.mxu1 %v312_v0  ;;  %s4685_s10 = scalar_lea.vmem %s6140_s0, %s4312_s30  ;;  %v4759_v44 = vshrl.u32 %v642_v42, 7  ;;  %v4766_v49 = vld [vmem:[%s6144_s4] ss:$0 sm:$0xff] }
   0xe   : > { %1320 = vst.msk [vmem:[#allocation2 + $0x120] sm:$0xff] %vm1315_vm0, %v4608_v2  ;;  %1321 = vst.msk [vmem:[#allocation2 + $0x128] sm:$0xff] %vm1315_vm0, %v4608_v2  ;;  %4420 = vmatprep.subr.mxu0 %v311_v1  ;;  %4579 = vmatprep.subr.mxu1 %v311_v1  ;;  %v279_v3 = vld [vmem:[%s4685_s10] sm:$0xff]  ;;  %v280_v4 = vld [vmem:[%s4685_s10 + $0x8] sm:$0xff] }
   0xf   : > { %4421 = vmatpush3.msra.mxu0 %v311_v1  ;;  %4581 = vmatpush3.msra.mxu1 %v311_v1  ;;  %v295_v5 = vld [vmem:[%s4685_s10 + $0x80] sm:$0xff]  ;;  %v296_v6 = vld [vmem:[%s4685_s10 + $0x88] sm:$0xff]  ;;  %v281_v7 = vld [vmem:[%s4685_s10 + $0x10] sm:$0xff]  ;;  %v644_v45 = vadd.s32 8, %v4759_v44  ;;  %v660_v46 = vadd.s32 136, %v4759_v44  ;;  %v679_v0 = vand.u32 15, %v4759_v44 }
  0x10   : > { %4422 = vmatprep.mubr.msk.f32.mxu0 %vm320_vm1, %v279_v3  ;;  %4446 = vmatprep.mubr.msk.f32.mxu1 %vm320_vm1, %v295_v5  ;;  %v297_v8 = vld [vmem:[%s4685_s10 + $0x90] sm:$0xff]  ;;  %v282_v9 = vld [vmem:[%s4685_s10 + $0x18] sm:$0xff]  ;;  %v283_v11 = vld [vmem:[%s4685_s10 + $0x20] sm:$0xff]  ;;  %v659_v1 = vadd.s32 128, %v4759_v44 }
  0x11   : > { %4423 = vmatmul.mubr.msk.f32.vlgmr.msra.gmra.mxu0 %vm320_vm1, %v280_v4  ;;  %4447 = vmatmul.mubr.msk.f32.vlgmr.msra.gmra.mxu1 %vm320_vm1, %v296_v6  ;;  %v298_v10 = vld [vmem:[%s4685_s10 + $0x98] sm:$0xff]  ;;  %v299_v12 = vld [vmem:[%s4685_s10 + $0xa0] sm:$0xff]  ;;  %v284_v13 = vld [vmem:[%s4685_s10 + $0x28] sm:$0xff]  ;;  %v686_v47 = vand.u32 15, %v644_v45  ;;  %v798_v48 = vand.u32 15, %v660_v46  ;;  %vm1187_vm6 = vcmp.ne.s32.totalorder %v679_v0, 0 }
  0x12   : > { %4425 = vmatprep.mubr.msk.f32.mxu0 %vm320_vm1, %v281_v7  ;;  %4449 = vmatprep.mubr.msk.f32.mxu1 %vm320_vm1, %v297_v8  ;;  %v300_v14 = vld [vmem:[%s4685_s10 + $0xa8] sm:$0xff]  ;;  %v285_v15 = vld [vmem:[%s4685_s10 + $0x30] sm:$0xff]  ;;  %v286_v18 = vld [vmem:[%s4685_s10 + $0x38] sm:$0xff] }
  0x13   : > { %v301_v16 = vld [vmem:[%s4685_s10 + $0xb0] sm:$0xff]  ;;  %v302_v19 = vld [vmem:[%s4685_s10 + $0xb8] sm:$0xff]  ;;  %v287_v21 = vld [vmem:[%s4685_s10 + $0x40] sm:$0xff]  ;;  %vm1060_vm4 = vcmp.ne.s32.totalorder %v686_v47, 15  ;;  %vm1076_vm5 = vcmp.ne.s32.totalorder %v798_v48, 15 }
  0x14   : > { %v1678_v17 = vld [vmem:[#allocation2 + $0xf] sm:$0xff]  ;;  %v1677_v20 = vld [vmem:[#allocation2 + $0x7] sm:$0xff]  ;;  %v290_v28 = vld [vmem:[%s4685_s10 + $0x58] sm:$0xff]  ;;  %v4210_v58 = vsel %vm1060_vm4, 1.0, %v4608_v2  ;;  %v4218_v59 = vsel %vm1076_vm5, 1.0, %v4608_v2 }
  0x15   : > { %4426 = vmatmul.mubr.msk.f32.gmra.mxu0 %vm320_vm1, %v282_v9  ;;  %4450 = vmatmul.mubr.msk.f32.gmra.mxu1 %vm320_vm1, %v298_v10  ;;  %v303_v22 = vld [vmem:[%s4685_s10 + $0xc0] sm:$0xff]  ;;  %v1870_v23 = vld [vmem:[#allocation2 + $0x10] sm:$0xff]  ;;  %v288_v24 = vld [vmem:[%s4685_s10 + $0x48] sm:$0xff] }
  0x16   : > { %4428 = vmatprep.mubr.msk.f32.mxu0 %vm320_vm1, %v283_v11  ;;  %4452 = vmatprep.mubr.msk.f32.mxu1 %vm320_vm1, %v299_v12  ;;  %v304_v25 = vld [vmem:[%s4685_s10 + $0xc8] sm:$0xff]  ;;  %v289_v26 = vld [vmem:[%s4685_s10 + $0x50] sm:$0xff]  ;;  %v306_v29 = vld [vmem:[%s4685_s10 + $0xd8] sm:$0xff]  ;;  %v791_v11 = vand.u32 15, %v659_v1 }
  0x17   : > { %1743 = vrot.lane.b32.xlu1 %v1678_v17, %s4609_s11  ;;  %1741 = vrot.lane.b32.xlu0 %v1677_v20, %s4609_s11  ;;  %v305_v27 = vld [vmem:[%s4685_s10 + $0xd0] sm:$0xff]  ;;  %v291_v30 = vld [vmem:[%s4685_s10 + $0x60] sm:$0xff]  ;;  %v1869_v38 = vld [vmem:[#allocation2 + $0x8] sm:$0xff] }
  0x18   : > { %v307_v31 = vld [vmem:[%s4685_s10 + $0xe0] sm:$0xff]  ;;  %v292_v32 = vld [vmem:[%s4685_s10 + $0x68] sm:$0xff]  ;;  %v293_v34 = vld [vmem:[%s4685_s10 + $0x70] sm:$0xff]  ;;  %vm4828_vm7 = vcmp.ne.s32.totalorder %v791_v11, 0 }
  0x19   : > { %4429 = vmatmul.mubr.msk.f32.gmra.mxu0 %vm320_vm1, %v284_v13  ;;  %4453 = vmatmul.mubr.msk.f32.gmra.mxu1 %vm320_vm1, %v300_v14  ;;  %v308_v33 = vld [vmem:[%s4685_s10 + $0xe8] sm:$0xff]  ;;  %v309_v35 = vld [vmem:[%s4685_s10 + $0xf0] sm:$0xff]  ;;  %v294_v36 = vld [vmem:[%s4685_s10 + $0x78] sm:$0xff]  ;;  %v646_v14 = vadd.s32 24, %v4759_v44 }
  0x1a   : > { %4431 = vmatprep.mubr.msk.f32.mxu0 %vm320_vm1, %v285_v15  ;;  %4455 = vmatprep.mubr.msk.f32.mxu1 %vm320_vm1, %v301_v16  ;;  %v310_v37 = vld [vmem:[%s4685_s10 + $0xf8] sm:$0xff] }
  0x1b   : > { %1935 = vrot.lane.b32.xlu1 %v1870_v23, %s4610_s12  ;;  %1933 = vrot.lane.b32.xlu0 %v1869_v38, %s4610_s12  ;;  %v645_v23 = vadd.s32 16, %v4759_v44 }
  0x1d   : > { %4432 = vmatmul.mubr.msk.f32.gmra.mxu0 %vm320_vm1, %v286_v18  ;;  %4456 = vmatmul.mubr.msk.f32.gmra.mxu1 %vm320_vm1, %v302_v19  ;;  %v4226_v19 = vsel %vm1187_vm6, 1.0, %v4608_v2 }
  0x1e   : > { %4434 = vmatprep.mubr.msk.f32.mxu0 %vm320_vm1, %v287_v21  ;;  %4458 = vmatprep.mubr.msk.f32.mxu1 %vm320_vm1, %v303_v22  ;;  %v664_v22 = vadd.s32 168, %v4759_v44 }
  0x21   : > { %4435 = vmatmul.mubr.msk.f32.gmra.mxu0 %vm320_vm1, %v288_v24  ;;  %4459 = vmatmul.mubr.msk.f32.gmra.mxu1 %vm320_vm1, %v304_v25 }
  0x22   : > { %4437 = vmatprep.mubr.msk.f32.mxu0 %vm320_vm1, %v289_v26  ;;  %4461 = vmatprep.mubr.msk.f32.mxu1 %vm320_vm1, %v305_v27  ;;  %v700_v26 = vand.u32 15, %v646_v14 }
  0x24   : > { %vm4871_vm8 = vcmp.ne.s32.totalorder %v700_v26, 15 }
  0x25   : > { %4438 = vmatmul.mubr.msk.f32.gmra.mxu0 %vm320_vm1, %v290_v28  ;;  %4462 = vmatmul.mubr.msk.f32.gmra.mxu1 %vm320_vm1, %v306_v29 }
  0x26   : > { %4440 = vmatprep.mubr.msk.f32.mxu0 %vm320_vm1, %v291_v30  ;;  %4464 = vmatprep.mubr.msk.f32.mxu1 %vm320_vm1, %v307_v31  ;;  %v662_v30 = vadd.s32 152, %v4759_v44 }
  0x28   : > { %v812_v45 = vand.u32 15, %v662_v30 }
  0x29   : > { %4441 = vmatmul.mubr.msk.f32.gmra.mxu0 %vm320_vm1, %v292_v32  ;;  %4465 = vmatmul.mubr.msk.f32.gmra.mxu1 %vm320_vm1, %v308_v33  ;;  %v4234_v33 = vsel %vm4828_vm7, 1.0, %v4608_v2 }
  0x2a   : > { %4443 = vmatprep.mubr.msk.f32.mxu0 %vm320_vm1, %v293_v34  ;;  %4467 = vmatprep.mubr.msk.f32.mxu1 %vm320_vm1, %v309_v35  ;;  %vm4904_vm10 = vcmp.ne.s32.totalorder %v812_v45, 15  ;;  %v666_v45 = vadd.s32 184, %v4759_v44 }
  0x2d   : > { %4444 = vmatmul.mubr.msk.f32.gmra.mxu0 %vm320_vm1, %v294_v36  ;;  %4468 = vmatmul.mubr.msk.f32.gmra.mxu1 %vm320_vm1, %v310_v37  ;;  %v693_v36 = vand.u32 15, %v645_v23  ;;  %v661_v37 = vadd.s32 144, %v4759_v44 }
  0x2f   : > { %vm1189_vm9 = vcmp.ne.s32.totalorder %v693_v36, 0 }
  0x89   : > { %v1744_v39 = vpop.permute.xlu1 %1743  ;;  %v1742_v40 = vpop.permute.xlu0 %1741 }
  0x8a   : > { %1838 = vst.msk [vmem:[#allocation3 + $0x8] sm:$0xff] %vm1322_vm2, %v1744_v39  ;;  %1837 = vst.msk [vmem:[#allocation3] sm:$0xff] %vm1322_vm2, %v1742_v40 }
  0x8d   : > { %v1936_v41 = vpop.permute.xlu1 %1935  ;;  %v1934_v43 = vpop.permute.xlu0 %1933 }
  0x8e   : > { %2030 = vst.msk [vmem:[#allocation3 + $0x8] sm:$0xff] %vm1483_vm3, %v1936_v41  ;;  %2029 = vst.msk [vmem:[#allocation3] sm:$0xff] %vm1483_vm3, %v1934_v43 }
  0xd1   : > { %v4424_v50 = vpop.f32.mrf.mxu0  ;;  %v4448_v51 = vpop.f32.mrf.mxu1 }
  0xd2   : > { %v489_v52 = vadd.f32 %v4424_v50, %v4766_v49  ;;  %v569_v53 = vadd.f32 %v4448_v51, %v4766_v49  ;;  %v805_v51 = vand.u32 15, %v661_v37 }
  0xd3   : > { %v483_v54 = vpop.f32.mrf.mxu0  ;;  %v563_v55 = vpop.f32.mrf.mxu1 }
  0xd4   : > { %v484_v56 = vadd.f32 %v4766_v49, %v483_v54  ;;  %1550 = vrot.lane.b32.xlu1 %v489_v52, %s4611_s15  ;;  %v4773_v57 = vadd.f32 %v4766_v49, %v563_v55  ;;  %1324 = vst.msk [vmem:[#allocation2 + $0x20] sm:$0xff] %vm1322_vm2, %v489_v52  ;;  %1340 = vst.msk [vmem:[#allocation2 + $0xa0] sm:$0xff] %vm1322_vm2, %v569_v53  ;;  %v1156_v5 = vmul.f32 %v4210_v58, %v489_v52 }
  0xd5   : > { %v4427_v60 = vpop.f32.mrf.mxu0  ;;  %v4451_v61 = vpop.f32.mrf.mxu1  ;;  %v1172_v6 = vmul.f32 %v4218_v59, %v569_v53  ;;  %v4211_v54 = vsel %vm4871_vm8, 1.0, %v4608_v2  ;;  %vm1205_vm11 = vcmp.ne.s32.totalorder %v805_v51, 0  ;;  %v840_v51 = vand.u32 15, %v666_v45 }
  0xd6   : > { %1387 = vrot.lane.b32.xlu0 %v484_v56, %s4610_s12  ;;  %v4781_v62 = vadd.f32 %v4427_v60, %v4766_v49  ;;  %v4784_v63 = vadd.f32 %v4451_v61, %v4766_v49  ;;  %1323 = vst.msk [vmem:[#allocation2 + $0x18] sm:$0xff] %vm1322_vm2, %v484_v56  ;;  %1339 = vst.msk [vmem:[#allocation2 + $0x98] sm:$0xff] %vm1322_vm2, %v4773_v57  ;;  %v1283_v29 = vmul.f32 %v4226_v19, %v484_v56 }
  0xd7   : > { %v493_v3 = vpop.f32.mrf.mxu0  ;;  %v573_v4 = vpop.f32.mrf.mxu1  ;;  %v1299_v43 = vmul.f32 %v4234_v33, %v4773_v57  ;;  %v4227_v60 = vsel %vm1189_vm9, 1.0, %v4608_v2  ;;  %v648_v61 = vadd.s32 40, %v4759_v44  ;;  %v647_v19 = vadd.s32 32, %v4759_v44 }
  0xd8   : > { %1582 = vrot.lane.b32.xlu1 %v569_v53, %s4611_s15  ;;  %v4793_v7 = vadd.f32 %v4766_v49, %v493_v3  ;;  %v4796_v8 = vadd.f32 %v4766_v49, %v573_v4  ;;  %1326 = vst.msk [vmem:[#allocation2 + $0x30] sm:$0xff] %vm1322_vm2, %v4781_v62  ;;  %1342 = vst.msk [vmem:[#allocation2 + $0xb0] sm:$0xff] %vm1322_vm2, %v4784_v63  ;;  %v1158_v3 = vmul.f32 %v4211_v54, %v4781_v62 }
  0xd9   : > { %v4430_v9 = vpop.f32.mrf.mxu0  ;;  %v4454_v10 = vpop.f32.mrf.mxu1  ;;  %v707_v33 = vand.u32 15, %v647_v19  ;;  %v649_v54 = vadd.s32 48, %v4759_v44  ;;  %vm1082_vm4 = vcmp.ne.s32.totalorder %v840_v51, 15 }
  0xda   : > { %1389 = vrot.lane.b32.xlu0 %v1156_v5, %s4610_s12  ;;  %v4804_v12 = vadd.f32 %v4430_v9, %v4766_v49  ;;  %v4807_v13 = vadd.f32 %v4454_v10, %v4766_v49  ;;  %1325 = vst.msk [vmem:[#allocation2 + $0x28] sm:$0xff] %vm1322_vm2, %v4793_v7  ;;  %1341 = vst.msk [vmem:[#allocation2 + $0xa8] sm:$0xff] %vm1322_vm2, %v4796_v8 }
  0xdb   : > { %v503_v15 = vpop.f32.mrf.mxu0  ;;  %v583_v16 = vpop.f32.mrf.mxu1  ;;  %vm1191_vm13 = vcmp.ne.s32.totalorder %v707_v33, 0  ;;  %v653_v33 = vadd.s32 80, %v4759_v44 }
  0xdc   : > { %1421 = vrot.lane.b32.xlu1 %v1172_v6, %s4610_s12  ;;  %v4816_v17 = vadd.f32 %v4766_v49, %v503_v15  ;;  %v4819_v18 = vadd.f32 %v4766_v49, %v583_v16  ;;  %1328 = vst.msk [vmem:[#allocation2 + $0x40] sm:$0xff] %vm1322_vm2, %v4804_v12  ;;  %1344 = vst.msk [vmem:[#allocation2 + $0xc0] sm:$0xff] %vm1322_vm2, %v4807_v13  ;;  %v4219_v6 = vsel %vm4904_vm10, 1.0, %v4608_v2  ;;  %v4235_v15 = vsel %vm1205_vm11, 1.0, %v4608_v2 }
  0xdd   : > { %v4433_v20 = vpop.f32.mrf.mxu0  ;;  %v4457_v21 = vpop.f32.mrf.mxu1  ;;  %v714_v16 = vand.u32 15, %v648_v61  ;;  %v4228_v37 = vsel %vm1191_vm13, 1.0, %v4608_v2  ;;  %v652_v61 = vadd.s32 72, %v4759_v44 }
  0xde   : > { %1419 = vrot.lane.b32.xlu0 %v4773_v57, %s4610_s12  ;;  %v4834_v24 = vadd.f32 %v4433_v20, %v4766_v49  ;;  %v4837_v25 = vadd.f32 %v4457_v21, %v4766_v49  ;;  %1327 = vst.msk [vmem:[#allocation2 + $0x38] sm:$0xff] %vm1322_vm2, %v4816_v17  ;;  %1343 = vst.msk [vmem:[#allocation2 + $0xb8] sm:$0xff] %vm1322_vm2, %v4819_v18 }
  0xdf   : > { %v513_v27 = vpop.f32.mrf.mxu0  ;;  %v593_v28 = vpop.f32.mrf.mxu1  ;;  %vm1064_vm12 = vcmp.ne.s32.totalorder %v714_v16, 15 }
  0xe0   : > { %1554 = vrot.lane.b32.xlu1 %v4781_v62, %s4611_s15  ;;  %v4847_v31 = vadd.f32 %v4766_v49, %v513_v27  ;;  %v4850_v32 = vadd.f32 %v4766_v49, %v593_v28  ;;  %1330 = vst.msk [vmem:[#allocation2 + $0x50] sm:$0xff] %vm1322_vm2, %v4834_v24  ;;  %1346 = vst.msk [vmem:[#allocation2 + $0xd0] sm:$0xff] %vm1322_vm2, %v4837_v25  ;;  %v1285_v62 = vmul.f32 %v4227_v60, %v4793_v7 }
  0xe1   : > { %v4436_v34 = vpop.f32.mrf.mxu0  ;;  %v4460_v35 = vpop.f32.mrf.mxu1 }
  0xe2   : > { %1548 = vrot.lane.b32.xlu0 %v1283_v29, %s4611_s15  ;;  %v4862_v38 = vadd.f32 %v4436_v34, %v4766_v49  ;;  %v4865_v39 = vadd.f32 %v4460_v35, %v4766_v49  ;;  %1329 = vst.msk [vmem:[#allocation2 + $0x48] sm:$0xff] %vm1322_vm2, %v4847_v31  ;;  %1345 = vst.msk [vmem:[#allocation2 + $0xc8] sm:$0xff] %vm1322_vm2, %v4850_v32  ;;  %v826_v34 = vand.u32 15, %v664_v22  ;;  %v663_v35 = vadd.s32 160, %v4759_v44 }
  0xe3   : > { %v523_v41 = vpop.f32.mrf.mxu0  ;;  %v603_v42 = vpop.f32.mrf.mxu1 }
  0xe4   : > { %1586 = vrot.lane.b32.xlu1 %v4784_v63, %s4611_s15  ;;  %v4879_v46 = vadd.f32 %v4766_v49, %v523_v41  ;;  %v4882_v47 = vadd.f32 %v4766_v49, %v603_v42  ;;  %1332 = vst.msk [vmem:[#allocation2 + $0x60] sm:$0xff] %vm1322_vm2, %v4862_v38  ;;  %1348 = vst.msk [vmem:[#allocation2 + $0xe0] sm:$0xff] %vm1322_vm2, %v4865_v39  ;;  %vm1080_vm14 = vcmp.ne.s32.totalorder %v826_v34, 15  ;;  %v650_v41 = vadd.s32 56, %v4759_v44 }
  0xe5   : > { %v4439_v48 = vpop.f32.mrf.mxu0  ;;  %v4463_v50 = vpop.f32.mrf.mxu1  ;;  %v4220_v40 = vsel %vm1080_vm14, 1.0, %v4608_v2  ;;  %v1287_v42 = vmul.f32 %v4228_v37, %v4816_v17  ;;  %v669_v34 = vadd.s32 208, %v4759_v44  ;;  %v656_v37 = vadd.s32 104, %v4759_v44 }
  0xe6   : > { %1580 = vrot.lane.b32.xlu0 %v1299_v43, %s4611_s15  ;;  %v4890_v52 = vadd.f32 %v4439_v48, %v4766_v49  ;;  %v4893_v53 = vadd.f32 %v4463_v50, %v4766_v49  ;;  %1331 = vst.msk [vmem:[#allocation2 + $0x58] sm:$0xff] %vm1322_vm2, %v4879_v46  ;;  %1347 = vst.msk [vmem:[#allocation2 + $0xd8] sm:$0xff] %vm1322_vm2, %v4882_v47  ;;  %v1176_v43 = vmul.f32 %v4220_v40, %v4807_v13 }
  0xe7   : > { %v533_v55 = vpop.f32.mrf.mxu0  ;;  %v613_v56 = vpop.f32.mrf.mxu1  ;;  %v728_v48 = vand.u32 15, %v650_v41  ;;  %v672_v40 = vadd.s32 232, %v4759_v44 }
  0xe8   : > { %1391 = vrot.lane.b32.xlu1 %v4793_v7, %s4610_s12  ;;  %v4909_v58 = vadd.f32 %v4766_v49, %v533_v55  ;;  %v4912_v59 = vadd.f32 %v4766_v49, %v613_v56  ;;  %1334 = vst.msk [vmem:[#allocation2 + $0x70] sm:$0xff] %vm1322_vm2, %v4890_v52  ;;  %1350 = vst.msk [vmem:[#allocation2 + $0xf0] sm:$0xff] %vm1322_vm2, %v4893_v53  ;;  %v1174_v7 = vmul.f32 %v4219_v6, %v4784_v63 }
  0xe9   : > { %v4442_v0 = vpop.f32.mrf.mxu0  ;;  %v4466_v1 = vpop.f32.mrf.mxu1  ;;  %v1301_v63 = vmul.f32 %v4235_v15, %v4796_v8  ;;  %vm1066_vm0 = vcmp.ne.s32.totalorder %v728_v48, 15  ;;  %v721_v55 = vand.u32 15, %v649_v54  ;;  %v671_v48 = vadd.s32 224, %v4759_v44 }
  0xea   : > { %1423 = vrot.lane.b32.xlu0 %v4796_v8, %s4610_s12  ;;  %v4924_v4 = vadd.f32 %v4442_v0, %v4766_v49  ;;  %v4927_v5 = vadd.f32 %v4466_v1, %v4766_v49  ;;  %1333 = vst.msk [vmem:[#allocation2 + $0x68] sm:$0xff] %vm1322_vm2, %v4909_v58  ;;  %1349 = vst.msk [vmem:[#allocation2 + $0xe8] sm:$0xff] %vm1322_vm2, %v4912_v59  ;;  %v4212_v8 = vsel %vm1064_vm12, 1.0, %v4608_v2  ;;  %v668_v0 = vadd.s32 200, %v4759_v44 }
  0xeb   : > { %v543_v9 = vpop.f32.mrf.mxu0  ;;  %v623_v10 = vpop.f32.mrf.mxu1  ;;  %v1160_v36 = vmul.f32 %v4212_v8, %v4804_v12  ;;  %vm1193_vm5 = vcmp.ne.s32.totalorder %v721_v55, 0  ;;  %v749_v8 = vand.u32 15, %v653_v33  ;;  %v875_v54 = vand.u32 15, %v671_v48 }
  0xec   : > { %1393 = vrot.lane.b32.xlu1 %v1158_v3, %s4610_s12  ;;  %v4939_v11 = vadd.f32 %v4766_v49, %v543_v9  ;;  %v4942_v14 = vadd.f32 %v4766_v49, %v623_v10  ;;  %1336 = vst.msk [vmem:[#allocation2 + $0x80] sm:$0xff] %vm1322_vm2, %v4924_v4  ;;  %1352 = vst.msk [vmem:[#allocation2 + $0x100] sm:$0xff] %vm1322_vm2, %v4927_v5  ;;  %v4229_v1 = vsel %vm1193_vm5, 1.0, %v4608_v2  ;;  %v742_v3 = vand.u32 15, %v652_v61 }
  0xed   : > { %v4445_v20 = vpop.f32.mrf.mxu0  ;;  %v4469_v21 = vpop.f32.mrf.mxu1  ;;  %v854_v6 = vand.u32 15, %v668_v0  ;;  %v651_v10 = vadd.s32 64, %v4759_v44  ;;  %vm1197_vm13 = vcmp.ne.s32.totalorder %v749_v8, 0  ;;  %vm1215_vm5 = vcmp.ne.s32.totalorder %v875_v54, 0 }
  0xee   : > { %1552 = vrot.lane.b32.xlu0 %v1285_v62, %s4611_s15  ;;  %v4954_v23 = vadd.f32 %v4445_v20, %v4766_v49  ;;  %1335 = vst.msk [vmem:[#allocation2 + $0x78] sm:$0xff] %vm1322_vm2, %v4939_v11  ;;  %1351 = vst.msk [vmem:[#allocation2 + $0xf8] sm:$0xff] %vm1322_vm2, %v4942_v14  ;;  %v4961_v26 = vadd.f32 %v4469_v21, %v4766_v49  ;;  %vm1068_vm7 = vcmp.ne.s32.totalorder %v742_v3, 15  ;;  %v667_v62 = vadd.s32 192, %v4759_v44 }
  0xef   : > { %v553_v27 = vpop.f32.mrf.mxu0  ;;  %v633_v28 = vpop.f32.mrf.mxu1  ;;  %vm1084_vm8 = vcmp.ne.s32.totalorder %v854_v6, 15  ;;  %v4214_v15 = vsel %vm1068_vm7, 1.0, %v4608_v2  ;;  %v735_v16 = vand.u32 15, %v651_v10  ;;  %v654_v21 = vadd.s32 88, %v4759_v44 }
  0xf0   : > { %1425 = vrot.lane.b32.xlu1 %v1174_v7, %s4610_s12  ;;  %1338 = vst.msk [vmem:[#allocation2 + $0x90] sm:$0xff] %vm1322_vm2, %v4954_v23  ;;  %v4968_v29 = vadd.f32 %v4766_v49, %v553_v27  ;;  %1354 = vst.msk [vmem:[#allocation2 + $0x110] sm:$0xff] %vm1322_vm2, %v4961_v26  ;;  %v4973_v30 = vadd.f32 %v4766_v49, %v633_v28  ;;  %v819_v49 = vand.u32 15, %v663_v35  ;;  %v847_v19 = vand.u32 15, %v667_v62 }
  0xf1   : > { %vm1195_vm9 = vcmp.ne.s32.totalorder %v735_v16, 0  ;;  %v670_v7 = vadd.s32 216, %v4759_v44  ;;  %v756_v27 = vand.u32 15, %v654_v21  ;;  %v4231_v41 = vsel %vm1197_vm13, 1.0, %v4608_v2 }
  0xf2   : > { %1584 = vrot.lane.b32.xlu0 %v1301_v63, %s4611_s15  ;;  %1337 = vst.msk [vmem:[#allocation2 + $0x88] sm:$0xff] %vm1322_vm2, %v4968_v29  ;;  %1353 = vst.msk [vmem:[#allocation2 + $0x108] sm:$0xff] %vm1322_vm2, %v4973_v30  ;;  %vm1207_vm15 = vcmp.ne.s32.totalorder %v819_v49, 0  ;;  %vm1211_vm10 = vcmp.ne.s32.totalorder %v847_v19, 0  ;;  %v4230_v22 = vsel %vm1195_vm9, 1.0, %v4608_v2  ;;  %v861_v49 = vand.u32 15, %v669_v34 }
  0xf3   : > { %v868_v28 = vand.u32 15, %v670_v7  ;;  %vm1070_vm11 = vcmp.ne.s32.totalorder %v756_v27, 15  ;;  %v674_v55 = vadd.s32 248, %v4759_v44  ;;  %vm2478_vm13 = vcmask 162944  }
  0xf4   : > { %1558 = vrot.lane.b32.xlu1 %v4804_v12, %s4611_s15  ;;  %v4236_v12 = vsel %vm1207_vm15, 1.0, %v4608_v2  ;;  %v4215_v35 = vsel %vm1070_vm11, 1.0, %v4608_v2  ;;  %vm1213_vm14 = vcmp.ne.s32.totalorder %v861_v49, 0  ;;  %vm3424_vm11 = vcmask 1043456  }
  0xf5   : > { %v1303_v50 = vmul.f32 %v4236_v12, %v4819_v18  ;;  %vm1086_vm12 = vcmp.ne.s32.totalorder %v868_v28, 15  ;;  %v655_v12 = vadd.s32 96, %v4759_v44 }
  0xf6   : > { %1395 = vrot.lane.b32.xlu0 %v4816_v17, %s4610_s12  ;;  %v4213_v17 = vsel %vm1066_vm0, 1.0, %v4608_v2 }
  0xf7   : > { %v1162_v56 = vmul.f32 %v4213_v17, %v4834_v24  ;;  %v763_v51 = vand.u32 15, %v655_v12  ;;  %v658_v17 = vadd.s32 120, %v4759_v44 }
  0xf8   : > { %1590 = vrot.lane.b32.xlu1 %v4807_v13, %s4611_s15  ;;  %v665_v13 = vadd.s32 176, %v4759_v44 }
  0xfa   : > { %1427 = vrot.lane.b32.xlu0 %v4819_v18, %s4610_s12  ;;  %v4221_v18 = vsel %vm1082_vm4, 1.0, %v4608_v2  ;;  %v833_v57 = vand.u32 15, %v665_v13  ;;  %vm1199_vm4 = vcmp.ne.s32.totalorder %v763_v51, 0 }
  0xfb   : > { %v1178_v60 = vmul.f32 %v4221_v18, %v4837_v25  ;;  %v4232_v18 = vsel %vm1199_vm4, 1.0, %v4608_v2  ;;  %vm3250_vm4 = vcmask 294144  }
  0xfc   : > { %1397 = vrot.lane.b32.xlu1 %v1160_v36, %s4610_s12  ;;  %vm1209_vm6 = vcmp.ne.s32.totalorder %v833_v57, 0  ;;  %v4240_v57 = vsel %vm1215_vm5, 1.0, %v4608_v2  ;;  %vm3327_vm5 = vcmask 293888  }
  0xfd   : > { %v1311_v61 = vmul.f32 %v4240_v57, %v4942_v14 }
  0xfe   : > { %1556 = vrot.lane.b32.xlu0 %v1287_v42, %s4611_s15  ;;  %v770_v42 = vand.u32 15, %v656_v37 }
 0x100   : > { %1429 = vrot.lane.b32.xlu1 %v1176_v43, %s4610_s12  ;;  %v882_v43 = vand.u32 15, %v672_v40  ;;  %vm1072_vm15 = vcmp.ne.s32.totalorder %v770_v42, 15 }
 0x102   : > { %1588 = vrot.lane.b32.xlu0 %v1303_v50, %s4611_s15  ;;  %vm1088_vm0 = vcmp.ne.s32.totalorder %v882_v43, 15  ;;  %v4216_v50 = vsel %vm1072_vm15, 1.0, %v4608_v2  ;;  %vm2864_vm15 = vcmask 228544  }
 0x104   : > { %1562 = vrot.lane.b32.xlu1 %v4834_v24, %s4611_s15  ;;  %v4237_v24 = vsel %vm1209_vm6, 1.0, %v4608_v2 }
 0x105   : > { %v1305_v9 = vmul.f32 %v4237_v24, %v4850_v32 }
 0x106   : > { %1399 = vrot.lane.b32.xlu0 %v4847_v31, %s4610_s12 }
 0x108   : > { %1594 = vrot.lane.b32.xlu1 %v4837_v25, %s4611_s15  ;;  %v1289_v25 = vmul.f32 %v4229_v1, %v4847_v31  ;;  %v4222_v31 = vsel %vm1084_vm8, 1.0, %v4608_v2  ;;  %v657_v1 = vadd.s32 112, %v4759_v44 }
 0x109   : > { %v1180_v20 = vmul.f32 %v4222_v31, %v4865_v39 }
 0x10a   : > { %1431 = vrot.lane.b32.xlu0 %v4850_v32, %s4610_s12  ;;  %v1164_v32 = vmul.f32 %v4214_v15, %v4862_v38 }
 0x10c   : > { %1401 = vrot.lane.b32.xlu1 %v1162_v56, %s4610_s12  ;;  %v784_v56 = vand.u32 15, %v658_v17 }
 0x10e   : > { %1433 = vrot.lane.b32.xlu0 %v1178_v60, %s4610_s12  ;;  %v896_v60 = vand.u32 15, %v674_v55  ;;  %vm1074_vm6 = vcmp.ne.s32.totalorder %v784_v56, 15  ;;  %v3317_v56 = vld [vmem:[%s6142_s2 + $0x10] sm:$0xff] }
 0x10f   : > { %v4217_v3 = vsel %vm1074_vm6, 1.0, %v4608_v2 }
 0x110   : > { %1566 = vrot.lane.b32.xlu1 %v4862_v38, %s4611_s15  ;;  %v4238_v38 = vsel %vm1211_vm10, 1.0, %v4608_v2  ;;  %vm1090_vm7 = vcmp.ne.s32.totalorder %v896_v60, 15  ;;  %v1170_v6 = vmul.f32 %v4217_v3, %v4954_v23  ;;  %vm1644_vm10 = vcmask 97344   ;;  %v3316_v60 = vld [vmem:[%s6142_s2 + $0x8] sm:$0xff] }
 0x111   : > { %v1307_v63 = vmul.f32 %v4238_v38, %v4882_v47 }
 0x112   : > { %1560 = vrot.lane.b32.xlu0 %v1289_v25, %s4611_s15  ;;  %v4225_v25 = vsel %vm1090_vm7, 1.0, %v4608_v2 }
 0x113   : > { %v1186_v10 = vmul.f32 %v4225_v25, %v4961_v26 }
 0x114   : > { %1592 = vrot.lane.b32.xlu1 %v1305_v9, %s4611_s15 }
 0x116   : > { %1403 = vrot.lane.b32.xlu0 %v4879_v46, %s4610_s12 }
 0x118   : > { %1598 = vrot.lane.b32.xlu1 %v4865_v39, %s4611_s15  ;;  %v1291_v39 = vmul.f32 %v4230_v22, %v4879_v46  ;;  %v4223_v46 = vsel %vm1086_vm12, 1.0, %v4608_v2  ;;  %vm2285_vm12 = vcmask 130144  }
 0x119   : > { %v1182_v36 = vmul.f32 %v4223_v46, %v4893_v53 }
 0x11a   : > { %1435 = vrot.lane.b32.xlu0 %v4882_v47, %s4610_s12  ;;  %v1166_v47 = vmul.f32 %v4215_v35, %v4890_v52 }
 0x11c   : > { %1405 = vrot.lane.b32.xlu1 %v1164_v32, %s4610_s12  ;;  %v2061_v32 = vld [vmem:[#allocation2 + $0x9] sm:$0xff] }
 0x11d   : > { %2093 = vst.msk [vmem:[#allocation3] sm:$0xff] %vm1644_vm10, %v2061_v32 }
 0x11e   : > { %1437 = vrot.lane.b32.xlu0 %v1180_v20, %s4610_s12 }
 0x120   : > { %1570 = vrot.lane.b32.xlu1 %v4890_v52, %s4611_s15  ;;  %v4239_v52 = vsel %vm1213_vm14, 1.0, %v4608_v2  ;;  %vm2671_vm14 = vcmask 195744  }
 0x121   : > { %v1309_v45 = vmul.f32 %v4239_v52, %v4912_v59 }
 0x122   : > { %1564 = vrot.lane.b32.xlu0 %v1291_v39, %s4611_s15 }
 0x124   : > { %1596 = vrot.lane.b32.xlu1 %v1307_v63, %s4611_s15 }
 0x126   : > { %1407 = vrot.lane.b32.xlu0 %v4909_v58, %s4610_s12 }
 0x128   : > { %1602 = vrot.lane.b32.xlu1 %v4893_v53, %s4611_s15  ;;  %v1293_v53 = vmul.f32 %v4231_v41, %v4909_v58  ;;  %v4224_v58 = vsel %vm1088_vm0, 1.0, %v4608_v2  ;;  %vm3057_vm0 = vcmask 261344  }
 0x129   : > { %v1184_v13 = vmul.f32 %v4224_v58, %v4927_v5 }
 0x12a   : > { %1439 = vrot.lane.b32.xlu0 %v4912_v59, %s4610_s12  ;;  %v1168_v59 = vmul.f32 %v4216_v50, %v4924_v4 }
 0x12c   : > { %1409 = vrot.lane.b32.xlu1 %v1166_v47, %s4610_s12 }
 0x12e   : > { %1441 = vrot.lane.b32.xlu0 %v1182_v36, %s4610_s12 }
 0x130   : > { %1574 = vrot.lane.b32.xlu1 %v4924_v4, %s4611_s15  ;;  %v673_v4 = vadd.s32 240, %v4759_v44 }
 0x132   : > { %1568 = vrot.lane.b32.xlu0 %v1293_v53, %s4611_s15  ;;  %v889_v0 = vand.u32 15, %v673_v4 }
 0x134   : > { %1600 = vrot.lane.b32.xlu1 %v1309_v45, %s4611_s15  ;;  %vm1217_vm8 = vcmp.ne.s32.totalorder %v889_v0, 0  ;;  %v3315_v0 = vld [vmem:[%s6142_s2] sm:$0xff] }
 0x135   : > { %v4241_v44 = vsel %vm1217_vm8, 1.0, %v4608_v2 }
 0x136   : > { %1411 = vrot.lane.b32.xlu0 %v4939_v11, %s4610_s12  ;;  %v1313_v15 = vmul.f32 %v4241_v44, %v4973_v30 }
 0x138   : > { %1606 = vrot.lane.b32.xlu1 %v4927_v5, %s4611_s15  ;;  %v1295_v5 = vmul.f32 %v4232_v18, %v4939_v11  ;;  %v777_v11 = vand.u32 15, %v657_v1  ;;  %v3318_v18 = vld [vmem:[%s6142_s2 + $0x18] sm:$0xff] }
 0x13a   : > { %1443 = vrot.lane.b32.xlu0 %v4942_v14, %s4610_s12  ;;  %vm1201_vm9 = vcmp.ne.s32.totalorder %v777_v11, 0 }
 0x13c   : > { %1413 = vrot.lane.b32.xlu1 %v1168_v59, %s4610_s12 }
 0x13e   : > { %1445 = vrot.lane.b32.xlu0 %v1184_v13, %s4610_s12  ;;  %v3319_v13 = vld [vmem:[%s6142_s2 + $0x20] sm:$0xf] }
 0x13f   : > { %4470 = vmatprep.subr.msk.mxu1 %vm3424_vm11, %v3319_v13 }
 0x140   : > { %1578 = vrot.lane.b32.xlu1 %v4954_v23, %s4611_s15  ;;  %v4233_v23 = vsel %vm1201_vm9, 1.0, %v4608_v2  ;;  %4471 = vmatpush3.msk.msra.mxu1 %vm3424_vm11, %v3319_v13 }
 0x141   : > { %v1297_v31 = vmul.f32 %v4233_v23, %v4968_v29  ;;  %4472 = vmatprep.subr.mxu1 %v3318_v18 }
 0x142   : > { %1572 = vrot.lane.b32.xlu0 %v1295_v5, %s4611_s15  ;;  %4473 = vmatpush3.msra.mxu1 %v3318_v18 }
 0x143   : > { %4474 = vmatprep.subr.mxu1 %v3317_v56 }
 0x144   : > { %1604 = vrot.lane.b32.xlu1 %v1311_v61, %s4611_s15  ;;  %4475 = vmatpush3.msra.mxu1 %v3317_v56 }
 0x145   : > { %4476 = vmatprep.subr.mxu1 %v3316_v60 }
 0x146   : > { %v1551_v24 = vpop.permute.xlu1 %1550  ;;  %1415 = vrot.lane.b32.xlu0 %v4968_v29, %s4610_s12  ;;  %4477 = vmatpush3.msra.mxu1 %v3316_v60 }
 0x147   : > { %4478 = vmatprep.subr.mxu1 %v3315_v0 }
 0x148   : > { %1610 = vrot.lane.b32.xlu1 %v4961_v26, %s4611_s15  ;;  %v1388_v14 = vpop.permute.xlu0 %1387  ;;  %4479 = vmatpush3.msra.mxu1 %v3315_v0 }
 0x149   : > { %1484 = vst.msk [vmem:[#allocation2 + $0x18] sm:$0xff] %vm1483_vm3, %v1388_v14 }
 0x14a   : > { %v1583_v9 = vpop.permute.xlu1 %1582  ;;  %1447 = vrot.lane.b32.xlu0 %v4973_v30, %s4610_s12 }
 0x14c   : > { %1417 = vrot.lane.b32.xlu1 %v1170_v6, %s4610_s12  ;;  %v1390_v62 = vpop.permute.xlu0 %1389 }
 0x14d   : > { %1485 = vst.msk [vmem:[#allocation2 + $0x20] sm:$0xff] %vm1483_vm3, %v1390_v62 }
 0x14e   : > { %1646 = vst.msk [vmem:[#allocation2 + $0x20] sm:$0xff] %vm1644_vm10, %v1551_v24  ;;  %v1422_v16 = vpop.permute.xlu1 %1421  ;;  %1449 = vrot.lane.b32.xlu0 %v1186_v10, %s4610_s12 }
 0x14f   : > { %1501 = vst.msk [vmem:[#allocation2 + $0xa0] sm:$0xff] %vm1483_vm3, %v1422_v16 }
 0x150   : > { %1662 = vst.msk [vmem:[#allocation2 + $0xa0] sm:$0xff] %vm1644_vm10, %v1583_v9  ;;  %1608 = vrot.lane.b32.xlu1 %v1313_v15, %s4611_s15  ;;  %v1420_v26 = vpop.permute.xlu0 %1419 }
 0x151   : > { %1500 = vst.msk [vmem:[#allocation2 + $0x98] sm:$0xff] %vm1483_vm3, %v1420_v26 }
 0x152   : > { %v1555_v2 = vpop.permute.xlu1 %1554  ;;  %1576 = vrot.lane.b32.xlu0 %v1297_v31, %s4611_s15 }
 0x154   : > { %v1549_v30 = vpop.permute.xlu0 %1548 }
 0x155   : > { %1645 = vst.msk [vmem:[#allocation2 + $0x18] sm:$0xff] %vm1644_vm10, %v1549_v30  ;;  %v2319_v19 = vld [vmem:[#allocation2 + $0x20] sm:$0xff] }
 0x156   : > { %v1587_v20 = vpop.permute.xlu1 %1586  ;;  %2384 = vrot.lane.b32.xlu0 %v2319_v19, %s4612_s16 }
 0x158   : > { %v1581_v21 = vpop.permute.xlu0 %1580 }
 0x159   : > { %1661 = vst.msk [vmem:[#allocation2 + $0x98] sm:$0xff] %vm1644_vm10, %v1581_v21 }
 0x15a   : > { %v1392_v29 = vpop.permute.xlu1 %1391  ;;  %1939 = vrot.lane.b32.xlu0 %v2319_v19, %s4610_s12 }
 0x15b   : > { %1486 = vst.msk [vmem:[#allocation2 + $0x28] sm:$0xff] %vm1483_vm3, %v1392_v29 }
 0x15c   : > { %v1424_v7 = vpop.permute.xlu0 %1423  ;;  %v1679_v22 = vld [vmem:[#allocation2 + $0x17] sm:$0xff]  ;;  %v2126_v63 = vld [vmem:[#allocation2 + $0x1f] sm:$0xff] }
 0x15d   : > { %1502 = vst.msk [vmem:[#allocation2 + $0xa8] sm:$0xff] %vm1483_vm3, %v1424_v7  ;;  %1745 = vrot.lane.b32.xlu1 %v1679_v22, %s4609_s11  ;;  %v2062_v27 = vld [vmem:[#allocation2 + $0x11] sm:$0xff]  ;;  %v5147_v46 = vld [vmem:[#allocation2 + $0x19] sm:$0xff] }
 0x15e   : > { %v1394_v38 = vpop.permute.xlu1 %1393  ;;  %2189 = vrot.lane.b32.xlu0 %v1679_v22, %s4611_s15  ;;  %2094 = vst.msk [vmem:[#allocation3 + $0x8] sm:$0xff] %vm1644_vm10, %v2062_v27  ;;  %v2318_v28 = vld [vmem:[#allocation2 + $0x18] sm:$0xff] }
 0x15f   : > { %1487 = vst.msk [vmem:[#allocation2 + $0x30] sm:$0xff] %vm1483_vm3, %v1394_v38 }
 0x160   : > { %1648 = vst.msk [vmem:[#allocation2 + $0x30] sm:$0xff] %vm1644_vm10, %v1555_v2  ;;  %v1553_v39 = vpop.permute.xlu0 %1552 }
 0x161   : > { %1647 = vst.msk [vmem:[#allocation2 + $0x28] sm:$0xff] %vm1644_vm10, %v1553_v39  ;;  %2382 = vrot.lane.b32.xlu1 %v2318_v28, %s4612_s16 }
 0x162   : > { %v1426_v33 = vpop.permute.xlu1 %1425  ;;  %2191 = vrot.lane.b32.xlu0 %v2126_v63, %s4611_s15 }
 0x163   : > { %1503 = vst.msk [vmem:[#allocation2 + $0xb0] sm:$0xff] %vm1483_vm3, %v1426_v33 }
 0x164   : > { %1664 = vst.msk [vmem:[#allocation2 + $0xb0] sm:$0xff] %vm1644_vm10, %v1587_v20  ;;  %v1585_v34 = vpop.permute.xlu0 %1584 }
 0x165   : > { %1663 = vst.msk [vmem:[#allocation2 + $0xa8] sm:$0xff] %vm1644_vm10, %v1585_v34  ;;  %1937 = vrot.lane.b32.xlu1 %v2318_v28, %s4610_s12 }
 0x166   : > { %v1559_v35 = vpop.permute.xlu1 %1558  ;;  %1747 = vrot.lane.b32.xlu0 %v2126_v63, %s4609_s11 }
 0x167   : > { %v1874_v47 = vld [vmem:[#allocation2 + $0x30] sm:$0xff] }
 0x168   : > { %v1396_v8 = vpop.permute.xlu0 %1395  ;;  %v2704_v37 = vld [vmem:[#allocation2 + $0x27] sm:$0xff]  ;;  %v2705_v42 = vld [vmem:[#allocation2 + $0x2f] sm:$0xff] }
 0x169   : > { %1488 = vst.msk [vmem:[#allocation2 + $0x38] sm:$0xff] %vm1483_vm3, %v1396_v8  ;;  %2575 = vrot.lane.b32.xlu1 %v5147_v46, %s4613_s17  ;;  %v5163_v43 = vld [vmem:[#allocation2 + $0x21] sm:$0xff]  ;;  %v5174_v58 = vld [vmem:[#allocation2 + $0x29] sm:$0xff] }
 0x16a   : > { %v1591_v49 = vpop.permute.xlu1 %1590  ;;  %1943 = vrot.lane.b32.xlu0 %v1874_v47, %s4610_s12  ;;  %v2320_v48 = vld [vmem:[#allocation2 + $0x28] sm:$0xff] }
 0x16c   : > { %v1428_v36 = vpop.permute.xlu0 %1427 }
 0x16d   : > { %1504 = vst.msk [vmem:[#allocation2 + $0xb8] sm:$0xff] %vm1483_vm3, %v1428_v36  ;;  %2963 = vrot.lane.b32.xlu1 %v1874_v47, %s4614_s18 }
 0x16e   : > { %v1398_v40 = vpop.permute.xlu1 %1397  ;;  %2768 = vrot.lane.b32.xlu0 %v2704_v37, %s4615_s19 }
 0x16f   : > { %1489 = vst.msk [vmem:[#allocation2 + $0x40] sm:$0xff] %vm1483_vm3, %v1398_v40 }
 0x170   : > { %1650 = vst.msk [vmem:[#allocation2 + $0x40] sm:$0xff] %vm1644_vm10, %v1559_v35  ;;  %v1557_v41 = vpop.permute.xlu0 %1556 }
 0x171   : > { %1649 = vst.msk [vmem:[#allocation2 + $0x38] sm:$0xff] %vm1644_vm10, %v1557_v41  ;;  %2388 = vrot.lane.b32.xlu1 %v1874_v47, %s4612_s16 }
 0x172   : > { %v1430_v52 = vpop.permute.xlu1 %1429  ;;  %2770 = vrot.lane.b32.xlu0 %v2705_v42, %s4615_s19 }
 0x173   : > { %1505 = vst.msk [vmem:[#allocation2 + $0xc0] sm:$0xff] %vm1483_vm3, %v1430_v52 }
 0x174   : > { %1666 = vst.msk [vmem:[#allocation2 + $0xc0] sm:$0xff] %vm1644_vm10, %v1591_v49  ;;  %v1589_v53 = vpop.permute.xlu0 %1588 }
 0x175   : > { %1665 = vst.msk [vmem:[#allocation2 + $0xb8] sm:$0xff] %vm1644_vm10, %v1589_v53  ;;  %2577 = vrot.lane.b32.xlu1 %v5163_v43, %s4613_s17 }
 0x176   : > { %v1563_v45 = vpop.permute.xlu1 %1562  ;;  %1749 = vrot.lane.b32.xlu0 %v2704_v37, %s4609_s11 }
 0x177   : > { %v2900_v5 = vld [vmem:[#allocation2 + $0x40] sm:$0xff] }
 0x178   : > { %v1400_v12 = vpop.permute.xlu0 %1399  ;;  %v2706_v3 = vld [vmem:[#allocation2 + $0x37] sm:$0xff]  ;;  %v2707_v14 = vld [vmem:[#allocation2 + $0x3f] sm:$0xff] }
 0x179   : > { %1490 = vst.msk [vmem:[#allocation2 + $0x48] sm:$0xff] %vm1483_vm3, %v1400_v12  ;;  %2193 = vrot.lane.b32.xlu1 %v2704_v37, %s4611_s15  ;;  %v5214_v25 = vld [vmem:[#allocation2 + $0x31] sm:$0xff]  ;;  %v5231_v16 = vld [vmem:[#allocation2 + $0x39] sm:$0xff] }
 0x17a   : > { %v1595_v50 = vpop.permute.xlu1 %1594  ;;  %2386 = vrot.lane.b32.xlu0 %v2320_v48, %s4612_s16  ;;  %v2322_v62 = vld [vmem:[#allocation2 + $0x38] sm:$0xff] }
 0x17c   : > { %v1432_v51 = vpop.permute.xlu0 %1431 }
 0x17d   : > { %1506 = vst.msk [vmem:[#allocation2 + $0xc8] sm:$0xff] %vm1483_vm3, %v1432_v51  ;;  %2961 = vrot.lane.b32.xlu1 %v2320_v48, %s4614_s18 }
 0x17e   : > { %v1402_v59 = vpop.permute.xlu1 %1401  ;;  %3154 = vrot.lane.b32.xlu0 %v5174_v58, %s4616_s20 }
 0x17f   : > { %1491 = vst.msk [vmem:[#allocation2 + $0x50] sm:$0xff] %vm1483_vm3, %v1402_v59 }
 0x180   : > { %1652 = vst.msk [vmem:[#allocation2 + $0x50] sm:$0xff] %vm1644_vm10, %v1563_v45  ;;  %v1434_v54 = vpop.permute.xlu0 %1433 }
 0x181   : > { %1507 = vst.msk [vmem:[#allocation2 + $0xd0] sm:$0xff] %vm1483_vm3, %v1434_v54  ;;  %2195 = vrot.lane.b32.xlu1 %v2705_v42, %s4611_s15 }
 0x182   : > { %1668 = vst.msk [vmem:[#allocation2 + $0xd0] sm:$0xff] %vm1644_vm10, %v1595_v50  ;;  %v1567_v17 = vpop.permute.xlu1 %1566  ;;  %1941 = vrot.lane.b32.xlu0 %v2320_v48, %s4610_s12 }
 0x184   : > { %v1561_v55 = vpop.permute.xlu0 %1560 }
 0x185   : > { %1651 = vst.msk [vmem:[#allocation2 + $0x48] sm:$0xff] %vm1644_vm10, %v1561_v55  ;;  %1751 = vrot.lane.b32.xlu1 %v2705_v42, %s4609_s11 }
 0x186   : > { %v1593_v4 = vpop.permute.xlu1 %1592  ;;  %2579 = vrot.lane.b32.xlu0 %v5174_v58, %s4613_s17 }
 0x187   : > { %1667 = vst.msk [vmem:[#allocation2 + $0xc8] sm:$0xff] %vm1644_vm10, %v1593_v4  ;;  %v2902_v20 = vld [vmem:[#allocation2 + $0x50] sm:$0xff] }
 0x188   : > { %v1404_v57 = vpop.permute.xlu0 %1403 }
 0x189   : > { %1492 = vst.msk [vmem:[#allocation2 + $0x58] sm:$0xff] %vm1483_vm3, %v1404_v57  ;;  %2967 = vrot.lane.b32.xlu1 %v2900_v5, %s4614_s18 }
 0x18a   : > { %v1599_v61 = vpop.permute.xlu1 %1598  ;;  %1947 = vrot.lane.b32.xlu0 %v2900_v5, %s4610_s12 }
 0x18c   : > { %v1436_v1 = vpop.permute.xlu0 %1435  ;;  %v2708_v7 = vld [vmem:[#allocation2 + $0x47] sm:$0xff]  ;;  %v2709_v39 = vld [vmem:[#allocation2 + $0x4f] sm:$0xff] }
 0x18d   : > { %1508 = vst.msk [vmem:[#allocation2 + $0xd8] sm:$0xff] %vm1483_vm3, %v1436_v1  ;;  %2392 = vrot.lane.b32.xlu1 %v2900_v5, %s4612_s16  ;;  %v5254_v38 = vld [vmem:[#allocation2 + $0x41] sm:$0xff]  ;;  %v5271_v49 = vld [vmem:[#allocation2 + $0x49] sm:$0xff] }
 0x18e   : > { %v1406_v24 = vpop.permute.xlu1 %1405  ;;  %2772 = vrot.lane.b32.xlu0 %v2706_v3, %s4615_s19  ;;  %v2324_v35 = vld [vmem:[#allocation2 + $0x48] sm:$0xff] }
 0x18f   : > { %1493 = vst.msk [vmem:[#allocation2 + $0x60] sm:$0xff] %vm1483_vm3, %v1406_v24 }
 0x190   : > { %1654 = vst.msk [vmem:[#allocation2 + $0x60] sm:$0xff] %vm1644_vm10, %v1567_v17  ;;  %v1438_v11 = vpop.permute.xlu0 %1437 }
 0x191   : > { %1509 = vst.msk [vmem:[#allocation2 + $0xe0] sm:$0xff] %vm1483_vm3, %v1438_v11  ;;  %3156 = vrot.lane.b32.xlu1 %v5214_v25, %s4616_s20 }
 0x192   : > { %1670 = vst.msk [vmem:[#allocation2 + $0xe0] sm:$0xff] %vm1644_vm10, %v1599_v61  ;;  %v1571_v6 = vpop.permute.xlu1 %1570  ;;  %2774 = vrot.lane.b32.xlu0 %v2707_v14, %s4615_s19 }
 0x194   : > { %v1565_v44 = vpop.permute.xlu0 %1564 }
 0x195   : > { %1653 = vst.msk [vmem:[#allocation2 + $0x58] sm:$0xff] %vm1644_vm10, %v1565_v44  ;;  %2581 = vrot.lane.b32.xlu1 %v5214_v25, %s4613_s17 }
 0x196   : > { %v1597_v9 = vpop.permute.xlu1 %1596  ;;  %1753 = vrot.lane.b32.xlu0 %v2706_v3, %s4609_s11 }
 0x197   : > { %1669 = vst.msk [vmem:[#allocation2 + $0xd8] sm:$0xff] %vm1644_vm10, %v1597_v9  ;;  %v2904_v52 = vld [vmem:[#allocation2 + $0x60] sm:$0xff] }
 0x198   : > { %v1408_v10 = vpop.permute.xlu0 %1407 }
 0x199   : > { %1494 = vst.msk [vmem:[#allocation2 + $0x68] sm:$0xff] %vm1483_vm3, %v1408_v10  ;;  %2197 = vrot.lane.b32.xlu1 %v2706_v3, %s4611_s15 }
 0x19a   : > { %v1603_v15 = vpop.permute.xlu1 %1602  ;;  %2390 = vrot.lane.b32.xlu0 %v2322_v62, %s4612_s16 }
 0x19c   : > { %v1440_v23 = vpop.permute.xlu0 %1439  ;;  %v2710_v45 = vld [vmem:[#allocation2 + $0x57] sm:$0xff]  ;;  %v2711_v51 = vld [vmem:[#allocation2 + $0x5f] sm:$0xff] }
 0x19d   : > { %1510 = vst.msk [vmem:[#allocation2 + $0xe8] sm:$0xff] %vm1483_vm3, %v1440_v23  ;;  %2965 = vrot.lane.b32.xlu1 %v2322_v62, %s4614_s18  ;;  %v5291_v50 = vld [vmem:[#allocation2 + $0x51] sm:$0xff]  ;;  %v5314_v4 = vld [vmem:[#allocation2 + $0x59] sm:$0xff] }
 0x19e   : > { %v1410_v26 = vpop.permute.xlu1 %1409  ;;  %3158 = vrot.lane.b32.xlu0 %v5231_v16, %s4616_s20  ;;  %v2326_v55 = vld [vmem:[#allocation2 + $0x58] sm:$0xff] }
 0x19f   : > { %1495 = vst.msk [vmem:[#allocation2 + $0x70] sm:$0xff] %vm1483_vm3, %v1410_v26 }
 0x1a0   : > { %1656 = vst.msk [vmem:[#allocation2 + $0x70] sm:$0xff] %vm1644_vm10, %v1571_v6  ;;  %v1442_v31 = vpop.permute.xlu0 %1441 }
 0x1a1   : > { %1511 = vst.msk [vmem:[#allocation2 + $0xf0] sm:$0xff] %vm1483_vm3, %v1442_v31  ;;  %2199 = vrot.lane.b32.xlu1 %v2707_v14, %s4611_s15 }
 0x1a2   : > { %1672 = vst.msk [vmem:[#allocation2 + $0xf0] sm:$0xff] %vm1644_vm10, %v1603_v15  ;;  %v1575_v32 = vpop.permute.xlu1 %1574  ;;  %1945 = vrot.lane.b32.xlu0 %v2322_v62, %s4610_s12 }
 0x1a4   : > { %v1569_v2 = vpop.permute.xlu0 %1568 }
 0x1a5   : > { %1655 = vst.msk [vmem:[#allocation2 + $0x68] sm:$0xff] %vm1644_vm10, %v1569_v2  ;;  %1755 = vrot.lane.b32.xlu1 %v2707_v14, %s4609_s11 }
 0x1a6   : > { %v1601_v30 = vpop.permute.xlu1 %1600  ;;  %2583 = vrot.lane.b32.xlu0 %v5231_v16, %s4613_s17 }
 0x1a7   : > { %1671 = vst.msk [vmem:[#allocation2 + $0xe8] sm:$0xff] %vm1644_vm10, %v1601_v30  ;;  %v2906_v0 = vld [vmem:[#allocation2 + $0x70] sm:$0xff] }
 0x1a8   : > { %v1412_v19 = vpop.permute.xlu0 %1411 }
 0x1a9   : > { %1496 = vst.msk [vmem:[#allocation2 + $0x78] sm:$0xff] %vm1483_vm3, %v1412_v19  ;;  %2971 = vrot.lane.b32.xlu1 %v2902_v20, %s4614_s18 }
 0x1aa   : > { %v1607_v21 = vpop.permute.xlu1 %1606  ;;  %1951 = vrot.lane.b32.xlu0 %v2902_v20, %s4610_s12 }
 0x1ac   : > { %v1444_v29 = vpop.permute.xlu0 %1443  ;;  %v2712_v24 = vld [vmem:[#allocation2 + $0x67] sm:$0xff]  ;;  %v2713_v44 = vld [vmem:[#allocation2 + $0x6f] sm:$0xff] }
 0x1ad   : > { %1512 = vst.msk [vmem:[#allocation2 + $0xf8] sm:$0xff] %vm1483_vm3, %v1444_v29  ;;  %2396 = vrot.lane.b32.xlu1 %v2902_v20, %s4612_s16  ;;  %v5335_v6 = vld [vmem:[#allocation2 + $0x61] sm:$0xff] }
 0x1ae   : > { %v1414_v22 = vpop.permute.xlu1 %1413  ;;  %2776 = vrot.lane.b32.xlu0 %v2708_v7, %s4615_s19  ;;  %v2328_v26 = vld [vmem:[#allocation2 + $0x68] sm:$0xff] }
 0x1af   : > { %1497 = vst.msk [vmem:[#allocation2 + $0x80] sm:$0xff] %vm1483_vm3, %v1414_v22 }
 0x1b0   : > { %1658 = vst.msk [vmem:[#allocation2 + $0x80] sm:$0xff] %vm1644_vm10, %v1575_v32  ;;  %v1446_v27 = vpop.permute.xlu0 %1445  ;;  %v5358_v32 = vld [vmem:[#allocation2 + $0x69] sm:$0xff] }
 0x1b1   : > { %1513 = vst.msk [vmem:[#allocation2 + $0x100] sm:$0xff] %vm1483_vm3, %v1446_v27  ;;  %3160 = vrot.lane.b32.xlu1 %v5254_v38, %s4616_s20 }
 0x1b2   : > { %1674 = vst.msk [vmem:[#allocation2 + $0x100] sm:$0xff] %vm1644_vm10, %v1607_v21  ;;  %v1579_v28 = vpop.permute.xlu1 %1578  ;;  %2778 = vrot.lane.b32.xlu0 %v2709_v39, %s4615_s19 }
 0x1b4   : > { %v1573_v63 = vpop.permute.xlu0 %1572 }
 0x1b5   : > { %1657 = vst.msk [vmem:[#allocation2 + $0x78] sm:$0xff] %vm1644_vm10, %v1573_v63  ;;  %2585 = vrot.lane.b32.xlu1 %v5254_v38, %s4613_s17 }
 0x1b6   : > { %v1605_v33 = vpop.permute.xlu1 %1604  ;;  %1757 = vrot.lane.b32.xlu0 %v2708_v7, %s4609_s11 }
 0x1b7   : > { %1673 = vst.msk [vmem:[#allocation2 + $0xf8] sm:$0xff] %vm1644_vm10, %v1605_v33  ;;  %v2908_v29 = vld [vmem:[#allocation2 + $0x80] sm:$0xff] }
 0x1b8   : > { %v1416_v34 = vpop.permute.xlu0 %1415 }
 0x1b9   : > { %1498 = vst.msk [vmem:[#allocation2 + $0x88] sm:$0xff] %vm1483_vm3, %v1416_v34  ;;  %2201 = vrot.lane.b32.xlu1 %v2708_v7, %s4611_s15 }
 0x1ba   : > { %v1611_v8 = vpop.permute.xlu1 %1610  ;;  %2394 = vrot.lane.b32.xlu0 %v2324_v35, %s4612_s16 }
 0x1bc   : > { %v1448_v47 = vpop.permute.xlu0 %1447  ;;  %v5381_v33 = vld [vmem:[#allocation2 + $0x71] sm:$0xff]  ;;  %v2715_v34 = vld [vmem:[#allocation2 + $0x7f] sm:$0xff] }
 0x1bd   : > { %1514 = vst.msk [vmem:[#allocation2 + $0x108] sm:$0xff] %vm1483_vm3, %v1448_v47  ;;  %2969 = vrot.lane.b32.xlu1 %v2324_v35, %s4614_s18 }
 0x1be   : > { %v1418_v36 = vpop.permute.xlu1 %1417  ;;  %3162 = vrot.lane.b32.xlu0 %v5271_v49, %s4616_s20 }
 0x1bf   : > { %1499 = vst.msk [vmem:[#allocation2 + $0x90] sm:$0xff] %vm1483_vm3, %v1418_v36 }
 0x1c0   : > { %1660 = vst.msk [vmem:[#allocation2 + $0x90] sm:$0xff] %vm1644_vm10, %v1579_v28  ;;  %v1450_v37 = vpop.permute.xlu0 %1449 }
 0x1c1   : > { %1515 = vst.msk [vmem:[#allocation2 + $0x110] sm:$0xff] %vm1483_vm3, %v1450_v37  ;;  %2203 = vrot.lane.b32.xlu1 %v2709_v39, %s4611_s15 }
 0x1c2   : > { %1676 = vst.msk [vmem:[#allocation2 + $0x110] sm:$0xff] %vm1644_vm10, %v1611_v8  ;;  %v1609_v40 = vpop.permute.xlu1 %1608  ;;  %1949 = vrot.lane.b32.xlu0 %v2324_v35, %s4610_s12 }
 0x1c3   : > { %1675 = vst.msk [vmem:[#allocation2 + $0x108] sm:$0xff] %vm1644_vm10, %v1609_v40  ;;  %v2330_v40 = vld [vmem:[#allocation2 + $0x78] sm:$0xff] }
 0x1c4   : > { %v1577_v41 = vpop.permute.xlu0 %1576 }
 0x1c5   : > { %1659 = vst.msk [vmem:[#allocation2 + $0x88] sm:$0xff] %vm1644_vm10, %v1577_v41  ;;  %1759 = vrot.lane.b32.xlu1 %v2709_v39, %s4609_s11  ;;  %v2714_v39 = vld [vmem:[#allocation2 + $0x77] sm:$0xff] }
 0x1c6   : > { %2587 = vrot.lane.b32.xlu0 %v5271_v49, %s4613_s17 }
 0x1c8   : > { %v2385_v42 = vpop.permute.xlu0 %2384 }
 0x1c9   : > { %2975 = vrot.lane.b32.xlu1 %v2904_v52, %s4614_s18 }
 0x1ca   : > { %1955 = vrot.lane.b32.xlu0 %v2904_v52, %s4610_s12 }
 0x1cc   : > { %v1940_v53 = vpop.permute.xlu0 %1939 }
 0x1cd   : > { %2400 = vrot.lane.b32.xlu1 %v2904_v52, %s4612_s16 }
 0x1ce   : > { %2780 = vrot.lane.b32.xlu0 %v2710_v45, %s4615_s19 }
 0x1cf   : > { %v1746_v12 = vpop.permute.xlu1 %1745 }
 0x1d0   : > { %1839 = vst.msk [vmem:[#allocation3 + $0x10] sm:$0xff] %vm1322_vm2, %v1746_v12  ;;  %v2190_v48 = vpop.permute.xlu0 %2189 }
 0x1d1   : > { %2286 = vst.msk [vmem:[#allocation3] sm:$0xff] %vm2285_vm12, %v2190_v48  ;;  %3164 = vrot.lane.b32.xlu1 %v5291_v50, %s4616_s20 }
 0x1d2   : > { %2782 = vrot.lane.b32.xlu0 %v2711_v51, %s4615_s19 }
 0x1d3   : > { %v2383_v59 = vpop.permute.xlu1 %2382 }
 0x1d4   : > { %2479 = vst.msk [vmem:[#allocation3] sm:$0xff] %vm2478_vm13, %v2383_v59  ;;  %v2192_v54 = vpop.permute.xlu0 %2191  ;;  %v2716_v59 = vld [vmem:[#allocation2 + $0x87] sm:$0xff] }
 0x1d5   : > { %2287 = vst.msk [vmem:[#allocation3 + $0x8] sm:$0xff] %vm2285_vm12, %v2192_v54  ;;  %2589 = vrot.lane.b32.xlu1 %v5291_v50, %s4613_s17 }
 0x1d6   : > { %2480 = vst.msk [vmem:[#allocation3 + $0x8] sm:$0xff] %vm2478_vm13, %v2385_v42  ;;  %1761 = vrot.lane.b32.xlu0 %v2710_v45, %s4609_s11  ;;  %v5404_v42 = vld [vmem:[#allocation2 + $0x79] sm:$0xff] }
 0x1d7   : > { %v1938_v13 = vpop.permute.xlu1 %1937 }
 0x1d8   : > { %2031 = vst.msk [vmem:[#allocation3 + $0x10] sm:$0xff] %vm1483_vm3, %v1938_v13  ;;  %v1748_v17 = vpop.permute.xlu0 %1747 }
 0x1d9   : > { %1840 = vst.msk [vmem:[#allocation3 + $0x18] sm:$0xff] %vm1322_vm2, %v1748_v17  ;;  %2205 = vrot.lane.b32.xlu1 %v2710_v45, %s4611_s15 }
 0x1da   : > { %2095 = vst.msk [vmem:[#allocation3 + $0x10] sm:$0xff] %vm1644_vm10, %v5147_v46  ;;  %2398 = vrot.lane.b32.xlu0 %v2326_v55, %s4612_s16 }
 0x1db   : > { %2032 = vst.msk [vmem:[#allocation3 + $0x18] sm:$0xff] %vm1483_vm3, %v1940_v53  ;;  %v2576_v18 = vpop.permute.xlu1 %2575 }
 0x1dc   : > { %2096 = vst.msk [vmem:[#allocation3 + $0x18] sm:$0xff] %vm1644_vm10, %v5163_v43  ;;  %v1944_v56 = vpop.permute.xlu0 %1943 }
 0x1dd   : > { %2672 = vst.msk [vmem:[#allocation3] sm:$0xff] %vm2671_vm14, %v2576_v18  ;;  %2973 = vrot.lane.b32.xlu1 %v2326_v55, %s4614_s18 }
 0x1de   : > { %3166 = vrot.lane.b32.xlu0 %v5314_v4, %s4616_s20 }
 0x1df   : > { %v2964_v46 = vpop.permute.xlu1 %2963 }
 0x1e0   : > { %v2769_v57 = vpop.permute.xlu0 %2768 }
 0x1e1   : > { %2865 = vst.msk [vmem:[#allocation3] sm:$0xff] %vm2864_vm15, %v2769_v57  ;;  %2207 = vrot.lane.b32.xlu1 %v2711_v51, %s4611_s15 }
 0x1e2   : > { %1953 = vrot.lane.b32.xlu0 %v2326_v55, %s4610_s12  ;;  %v2717_v55 = vld [vmem:[#allocation2 + $0x8f] sm:$0xff] }
 0x1e3   : > { %v2389_v43 = vpop.permute.xlu1 %2388 }
 0x1e4   : > { %v2771_v5 = vpop.permute.xlu0 %2770 }
 0x1e5   : > { %1763 = vrot.lane.b32.xlu1 %v2711_v51, %s4609_s11  ;;  %v5416_v51 = vld [vmem:[#allocation2 + $0x81] sm:$0xff] }
 0x1e6   : > { %2591 = vrot.lane.b32.xlu0 %v5314_v4, %s4613_s17 }
 0x1e7   : > { %v2578_v60 = vpop.permute.xlu1 %2577 }
 0x1e8   : > { %2673 = vst.msk [vmem:[#allocation3 + $0x8] sm:$0xff] %vm2671_vm14, %v2578_v60  ;;  %v1750_v61 = vpop.permute.xlu0 %1749 }
 0x1e9   : > { %2866 = vst.msk [vmem:[#allocation3 + $0x8] sm:$0xff] %vm2864_vm15, %v2771_v5  ;;  %2979 = vrot.lane.b32.xlu1 %v2906_v0, %s4614_s18 }
 0x1ea   : > { %1841 = vst.msk [vmem:[#allocation3 + $0x20] sm:$0xff] %vm1322_vm2, %v1750_v61  ;;  %1959 = vrot.lane.b32.xlu0 %v2906_v0, %s4610_s12 }
 0x1eb   : > { %3059 = vst.msk [vmem:[#allocation3 + $0x8] sm:$0xff] %vm3057_vm0, %v2964_v46  ;;  %v2194_v1 = vpop.permute.xlu1 %2193 }
 0x1ec   : > { %2288 = vst.msk [vmem:[#allocation3 + $0x10] sm:$0xff] %vm2285_vm12, %v2194_v1  ;;  %v2387_v3 = vpop.permute.xlu0 %2386 }
 0x1ed   : > { %2481 = vst.msk [vmem:[#allocation3 + $0x10] sm:$0xff] %vm2478_vm13, %v2387_v3  ;;  %2404 = vrot.lane.b32.xlu1 %v2906_v0, %s4612_s16  ;;  %v5446_v0 = vld [vmem:[#allocation2 + $0x89] sm:$0xff] }
 0x1ee   : > { %2784 = vrot.lane.b32.xlu0 %v2712_v24, %s4615_s19  ;;  %v2910_v3 = vld [vmem:[#allocation2 + $0x90] sm:$0xff] }
 0x1ef   : > { %v2962_v11 = vpop.permute.xlu1 %2961 }
 0x1f0   : > { %3058 = vst.msk [vmem:[#allocation3] sm:$0xff] %vm3057_vm0, %v2962_v11  ;;  %v3155_v14 = vpop.permute.xlu0 %3154 }
 0x1f1   : > { %3251 = vst.msk [vmem:[#allocation3] sm:$0xff] %vm3250_vm4, %v3155_v14  ;;  %3168 = vrot.lane.b32.xlu1 %v5335_v6, %s4616_s20 }
 0x1f2   : > { %2786 = vrot.lane.b32.xlu0 %v2713_v44, %s4615_s19 }
 0x1f3   : > { %v2196_v9 = vpop.permute.xlu1 %2195 }
 0x1f4   : > { %2289 = vst.msk [vmem:[#allocation3 + $0x18] sm:$0xff] %vm2285_vm12, %v2196_v9  ;;  %v1942_v10 = vpop.permute.xlu0 %1941 }
 0x1f5   : > { %2482 = vst.msk [vmem:[#allocation3 + $0x18] sm:$0xff] %vm2478_vm13, %v2389_v43  ;;  %2593 = vrot.lane.b32.xlu1 %v5335_v6, %s4613_s17  ;;  %v2909_v43 = vld [vmem:[#allocation2 + $0x88] sm:$0xff] }
 0x1f6   : > { %2033 = vst.msk [vmem:[#allocation3 + $0x20] sm:$0xff] %vm1483_vm3, %v1942_v10  ;;  %1765 = vrot.lane.b32.xlu0 %v2712_v24, %s4609_s11  ;;  %v5462_v10 = vld [vmem:[#allocation2 + $0x91] sm:$0xff] }
 0x1f7   : > { %2097 = vst.msk [vmem:[#allocation3 + $0x20] sm:$0xff] %vm1644_vm10, %v5174_v58  ;;  %v1752_v62 = vpop.permute.xlu1 %1751 }
 0x1f8   : > { %1842 = vst.msk [vmem:[#allocation3 + $0x28] sm:$0xff] %vm1322_vm2, %v1752_v62  ;;  %v2580_v15 = vpop.permute.xlu0 %2579  ;;  %v3283_v23 = vld [vmem:[#allocation3] sm:$0xff] }
 0x1f9   : > { %2034 = vst.msk [vmem:[#allocation3 + $0x28] sm:$0xff] %vm1483_vm3, %v1944_v56  ;;  %2209 = vrot.lane.b32.xlu1 %v2712_v24, %s4611_s15  ;;  %4480 = vmatprep.mubr.msk.f32.mxu1 %vm3327_vm5, %v3283_v23  ;;  %v2718_v62 = vld [vmem:[#allocation2 + $0x97] sm:$0xff] }
 0x1fa   : > { %2674 = vst.msk [vmem:[#allocation3 + $0x10] sm:$0xff] %vm2671_vm14, %v2580_v15  ;;  %2402 = vrot.lane.b32.xlu0 %v2328_v26, %s4612_s16 }
 0x1fb   : > { %2098 = vst.msk [vmem:[#allocation3 + $0x28] sm:$0xff] %vm1644_vm10, %v5214_v25  ;;  %v2968_v58 = vpop.permute.xlu1 %2967 }
 0x1fc   : > { %v1948_v31 = vpop.permute.xlu0 %1947 }
 0x1fd   : > { %2977 = vrot.lane.b32.xlu1 %v2328_v26, %s4614_s18 }
 0x1fe   : > { %3170 = vrot.lane.b32.xlu0 %v5358_v32, %s4616_s20 }
 0x1ff   : > { %v2393_v2 = vpop.permute.xlu1 %2392 }
 0x200   : > { %v2773_v30 = vpop.permute.xlu0 %2772 }
 0x201   : > { %2867 = vst.msk [vmem:[#allocation3 + $0x10] sm:$0xff] %vm2864_vm15, %v2773_v30  ;;  %2211 = vrot.lane.b32.xlu1 %v2713_v44, %s4611_s15  ;;  %v3653_v30 = vld [vmem:[%s6143_s3] sm:$0xf] }
 0x202   : > { %1957 = vrot.lane.b32.xlu0 %v2328_v26, %s4610_s12  ;;  %4528 = vmatprep.subr.msk.mxu0 %vm3424_vm11, %v3653_v30 }
 0x203   : > { %v3157_v19 = vpop.permute.xlu1 %3156  ;;  %4529 = vmatpush3.msk.msra.mxu0 %vm3424_vm11, %v3653_v30 }
 0x204   : > { %3252 = vst.msk [vmem:[#allocation3 + $0x8] sm:$0xff] %vm3250_vm4, %v3157_v19  ;;  %v2775_v25 = vpop.permute.xlu0 %2774 }
 0x205   : > { %1767 = vrot.lane.b32.xlu1 %v2713_v44, %s4609_s11 }
 0x206   : > { %2595 = vrot.lane.b32.xlu0 %v5358_v32, %s4613_s17 }
 0x207   : > { %v2582_v20 = vpop.permute.xlu1 %2581 }
 0x208   : > { %2675 = vst.msk [vmem:[#allocation3 + $0x18] sm:$0xff] %vm2671_vm14, %v2582_v20  ;;  %v1754_v21 = vpop.permute.xlu0 %1753  ;;  %v2911_v20 = vld [vmem:[#allocation2 + $0x98] sm:$0xff] }
 0x209   : > { %2868 = vst.msk [vmem:[#allocation3 + $0x18] sm:$0xff] %vm2864_vm15, %v2775_v25  ;;  %2983 = vrot.lane.b32.xlu1 %v2908_v29, %s4614_s18 }
 0x20a   : > { %1843 = vst.msk [vmem:[#allocation3 + $0x30] sm:$0xff] %vm1322_vm2, %v1754_v21  ;;  %1963 = vrot.lane.b32.xlu0 %v2908_v29, %s4610_s12 }
 0x20b   : > { %3061 = vst.msk [vmem:[#allocation3 + $0x18] sm:$0xff] %vm3057_vm0, %v2968_v58  ;;  %v2198_v7 = vpop.permute.xlu1 %2197  ;;  %v3284_v22 = vld [vmem:[#allocation3 + $0x8] sm:$0xff] }
 0x20c   : > { %2290 = vst.msk [vmem:[#allocation3 + $0x20] sm:$0xff] %vm2285_vm12, %v2198_v7  ;;  %4481 = vmatmul.mubr.msk.f32.vlgmr.msra.gmra.mxu1 %vm3327_vm5, %v3284_v22  ;;  %v2391_v27 = vpop.permute.xlu0 %2390  ;;  %v2719_v58 = vld [vmem:[#allocation2 + $0x9f] sm:$0xff] }
 0x20d   : > { %2483 = vst.msk [vmem:[#allocation3 + $0x20] sm:$0xff] %vm2478_vm13, %v2391_v27  ;;  %2408 = vrot.lane.b32.xlu1 %v2908_v29, %s4612_s16  ;;  %v5497_v22 = vld [vmem:[#allocation2 + $0x99] sm:$0xff] }
 0x20e   : > { %2788 = vrot.lane.b32.xlu0 %v2714_v39, %s4615_s19 }
 0x20f   : > { %v2966_v28 = vpop.permute.xlu1 %2965 }
 0x210   : > { %3060 = vst.msk [vmem:[#allocation3 + $0x10] sm:$0xff] %vm3057_vm0, %v2966_v28  ;;  %v3159_v63 = vpop.permute.xlu0 %3158 }
 0x211   : > { %3253 = vst.msk [vmem:[#allocation3 + $0x10] sm:$0xff] %vm3250_vm4, %v3159_v63  ;;  %3172 = vrot.lane.b32.xlu1 %v5381_v33, %s4616_s20 }
 0x212   : > { %2790 = vrot.lane.b32.xlu0 %v2715_v34, %s4615_s19 }
 0x213   : > { %v2200_v35 = vpop.permute.xlu1 %2199 }
 0x214   : > { %2291 = vst.msk [vmem:[#allocation3 + $0x28] sm:$0xff] %vm2285_vm12, %v2200_v35  ;;  %v1946_v8 = vpop.permute.xlu0 %1945 }
 0x215   : > { %2484 = vst.msk [vmem:[#allocation3 + $0x28] sm:$0xff] %vm2478_vm13, %v2393_v2  ;;  %2597 = vrot.lane.b32.xlu1 %v5381_v33, %s4613_s17 }
 0x216   : > { %2035 = vst.msk [vmem:[#allocation3 + $0x30] sm:$0xff] %vm1483_vm3, %v1946_v8  ;;  %1769 = vrot.lane.b32.xlu0 %v2714_v39, %s4609_s11 }
 0x217   : > { %2099 = vst.msk [vmem:[#allocation3 + $0x30] sm:$0xff] %vm1644_vm10, %v5231_v16  ;;  %v1756_v47 = vpop.permute.xlu1 %1755 }
 0x218   : > { %1844 = vst.msk [vmem:[#allocation3 + $0x38] sm:$0xff] %vm1322_vm2, %v1756_v47  ;;  %v2584_v36 = vpop.permute.xlu0 %2583  ;;  %v3285_v37 = vld [vmem:[#allocation3 + $0x10] sm:$0xff] }
 0x219   : > { %2036 = vst.msk [vmem:[#allocation3 + $0x38] sm:$0xff] %vm1483_vm3, %v1948_v31  ;;  %2213 = vrot.lane.b32.xlu1 %v2714_v39, %s4611_s15  ;;  %4483 = vmatprep.mubr.msk.f32.mxu1 %vm3327_vm5, %v3285_v37  ;;  %v2912_v39 = vld [vmem:[#allocation2 + $0xa0] sm:$0xff] }
 0x21a   : > { %2676 = vst.msk [vmem:[#allocation3 + $0x20] sm:$0xff] %vm2671_vm14, %v2584_v36  ;;  %2406 = vrot.lane.b32.xlu0 %v2330_v40, %s4612_s16  ;;  %v5513_v47 = vld [vmem:[#allocation2 + $0xa1] sm:$0xff] }
 0x21b   : > { %2100 = vst.msk [vmem:[#allocation3 + $0x38] sm:$0xff] %vm1644_vm10, %v5254_v38  ;;  %v2972_v16 = vpop.permute.xlu1 %2971  ;;  %v2720_v36 = vld [vmem:[#allocation2 + $0xa7] sm:$0xff] }
 0x21c   : > { %v1952_v41 = vpop.permute.xlu0 %1951 }
 0x21d   : > { %2981 = vrot.lane.b32.xlu1 %v2330_v40, %s4614_s18 }
 0x21e   : > { %3174 = vrot.lane.b32.xlu0 %v5404_v42, %s4616_s20 }
 0x21f   : > { %v2397_v52 = vpop.permute.xlu1 %2396 }
 0x220   : > { %v2777_v53 = vpop.permute.xlu0 %2776 }
 0x221   : > { %2869 = vst.msk [vmem:[#allocation3 + $0x20] sm:$0xff] %vm2864_vm15, %v2777_v53  ;;  %2215 = vrot.lane.b32.xlu1 %v2715_v34, %s4611_s15 }
 0x222   : > { %1961 = vrot.lane.b32.xlu0 %v2330_v40, %s4610_s12 }
 0x223   : > { %v3161_v45 = vpop.permute.xlu1 %3160 }
 0x224   : > { %3254 = vst.msk [vmem:[#allocation3 + $0x18] sm:$0xff] %vm3250_vm4, %v3161_v45  ;;  %v2779_v38 = vpop.permute.xlu0 %2778 }
 0x225   : > { %1771 = vrot.lane.b32.xlu1 %v2715_v34, %s4609_s11 }
 0x226   : > { %2599 = vrot.lane.b32.xlu0 %v5404_v42, %s4613_s17 }
 0x227   : > { %v2586_v12 = vpop.permute.xlu1 %2585 }
 0x228   : > { %2677 = vst.msk [vmem:[#allocation3 + $0x28] sm:$0xff] %vm2671_vm14, %v2586_v12  ;;  %v1758_v48 = vpop.permute.xlu0 %1757  ;;  %v2913_v12 = vld [vmem:[#allocation2 + $0xa8] sm:$0xff] }
 0x229   : > { %2870 = vst.msk [vmem:[#allocation3 + $0x28] sm:$0xff] %vm2864_vm15, %v2779_v38  ;;  %3176 = vrot.lane.b32.xlu1 %v5416_v51, %s4616_s20 }
 0x22a   : > { %1845 = vst.msk [vmem:[#allocation3 + $0x40] sm:$0xff] %vm1322_vm2, %v1758_v48  ;;  %2792 = vrot.lane.b32.xlu0 %v2716_v59, %s4615_s19 }
 0x22b   : > { %3063 = vst.msk [vmem:[#allocation3 + $0x28] sm:$0xff] %vm3057_vm0, %v2972_v16  ;;  %v2202_v54 = vpop.permute.xlu1 %2201  ;;  %v3286_v13 = vld [vmem:[#allocation3 + $0x18] sm:$0xff] }
 0x22c   : > { %2292 = vst.msk [vmem:[#allocation3 + $0x30] sm:$0xff] %vm2285_vm12, %v2202_v54  ;;  %4484 = vmatmul.mubr.msk.f32.gmra.mxu1 %vm3327_vm5, %v3286_v13  ;;  %v2395_v17 = vpop.permute.xlu0 %2394  ;;  %v5543_v13 = vld [vmem:[#allocation2 + $0xa9] sm:$0xff] }
 0x22d   : > { %2485 = vst.msk [vmem:[#allocation3 + $0x30] sm:$0xff] %vm2478_vm13, %v2395_v17  ;;  %2601 = vrot.lane.b32.xlu1 %v5416_v51, %s4613_s17 }
 0x22e   : > { %2794 = vrot.lane.b32.xlu0 %v2717_v55, %s4615_s19 }
 0x22f   : > { %v2970_v18 = vpop.permute.xlu1 %2969 }
 0x230   : > { %3062 = vst.msk [vmem:[#allocation3 + $0x20] sm:$0xff] %vm3057_vm0, %v2970_v18  ;;  %v3163_v56 = vpop.permute.xlu0 %3162 }
 0x231   : > { %3255 = vst.msk [vmem:[#allocation3 + $0x20] sm:$0xff] %vm3250_vm4, %v3163_v56  ;;  %2217 = vrot.lane.b32.xlu1 %v2716_v59, %s4611_s15 }
 0x232   : > { %1773 = vrot.lane.b32.xlu0 %v2716_v59, %s4609_s11 }
 0x233   : > { %v2204_v46 = vpop.permute.xlu1 %2203 }
 0x234   : > { %2293 = vst.msk [vmem:[#allocation3 + $0x38] sm:$0xff] %vm2285_vm12, %v2204_v46  ;;  %v1950_v57 = vpop.permute.xlu0 %1949 }
 0x235   : > { %2486 = vst.msk [vmem:[#allocation3 + $0x38] sm:$0xff] %vm2478_vm13, %v2397_v52  ;;  %2985 = vrot.lane.b32.xlu1 %v2909_v43, %s4614_s18 }
 0x236   : > { %2037 = vst.msk [vmem:[#allocation3 + $0x40] sm:$0xff] %vm1483_vm3, %v1950_v57  ;;  %2410 = vrot.lane.b32.xlu0 %v2909_v43, %s4612_s16 }
 0x237   : > { %2101 = vst.msk [vmem:[#allocation3 + $0x40] sm:$0xff] %vm1644_vm10, %v5271_v49  ;;  %v1760_v5 = vpop.permute.xlu1 %1759 }
 0x238   : > { %1846 = vst.msk [vmem:[#allocation3 + $0x48] sm:$0xff] %vm1322_vm2, %v1760_v5  ;;  %v2588_v60 = vpop.permute.xlu0 %2587  ;;  %v3287_v61 = vld [vmem:[#allocation3 + $0x20] sm:$0xff] }
 0x239   : > { %2038 = vst.msk [vmem:[#allocation3 + $0x48] sm:$0xff] %vm1483_vm3, %v1952_v41  ;;  %2219 = vrot.lane.b32.xlu1 %v2717_v55, %s4611_s15  ;;  %4486 = vmatprep.mubr.msk.f32.mxu1 %vm3327_vm5, %v3287_v61  ;;  %v2721_v41 = vld [vmem:[#allocation2 + $0xaf] sm:$0xff] }
 0x23a   : > { %2678 = vst.msk [vmem:[#allocation3 + $0x30] sm:$0xff] %vm2671_vm14, %v2588_v60  ;;  %3178 = vrot.lane.b32.xlu0 %v5446_v0, %s4616_s20  ;;  %v5559_v5 = vld [vmem:[#allocation2 + $0xb1] sm:$0xff] }
 0x23b   : > { %2102 = vst.msk [vmem:[#allocation3 + $0x48] sm:$0xff] %vm1644_vm10, %v5291_v50  ;;  %v2976_v49 = vpop.permute.xlu1 %2975  ;;  %v2722_v60 = vld [vmem:[#allocation2 + $0xb7] sm:$0xff] }
 0x23c   : > { %v1956_v1 = vpop.permute.xlu0 %1955 }
 0x23d   : > { %2987 = vrot.lane.b32.xlu1 %v2910_v3, %s4614_s18 }
 0x23e   : > { %1965 = vrot.lane.b32.xlu0 %v2909_v43, %s4610_s12 }
 0x23f   : > { %v2401_v24 = vpop.permute.xlu1 %2400 }
 0x240   : > { %v2781_v11 = vpop.permute.xlu0 %2780 }
 0x241   : > { %2871 = vst.msk [vmem:[#allocation3 + $0x30] sm:$0xff] %vm2864_vm15, %v2781_v11  ;;  %1775 = vrot.lane.b32.xlu1 %v2717_v55, %s4609_s11  ;;  %v2914_v55 = vld [vmem:[#allocation2 + $0xb0] sm:$0xff] }
 0x242   : > { %2603 = vrot.lane.b32.xlu0 %v5446_v0, %s4613_s17 }
 0x243   : > { %v3165_v14 = vpop.permute.xlu1 %3164 }
 0x244   : > { %3256 = vst.msk [vmem:[#allocation3 + $0x28] sm:$0xff] %vm3250_vm4, %v3165_v14  ;;  %v2783_v50 = vpop.permute.xlu0 %2782 }
 0x245   : > { %2412 = vrot.lane.b32.xlu1 %v2910_v3, %s4612_s16 }
 0x246   : > { %1967 = vrot.lane.b32.xlu0 %v2910_v3, %s4610_s12  ;;  %v2723_v3 = vld [vmem:[#allocation2 + $0xbf] sm:$0xff] }
 0x247   : > { %v2590_v44 = vpop.permute.xlu1 %2589 }
 0x248   : > { %2679 = vst.msk [vmem:[#allocation3 + $0x38] sm:$0xff] %vm2671_vm14, %v2590_v44  ;;  %v1762_v9 = vpop.permute.xlu0 %1761  ;;  %v2915_v44 = vld [vmem:[#allocation2 + $0xb8] sm:$0xff] }
 0x249   : > { %2872 = vst.msk [vmem:[#allocation3 + $0x38] sm:$0xff] %vm2864_vm15, %v2783_v50  ;;  %3180 = vrot.lane.b32.xlu1 %v5462_v10, %s4616_s20 }
 0x24a   : > { %1847 = vst.msk [vmem:[#allocation3 + $0x50] sm:$0xff] %vm1322_vm2, %v1762_v9  ;;  %2796 = vrot.lane.b32.xlu0 %v2718_v62, %s4615_s19 }
 0x24b   : > { %3065 = vst.msk [vmem:[#allocation3 + $0x38] sm:$0xff] %vm3057_vm0, %v2976_v49  ;;  %v2206_v15 = vpop.permute.xlu1 %2205  ;;  %v3288_v23 = vld [vmem:[#allocation3 + $0x28] sm:$0xff] }
 0x24c   : > { %2294 = vst.msk [vmem:[#allocation3 + $0x40] sm:$0xff] %vm2285_vm12, %v2206_v15  ;;  %4487 = vmatmul.mubr.msk.f32.gmra.mxu1 %vm3327_vm5, %v3288_v23  ;;  %v2399_v26 = vpop.permute.xlu0 %2398  ;;  %v5589_v23 = vld [vmem:[#allocation2 + $0xb9] sm:$0xff] }
 0x24d   : > { %2487 = vst.msk [vmem:[#allocation3 + $0x40] sm:$0xff] %vm2478_vm13, %v2399_v26  ;;  %2605 = vrot.lane.b32.xlu1 %v5462_v10, %s4613_s17 }
 0x24e   : > { %2798 = vrot.lane.b32.xlu0 %v2719_v58, %s4615_s19 }
 0x24f   : > { %v2974_v31 = vpop.permute.xlu1 %2973 }
 0x250   : > { %3064 = vst.msk [vmem:[#allocation3 + $0x30] sm:$0xff] %vm3057_vm0, %v2974_v31  ;;  %v3167_v2 = vpop.permute.xlu0 %3166 }
 0x251   : > { %3257 = vst.msk [vmem:[#allocation3 + $0x30] sm:$0xff] %vm3250_vm4, %v3167_v2  ;;  %2221 = vrot.lane.b32.xlu1 %v2718_v62, %s4611_s15 }
 0x252   : > { %1777 = vrot.lane.b32.xlu0 %v2718_v62, %s4609_s11 }
 0x253   : > { %v2208_v19 = vpop.permute.xlu1 %2207 }
 0x254   : > { %2295 = vst.msk [vmem:[#allocation3 + $0x48] sm:$0xff] %vm2285_vm12, %v2208_v19  ;;  %v1954_v25 = vpop.permute.xlu0 %1953 }
 0x255   : > { %2488 = vst.msk [vmem:[#allocation3 + $0x48] sm:$0xff] %vm2478_vm13, %v2401_v24  ;;  %2989 = vrot.lane.b32.xlu1 %v2911_v20, %s4614_s18 }
 0x256   : > { %2039 = vst.msk [vmem:[#allocation3 + $0x50] sm:$0xff] %vm1483_vm3, %v1954_v25  ;;  %2414 = vrot.lane.b32.xlu0 %v2911_v20, %s4612_s16 }
 0x257   : > { %2103 = vst.msk [vmem:[#allocation3 + $0x50] sm:$0xff] %vm1644_vm10, %v5314_v4  ;;  %v1764_v21 = vpop.permute.xlu1 %1763 }
 0x258   : > { %1848 = vst.msk [vmem:[#allocation3 + $0x58] sm:$0xff] %vm1322_vm2, %v1764_v21  ;;  %v2592_v29 = vpop.permute.xlu0 %2591  ;;  %v3289_v7 = vld [vmem:[#allocation3 + $0x30] sm:$0xff] }
 0x259   : > { %2040 = vst.msk [vmem:[#allocation3 + $0x58] sm:$0xff] %vm1483_vm3, %v1956_v1  ;;  %2223 = vrot.lane.b32.xlu1 %v2719_v58, %s4611_s15  ;;  %4489 = vmatprep.mubr.msk.f32.mxu1 %vm3327_vm5, %v3289_v7  ;;  %v5610_v21 = vld [vmem:[#allocation2 + $0xc1] sm:$0xff] }
 0x25a   : > { %2680 = vst.msk [vmem:[#allocation3 + $0x40] sm:$0xff] %vm2671_vm14, %v2592_v29  ;;  %3182 = vrot.lane.b32.xlu0 %v5497_v22, %s4616_s20  ;;  %v2724_v29 = vld [vmem:[#allocation2 + $0xc7] sm:$0xff] }
 0x25b   : > { %2104 = vst.msk [vmem:[#allocation3 + $0x58] sm:$0xff] %vm1644_vm10, %v5335_v6  ;;  %v2980_v4 = vpop.permute.xlu1 %2979 }
 0x25c   : > { %v1960_v27 = vpop.permute.xlu0 %1959 }
 0x25d   : > { %2991 = vrot.lane.b32.xlu1 %v2912_v39, %s4614_s18 }
 0x25e   : > { %1969 = vrot.lane.b32.xlu0 %v2911_v20, %s4610_s12 }
 0x25f   : > { %v2405_v28 = vpop.permute.xlu1 %2404 }
 0x260   : > { %v2785_v63 = vpop.permute.xlu0 %2784 }
 0x261   : > { %2873 = vst.msk [vmem:[#allocation3 + $0x40] sm:$0xff] %vm2864_vm15, %v2785_v63  ;;  %1779 = vrot.lane.b32.xlu1 %v2719_v58, %s4609_s11  ;;  %v2916_v58 = vld [vmem:[#allocation2 + $0xc0] sm:$0xff] }
 0x262   : > { %2607 = vrot.lane.b32.xlu0 %v5497_v22, %s4613_s17 }
 0x263   : > { %v3169_v34 = vpop.permute.xlu1 %3168 }
 0x264   : > { %3258 = vst.msk [vmem:[#allocation3 + $0x38] sm:$0xff] %vm3250_vm4, %v3169_v34  ;;  %v2787_v6 = vpop.permute.xlu0 %2786 }
 0x265   : > { %2416 = vrot.lane.b32.xlu1 %v2912_v39, %s4612_s16 }
 0x266   : > { %1971 = vrot.lane.b32.xlu0 %v2912_v39, %s4610_s12 }
 0x267   : > { %v2594_v35 = vpop.permute.xlu1 %2593 }
 0x268   : > { %2681 = vst.msk [vmem:[#allocation3 + $0x48] sm:$0xff] %vm2671_vm14, %v2594_v35  ;;  %v1766_v8 = vpop.permute.xlu0 %1765 }
 0x269   : > { %2874 = vst.msk [vmem:[#allocation3 + $0x48] sm:$0xff] %vm2864_vm15, %v2787_v6  ;;  %3184 = vrot.lane.b32.xlu1 %v5513_v47, %s4616_s20  ;;  %v2917_v6 = vld [vmem:[#allocation2 + $0xc8] sm:$0xff] }
 0x26a   : > { %1849 = vst.msk [vmem:[#allocation3 + $0x60] sm:$0xff] %vm1322_vm2, %v1766_v8  ;;  %2800 = vrot.lane.b32.xlu0 %v2720_v36, %s4615_s19 }
 0x26b   : > { %3067 = vst.msk [vmem:[#allocation3 + $0x48] sm:$0xff] %vm3057_vm0, %v2980_v4  ;;  %v2210_v37 = vpop.permute.xlu1 %2209  ;;  %v3290_v40 = vld [vmem:[#allocation3 + $0x38] sm:$0xff] }
 0x26c   : > { %2296 = vst.msk [vmem:[#allocation3 + $0x50] sm:$0xff] %vm2285_vm12, %v2210_v37  ;;  %4490 = vmatmul.mubr.msk.f32.gmra.mxu1 %vm3327_vm5, %v3290_v40  ;;  %v2403_v16 = vpop.permute.xlu0 %2402 }
 0x26d   : > { %2489 = vst.msk [vmem:[#allocation3 + $0x50] sm:$0xff] %vm2478_vm13, %v2403_v16  ;;  %2609 = vrot.lane.b32.xlu1 %v5513_v47, %s4613_s17  ;;  %v2918_v16 = vld [vmem:[#allocation2 + $0xd0] sm:$0xff] }
 0x26e   : > { %2802 = vrot.lane.b32.xlu0 %v2721_v41, %s4615_s19 }
 0x26f   : > { %v2978_v52 = vpop.permute.xlu1 %2977 }
 0x270   : > { %3066 = vst.msk [vmem:[#allocation3 + $0x40] sm:$0xff] %vm3057_vm0, %v2978_v52  ;;  %v3171_v53 = vpop.permute.xlu0 %3170 }
 0x271   : > { %3259 = vst.msk [vmem:[#allocation3 + $0x40] sm:$0xff] %vm3250_vm4, %v3171_v53  ;;  %2225 = vrot.lane.b32.xlu1 %v2720_v36, %s4611_s15 }
 0x272   : > { %1781 = vrot.lane.b32.xlu0 %v2720_v36, %s4609_s11 }
 0x273   : > { %v2212_v45 = vpop.permute.xlu1 %2211 }
 0x274   : > { %2297 = vst.msk [vmem:[#allocation3 + $0x58] sm:$0xff] %vm2285_vm12, %v2212_v45  ;;  %v1958_v38 = vpop.permute.xlu0 %1957 }
 0x275   : > { %2490 = vst.msk [vmem:[#allocation3 + $0x58] sm:$0xff] %vm2478_vm13, %v2405_v28  ;;  %2993 = vrot.lane.b32.xlu1 %v2913_v12, %s4614_s18 }
 0x276   : > { %2041 = vst.msk [vmem:[#allocation3 + $0x60] sm:$0xff] %vm1483_vm3, %v1958_v38  ;;  %2418 = vrot.lane.b32.xlu0 %v2913_v12, %s4612_s16 }
 0x277   : > { %2105 = vst.msk [vmem:[#allocation3 + $0x60] sm:$0xff] %vm1644_vm10, %v5358_v32  ;;  %v1768_v48 = vpop.permute.xlu1 %1767 }
 0x278   : > { %1850 = vst.msk [vmem:[#allocation3 + $0x68] sm:$0xff] %vm1322_vm2, %v1768_v48  ;;  %v2596_v59 = vpop.permute.xlu0 %2595  ;;  %v3291_v54 = vld [vmem:[#allocation3 + $0x40] sm:$0xff] }
 0x279   : > { %2042 = vst.msk [vmem:[#allocation3 + $0x68] sm:$0xff] %vm1483_vm3, %v1960_v27  ;;  %2227 = vrot.lane.b32.xlu1 %v2721_v41, %s4611_s15  ;;  %4492 = vmatprep.mubr.msk.f32.mxu1 %vm3327_vm5, %v3291_v54  ;;  %v2725_v27 = vld [vmem:[#allocation2 + $0xcf] sm:$0xff] }
 0x27a   : > { %2682 = vst.msk [vmem:[#allocation3 + $0x50] sm:$0xff] %vm2671_vm14, %v2596_v59  ;;  %3186 = vrot.lane.b32.xlu0 %v5543_v13, %s4616_s20  ;;  %v5656_v48 = vld [vmem:[#allocation2 + $0xd1] sm:$0xff] }
 0x27b   : > { %2106 = vst.msk [vmem:[#allocation3 + $0x68] sm:$0xff] %vm1644_vm10, %v5381_v33  ;;  %v2984_v32 = vpop.permute.xlu1 %2983  ;;  %v2726_v59 = vld [vmem:[#allocation2 + $0xd7] sm:$0xff] }
 0x27c   : > { %v1964_v17 = vpop.permute.xlu0 %1963 }
 0x27d   : > { %2995 = vrot.lane.b32.xlu1 %v2914_v55, %s4614_s18 }
 0x27e   : > { %1973 = vrot.lane.b32.xlu0 %v2913_v12, %s4610_s12 }
 0x27f   : > { %v2409_v18 = vpop.permute.xlu1 %2408 }
 0x280   : > { %v2789_v56 = vpop.permute.xlu0 %2788 }
 0x281   : > { %2875 = vst.msk [vmem:[#allocation3 + $0x50] sm:$0xff] %vm2864_vm15, %v2789_v56  ;;  %1783 = vrot.lane.b32.xlu1 %v2721_v41, %s4609_s11 }
 0x282   : > { %2611 = vrot.lane.b32.xlu0 %v5543_v13, %s4613_s17 }
 0x283   : > { %v3173_v46 = vpop.permute.xlu1 %3172 }
 0x284   : > { %3260 = vst.msk [vmem:[#allocation3 + $0x48] sm:$0xff] %vm3250_vm4, %v3173_v46  ;;  %v2791_v33 = vpop.permute.xlu0 %2790 }
 0x285   : > { %2420 = vrot.lane.b32.xlu1 %v2914_v55, %s4612_s16 }
 0x286   : > { %1975 = vrot.lane.b32.xlu0 %v2914_v55, %s4610_s12  ;;  %v5666_v55 = vld [vmem:[%s6145_s5] ss:$0 sm:$0xff] }
 0x287   : > { %v2598_v57 = vpop.permute.xlu1 %2597 }
 0x288   : > { %2683 = vst.msk [vmem:[#allocation3 + $0x58] sm:$0xff] %vm2671_vm14, %v2598_v57  ;;  %v1770_v43 = vpop.permute.xlu0 %1769 }
 0x289   : > { %2876 = vst.msk [vmem:[#allocation3 + $0x58] sm:$0xff] %vm2864_vm15, %v2791_v33  ;;  %3188 = vrot.lane.b32.xlu1 %v5559_v5, %s4616_s20 }
 0x28a   : > { %1851 = vst.msk [vmem:[#allocation3 + $0x70] sm:$0xff] %vm1322_vm2, %v1770_v43  ;;  %2804 = vrot.lane.b32.xlu0 %v2722_v60, %s4615_s19 }
 0x28b   : > { %3069 = vst.msk [vmem:[#allocation3 + $0x58] sm:$0xff] %vm3057_vm0, %v2984_v32  ;;  %v2214_v61 = vpop.permute.xlu1 %2213  ;;  %v3292_v49 = vld [vmem:[#allocation3 + $0x48] sm:$0xff] }
 0x28c   : > { %2298 = vst.msk [vmem:[#allocation3 + $0x60] sm:$0xff] %vm2285_vm12, %v2214_v61  ;;  %4493 = vmatmul.mubr.msk.f32.gmra.mxu1 %vm3327_vm5, %v3292_v49  ;;  %v2407_v1 = vpop.permute.xlu0 %2406  ;;  %v2919_v49 = vld [vmem:[#allocation2 + $0xd8] sm:$0xff] }
 0x28d   : > { %2491 = vst.msk [vmem:[#allocation3 + $0x60] sm:$0xff] %vm2478_vm13, %v2407_v1  ;;  %2613 = vrot.lane.b32.xlu1 %v5559_v5, %s4613_s17 }
 0x28e   : > { %2806 = vrot.lane.b32.xlu0 %v2723_v3, %s4615_s19 }
 0x28f   : > { %v2982_v24 = vpop.permute.xlu1 %2981 }
 0x290   : > { %3068 = vst.msk [vmem:[#allocation3 + $0x50] sm:$0xff] %vm3057_vm0, %v2982_v24  ;;  %v3175_v11 = vpop.permute.xlu0 %3174 }
 0x291   : > { %3261 = vst.msk [vmem:[#allocation3 + $0x50] sm:$0xff] %vm3250_vm4, %v3175_v11  ;;  %2229 = vrot.lane.b32.xlu1 %v2722_v60, %s4611_s15 }
 0x292   : > { %1785 = vrot.lane.b32.xlu0 %v2722_v60, %s4609_s11 }
 0x293   : > { %v2216_v14 = vpop.permute.xlu1 %2215 }
 0x294   : > { %2299 = vst.msk [vmem:[#allocation3 + $0x68] sm:$0xff] %vm2285_vm12, %v2216_v14  ;;  %v1962_v50 = vpop.permute.xlu0 %1961 }
 0x295   : > { %2492 = vst.msk [vmem:[#allocation3 + $0x68] sm:$0xff] %vm2478_vm13, %v2409_v18  ;;  %2997 = vrot.lane.b32.xlu1 %v2915_v44, %s4614_s18  ;;  %v2727_v18 = vld [vmem:[#allocation2 + $0xdf] sm:$0xff] }
 0x296   : > { %2043 = vst.msk [vmem:[#allocation3 + $0x70] sm:$0xff] %vm1483_vm3, %v1962_v50  ;;  %2422 = vrot.lane.b32.xlu0 %v2915_v44, %s4612_s16  ;;  %v2920_v50 = vld [vmem:[#allocation2 + $0xe0] sm:$0xff] }
 0x297   : > { %2107 = vst.msk [vmem:[#allocation3 + $0x70] sm:$0xff] %vm1644_vm10, %v5404_v42  ;;  %v1772_v9 = vpop.permute.xlu1 %1771 }
 0x298   : > { %1852 = vst.msk [vmem:[#allocation3 + $0x78] sm:$0xff] %vm1322_vm2, %v1772_v9  ;;  %v2600_v62 = vpop.permute.xlu0 %2599  ;;  %v3293_v15 = vld [vmem:[#allocation3 + $0x50] sm:$0xff] }
 0x299   : > { %2044 = vst.msk [vmem:[#allocation3 + $0x78] sm:$0xff] %vm1483_vm3, %v1964_v17  ;;  %2231 = vrot.lane.b32.xlu1 %v2723_v3, %s4611_s15  ;;  %4495 = vmatprep.mubr.msk.f32.mxu1 %vm3327_vm5, %v3293_v15 }
 0x29a   : > { %2684 = vst.msk [vmem:[#allocation3 + $0x60] sm:$0xff] %vm2671_vm14, %v2600_v62  ;;  %3190 = vrot.lane.b32.xlu0 %v5589_v23, %s4616_s20 }
 0x29b   : > { %2108 = vst.msk [vmem:[#allocation3 + $0x78] sm:$0xff] %vm1644_vm10, %v5416_v51  ;;  %v3177_v42 = vpop.permute.xlu1 %3176 }
 0x29c   : > { %3262 = vst.msk [vmem:[#allocation3 + $0x58] sm:$0xff] %vm3250_vm4, %v3177_v42  ;;  %v2793_v26 = vpop.permute.xlu0 %2792 }
 0x29d   : > { %2877 = vst.msk [vmem:[#allocation3 + $0x60] sm:$0xff] %vm2864_vm15, %v2793_v26  ;;  %2999 = vrot.lane.b32.xlu1 %v2916_v58, %s4614_s18 }
 0x29e   : > { %1977 = vrot.lane.b32.xlu0 %v2915_v44, %s4610_s12 }
 0x29f   : > { %v2602_v31 = vpop.permute.xlu1 %2601 }
 0x2a0   : > { %2685 = vst.msk [vmem:[#allocation3 + $0x68] sm:$0xff] %vm2671_vm14, %v2602_v31  ;;  %v2795_v2 = vpop.permute.xlu0 %2794  ;;  %v2728_v31 = vld [vmem:[#allocation2 + $0xe7] sm:$0xff] }
 0x2a1   : > { %2878 = vst.msk [vmem:[#allocation3 + $0x68] sm:$0xff] %vm2864_vm15, %v2795_v2  ;;  %1787 = vrot.lane.b32.xlu1 %v2723_v3, %s4609_s11 }
 0x2a2   : > { %2615 = vrot.lane.b32.xlu0 %v5589_v23, %s4613_s17 }
 0x2a3   : > { %v2218_v51 = vpop.permute.xlu1 %2217  ;;  %v3294_v30 = vld [vmem:[#allocation3 + $0x58] sm:$0xff] }
 0x2a4   : > { %2300 = vst.msk [vmem:[#allocation3 + $0x70] sm:$0xff] %vm2285_vm12, %v2218_v51  ;;  %4496 = vmatmul.mubr.msk.f32.gmra.mxu1 %vm3327_vm5, %v3294_v30  ;;  %v1774_v19 = vpop.permute.xlu0 %1773 }
 0x2a5   : > { %1853 = vst.msk [vmem:[#allocation3 + $0x80] sm:$0xff] %vm1322_vm2, %v1774_v19  ;;  %2424 = vrot.lane.b32.xlu1 %v2916_v58, %s4612_s16  ;;  %v2729_v19 = vld [vmem:[#allocation2 + $0xef] sm:$0xff] }
 0x2a6   : > { %1979 = vrot.lane.b32.xlu0 %v2916_v58, %s4610_s12  ;;  %v5711_v58 = vld [vmem:[#allocation2 + $0xe1] sm:$0xff] }
 0x2a7   : > { %v2986_v25 = vpop.permute.xlu1 %2985 }
 0x2a8   : > { %3070 = vst.msk [vmem:[#allocation3 + $0x60] sm:$0xff] %vm3057_vm0, %v2986_v25  ;;  %v2411_v20 = vpop.permute.xlu0 %2410 }
 0x2a9   : > { %2493 = vst.msk [vmem:[#allocation3 + $0x70] sm:$0xff] %vm2478_vm13, %v2411_v20  ;;  %3192 = vrot.lane.b32.xlu1 %v5610_v21, %s4616_s20 }
 0x2aa   : > { %2808 = vrot.lane.b32.xlu0 %v2724_v29, %s4615_s19 }
 0x2ab   : > { %v2220_v7 = vpop.permute.xlu1 %2219 }
 0x2ac   : > { %2301 = vst.msk [vmem:[#allocation3 + $0x78] sm:$0xff] %vm2285_vm12, %v2220_v7  ;;  %v3179_v4 = vpop.permute.xlu0 %3178 }
 0x2ad   : > { %3263 = vst.msk [vmem:[#allocation3 + $0x60] sm:$0xff] %vm3250_vm4, %v3179_v4  ;;  %2617 = vrot.lane.b32.xlu1 %v5610_v21, %s4613_s17 }
 0x2ae   : > { %2810 = vrot.lane.b32.xlu0 %v2725_v27, %s4615_s19 }
 0x2af   : > { %v2988_v39 = vpop.permute.xlu1 %2987 }
 0x2b0   : > { %3071 = vst.msk [vmem:[#allocation3 + $0x68] sm:$0xff] %vm3057_vm0, %v2988_v39  ;;  %v1966_v28 = vpop.permute.xlu0 %1965 }
 0x2b1   : > { %2045 = vst.msk [vmem:[#allocation3 + $0x80] sm:$0xff] %vm1483_vm3, %v1966_v28  ;;  %2233 = vrot.lane.b32.xlu1 %v2724_v29, %s4611_s15  ;;  %v2921_v28 = vld [vmem:[#allocation2 + $0xe8] sm:$0xff] }
 0x2b2   : > { %1789 = vrot.lane.b32.xlu0 %v2724_v29, %s4609_s11  ;;  %2109 = vst.msk [vmem:[#allocation3 + $0x80] sm:$0xff] %vm1644_vm10, %v5446_v0  ;;  %v5635_v0 = vld [vmem:[#allocation2 + $0xc9] sm:$0xff] }
 0x2b3   : > { %v1776_v63 = vpop.permute.xlu1 %1775 }
 0x2b4   : > { %1854 = vst.msk [vmem:[#allocation3 + $0x88] sm:$0xff] %vm1322_vm2, %v1776_v63  ;;  %v2604_v34 = vpop.permute.xlu0 %2603  ;;  %v3295_v35 = vld [vmem:[#allocation3 + $0x60] sm:$0xff] }
 0x2b5   : > { %2686 = vst.msk [vmem:[#allocation3 + $0x70] sm:$0xff] %vm2671_vm14, %v2604_v34  ;;  %3001 = vrot.lane.b32.xlu1 %v2917_v6, %s4614_s18  ;;  %4498 = vmatprep.mubr.msk.f32.mxu1 %vm3327_vm5, %v3295_v35 }
 0x2b6   : > { %2426 = vrot.lane.b32.xlu0 %v2917_v6, %s4612_s16 }
 0x2b7   : > { %v2413_v8 = vpop.permute.xlu1 %2412 }
 0x2b8   : > { %2494 = vst.msk [vmem:[#allocation3 + $0x78] sm:$0xff] %vm2478_vm13, %v2413_v8  ;;  %v1968_v36 = vpop.permute.xlu0 %1967 }
 0x2b9   : > { %2046 = vst.msk [vmem:[#allocation3 + $0x88] sm:$0xff] %vm1483_vm3, %v1968_v36  ;;  %2235 = vrot.lane.b32.xlu1 %v2725_v27, %s4611_s15  ;;  %v2922_v36 = vld [vmem:[#allocation2 + $0xf0] sm:$0xff] }
 0x2ba   : > { %3194 = vrot.lane.b32.xlu0 %v5635_v0, %s4616_s20  ;;  %2110 = vst.msk [vmem:[#allocation3 + $0x88] sm:$0xff] %vm1644_vm10, %v5462_v10 }
 0x2bb   : > { %v3181_v37 = vpop.permute.xlu1 %3180 }
 0x2bc   : > { %3264 = vst.msk [vmem:[#allocation3 + $0x68] sm:$0xff] %vm3250_vm4, %v3181_v37  ;;  %v2797_v40 = vpop.permute.xlu0 %2796 }
 0x2bd   : > { %2879 = vst.msk [vmem:[#allocation3 + $0x70] sm:$0xff] %vm2864_vm15, %v2797_v40  ;;  %3003 = vrot.lane.b32.xlu1 %v2918_v16, %s4614_s18 }
 0x2be   : > { %1981 = vrot.lane.b32.xlu0 %v2917_v6, %s4610_s12 }
 0x2bf   : > { %v2606_v41 = vpop.permute.xlu1 %2605 }
 0x2c0   : > { %2687 = vst.msk [vmem:[#allocation3 + $0x78] sm:$0xff] %vm2671_vm14, %v2606_v41  ;;  %v2799_v52 = vpop.permute.xlu0 %2798 }
 0x2c1   : > { %2880 = vst.msk [vmem:[#allocation3 + $0x78] sm:$0xff] %vm2864_vm15, %v2799_v52  ;;  %1791 = vrot.lane.b32.xlu1 %v2725_v27, %s4609_s11 }
 0x2c2   : > { %2619 = vrot.lane.b32.xlu0 %v5635_v0, %s4613_s17 }
 0x2c3   : > { %v2222_v10 = vpop.permute.xlu1 %2221  ;;  %v3296_v53 = vld [vmem:[#allocation3 + $0x68] sm:$0xff] }
 0x2c4   : > { %2302 = vst.msk [vmem:[#allocation3 + $0x80] sm:$0xff] %vm2285_vm12, %v2222_v10  ;;  %4499 = vmatmul.mubr.msk.f32.gmra.mxu1 %vm3327_vm5, %v3296_v53  ;;  %v1778_v45 = vpop.permute.xlu0 %1777  ;;  %v5761_v53 = vld [vmem:[#allocation2 + $0xf1] sm:$0xff] }
 0x2c5   : > { %1855 = vst.msk [vmem:[#allocation3 + $0x90] sm:$0xff] %vm1322_vm2, %v1778_v45  ;;  %2428 = vrot.lane.b32.xlu1 %v2918_v16, %s4612_s16  ;;  %v2730_v45 = vld [vmem:[#allocation2 + $0xf7] sm:$0xff] }
 0x2c6   : > { %1983 = vrot.lane.b32.xlu0 %v2918_v16, %s4610_s12 }
 0x2c7   : > { %v2990_v38 = vpop.permute.xlu1 %2989 }
 0x2c8   : > { %3072 = vst.msk [vmem:[#allocation3 + $0x70] sm:$0xff] %vm3057_vm0, %v2990_v38  ;;  %v2415_v12 = vpop.permute.xlu0 %2414 }
 0x2c9   : > { %2495 = vst.msk [vmem:[#allocation3 + $0x80] sm:$0xff] %vm2478_vm13, %v2415_v12  ;;  %3196 = vrot.lane.b32.xlu1 %v5656_v48, %s4616_s20 }
 0x2ca   : > { %2812 = vrot.lane.b32.xlu0 %v2726_v59, %s4615_s19 }
 0x2cb   : > { %v2224_v54 = vpop.permute.xlu1 %2223 }
 0x2cc   : > { %2303 = vst.msk [vmem:[#allocation3 + $0x88] sm:$0xff] %vm2285_vm12, %v2224_v54  ;;  %v4482_v32 = vpop.f32.mrf.mxu1  ;;  %v3183_v17 = vpop.permute.xlu0 %3182  ;;  %v2731_v54 = vld [vmem:[#allocation2 + $0xff] sm:$0xff] }
 0x2cd   : > { %3265 = vst.msk [vmem:[#allocation3 + $0x70] sm:$0xff] %vm3250_vm4, %v3183_v17  ;;  %2621 = vrot.lane.b32.xlu1 %v5656_v48, %s4613_s17  ;;  %v3500_v57 = vadd.f32 %v4482_v32, %v5666_v55 }
 0x2ce   : > { %v3494_v56 = vpop.f32.mrf.mxu1  ;;  %2814 = vrot.lane.b32.xlu0 %v2727_v18, %s4615_s19 }
 0x2cf   : > { %v3495_v46 = vadd.f32 %v5666_v55, %v3494_v56  ;;  %v2992_v33 = vpop.permute.xlu1 %2991 }
 0x2d0   : > { %3073 = vst.msk [vmem:[#allocation3 + $0x78] sm:$0xff] %vm3057_vm0, %v2992_v33  ;;  %v1970_v43 = vpop.permute.xlu0 %1969 }
 0x2d1   : > { %2047 = vst.msk [vmem:[#allocation3 + $0x90] sm:$0xff] %vm1483_vm3, %v1970_v43  ;;  %2237 = vrot.lane.b32.xlu1 %v2726_v59, %s4611_s15  ;;  %4530 = vmatprep.mubr.msk.f32.mxu0 %vm1322_vm2, %v3495_v46  ;;  %v2923_v43 = vld [vmem:[#allocation2 + $0xf8] sm:$0xff] }
 0x2d2   : > { %4531 = vmatmul.mubr.msk.f32.vlgmr.msra.gmra.mxu0 %vm1322_vm2, %v3500_v57  ;;  %1793 = vrot.lane.b32.xlu0 %v2726_v59, %s4609_s11  ;;  %2111 = vst.msk [vmem:[#allocation3 + $0x90] sm:$0xff] %vm1644_vm10, %v5497_v22  ;;  %v5690_v22 = vld [vmem:[#allocation2 + $0xd9] sm:$0xff] }
 0x2d3   : > { %v1780_v60 = vpop.permute.xlu1 %1779 }
 0x2d4   : > { %1856 = vst.msk [vmem:[#allocation3 + $0x98] sm:$0xff] %vm1322_vm2, %v1780_v60  ;;  %v2608_v61 = vpop.permute.xlu0 %2607  ;;  %v3297_v1 = vld [vmem:[#allocation3 + $0x70] sm:$0xff] }
 0x2d5   : > { %2688 = vst.msk [vmem:[#allocation3 + $0x80] sm:$0xff] %vm2671_vm14, %v2608_v61  ;;  %3005 = vrot.lane.b32.xlu1 %v2919_v49, %s4614_s18  ;;  %4501 = vmatprep.mubr.msk.f32.mxu1 %vm3327_vm5, %v3297_v1 }
 0x2d6   : > { %2430 = vrot.lane.b32.xlu0 %v2919_v49, %s4612_s16 }
 0x2d7   : > { %v2417_v3 = vpop.permute.xlu1 %2416 }
 0x2d8   : > { %2496 = vst.msk [vmem:[#allocation3 + $0x88] sm:$0xff] %vm2478_vm13, %v2417_v3  ;;  %v1972_v24 = vpop.permute.xlu0 %1971 }
 0x2d9   : > { %2048 = vst.msk [vmem:[#allocation3 + $0x98] sm:$0xff] %vm1483_vm3, %v1972_v24  ;;  %2239 = vrot.lane.b32.xlu1 %v2727_v18, %s4611_s15  ;;  %v2924_v24 = vld [vmem:[#allocation2 + $0x100] sm:$0xff] }
 0x2da   : > { %3198 = vrot.lane.b32.xlu0 %v5690_v22, %s4616_s20  ;;  %2112 = vst.msk [vmem:[#allocation3 + $0x98] sm:$0xff] %vm1644_vm10, %v5513_v47 }
 0x2db   : > { %v3185_v11 = vpop.permute.xlu1 %3184 }
 0x2dc   : > { %3266 = vst.msk [vmem:[#allocation3 + $0x78] sm:$0xff] %vm3250_vm4, %v3185_v11  ;;  %v2801_v14 = vpop.permute.xlu0 %2800 }
 0x2dd   : > { %2881 = vst.msk [vmem:[#allocation3 + $0x80] sm:$0xff] %vm2864_vm15, %v2801_v14  ;;  %3007 = vrot.lane.b32.xlu1 %v2920_v50, %s4614_s18 }
 0x2de   : > { %1985 = vrot.lane.b32.xlu0 %v2919_v49, %s4610_s12 }
 0x2df   : > { %v2610_v44 = vpop.permute.xlu1 %2609 }
 0x2e0   : > { %2689 = vst.msk [vmem:[#allocation3 + $0x88] sm:$0xff] %vm2671_vm14, %v2610_v44  ;;  %v2803_v9 = vpop.permute.xlu0 %2802 }
 0x2e1   : > { %2882 = vst.msk [vmem:[#allocation3 + $0x88] sm:$0xff] %vm2864_vm15, %v2803_v9  ;;  %1795 = vrot.lane.b32.xlu1 %v2727_v18, %s4609_s11 }
 0x2e2   : > { %2623 = vrot.lane.b32.xlu0 %v5690_v22, %s4613_s17 }
 0x2e3   : > { %v2226_v47 = vpop.permute.xlu1 %2225  ;;  %v3298_v62 = vld [vmem:[#allocation3 + $0x78] sm:$0xff] }
 0x2e4   : > { %2304 = vst.msk [vmem:[#allocation3 + $0x90] sm:$0xff] %vm2285_vm12, %v2226_v47  ;;  %4502 = vmatmul.mubr.msk.f32.gmra.mxu1 %vm3327_vm5, %v3298_v62  ;;  %v1782_v15 = vpop.permute.xlu0 %1781  ;;  %v5811_v62 = vld [vmem:[#allocation2 + $0x101] sm:$0xff] }
 0x2e5   : > { %1857 = vst.msk [vmem:[#allocation3 + $0xa0] sm:$0xff] %vm1322_vm2, %v1782_v15  ;;  %2432 = vrot.lane.b32.xlu1 %v2920_v50, %s4612_s16  ;;  %v2732_v15 = vld [vmem:[#allocation2 + $0x107] sm:$0xff] }
 0x2e6   : > { %1987 = vrot.lane.b32.xlu0 %v2920_v50, %s4610_s12 }
 0x2e7   : > { %v2994_v42 = vpop.permute.xlu1 %2993 }
 0x2e8   : > { %3074 = vst.msk [vmem:[#allocation3 + $0x80] sm:$0xff] %vm3057_vm0, %v2994_v42  ;;  %v2419_v26 = vpop.permute.xlu0 %2418 }
 0x2e9   : > { %2497 = vst.msk [vmem:[#allocation3 + $0x90] sm:$0xff] %vm2478_vm13, %v2419_v26  ;;  %3200 = vrot.lane.b32.xlu1 %v5711_v58, %s4616_s20 }
 0x2ea   : > { %2816 = vrot.lane.b32.xlu0 %v2728_v31, %s4615_s19 }
 0x2eb   : > { %v2228_v2 = vpop.permute.xlu1 %2227 }
 0x2ec   : > { %2305 = vst.msk [vmem:[#allocation3 + $0x98] sm:$0xff] %vm2285_vm12, %v2228_v2  ;;  %v4485_v51 = vpop.f32.mrf.mxu1  ;;  %v3187_v30 = vpop.permute.xlu0 %3186  ;;  %v2733_v2 = vld [vmem:[#allocation2 + $0x10f] sm:$0xff] }
 0x2ed   : > { %3267 = vst.msk [vmem:[#allocation3 + $0x80] sm:$0xff] %vm3250_vm4, %v3187_v30  ;;  %2625 = vrot.lane.b32.xlu1 %v5711_v58, %s4613_s17  ;;  %v3510_v7 = vadd.f32 %v4485_v51, %v5666_v55 }
 0x2ee   : > { %v3504_v25 = vpop.f32.mrf.mxu1  ;;  %2818 = vrot.lane.b32.xlu0 %v2729_v19, %s4615_s19 }
 0x2ef   : > { %v3505_v20 = vadd.f32 %v5666_v55, %v3504_v25  ;;  %v2996_v29 = vpop.permute.xlu1 %2995 }
 0x2f0   : > { %3075 = vst.msk [vmem:[#allocation3 + $0x88] sm:$0xff] %vm3057_vm0, %v2996_v29  ;;  %v1974_v4 = vpop.permute.xlu0 %1973 }
 0x2f1   : > { %2049 = vst.msk [vmem:[#allocation3 + $0xa0] sm:$0xff] %vm1483_vm3, %v1974_v4  ;;  %2241 = vrot.lane.b32.xlu1 %v2728_v31, %s4611_s15  ;;  %4533 = vmatprep.mubr.msk.f32.mxu0 %vm1322_vm2, %v3505_v20  ;;  %v2925_v4 = vld [vmem:[#allocation2 + $0x108] sm:$0xff] }
 0x2f2   : > { %4534 = vmatmul.mubr.msk.f32.gmra.mxu0 %vm1322_vm2, %v3510_v7  ;;  %1797 = vrot.lane.b32.xlu0 %v2728_v31, %s4609_s11  ;;  %2113 = vst.msk [vmem:[#allocation3 + $0xa0] sm:$0xff] %vm1644_vm10, %v5543_v13  ;;  %v5740_v13 = vld [vmem:[#allocation2 + $0xe9] sm:$0xff] }
 0x2f3   : > { %v1784_v27 = vpop.permute.xlu1 %1783 }
 0x2f4   : > { %1858 = vst.msk [vmem:[#allocation3 + $0xa8] sm:$0xff] %vm1322_vm2, %v1784_v27  ;;  %v2612_v39 = vpop.permute.xlu0 %2611  ;;  %v3299_v63 = vld [vmem:[#allocation3 + $0x80] sm:$0xff] }
 0x2f5   : > { %2690 = vst.msk [vmem:[#allocation3 + $0x90] sm:$0xff] %vm2671_vm14, %v2612_v39  ;;  %3009 = vrot.lane.b32.xlu1 %v2921_v28, %s4614_s18  ;;  %4504 = vmatprep.mubr.msk.f32.mxu1 %vm3327_vm5, %v3299_v63  ;;  %v2926_v39 = vld [vmem:[#allocation2 + $0x110] sm:$0xff] }
 0x2f6   : > { %2434 = vrot.lane.b32.xlu0 %v2921_v28, %s4612_s16 }
 0x2f7   : > { %v2421_v34 = vpop.permute.xlu1 %2420 }
 0x2f8   : > { %2498 = vst.msk [vmem:[#allocation3 + $0x98] sm:$0xff] %vm2478_vm13, %v2421_v34  ;;  %v1976_v6 = vpop.permute.xlu0 %1975 }
 0x2f9   : > { %2050 = vst.msk [vmem:[#allocation3 + $0xa8] sm:$0xff] %vm1483_vm3, %v1976_v6  ;;  %2243 = vrot.lane.b32.xlu1 %v2729_v19, %s4611_s15  ;;  %v3118_v6 = vld [vmem:[#allocation2 + $0x109] sm:$0xff] }
 0x2fa   : > { %3202 = vrot.lane.b32.xlu0 %v5740_v13, %s4616_s20  ;;  %2114 = vst.msk [vmem:[#allocation3 + $0xa8] sm:$0xff] %vm1644_vm10, %v5559_v5 }
 0x2fb   : > { %v3189_v35 = vpop.permute.xlu1 %3188 }
 0x2fc   : > { %3268 = vst.msk [vmem:[#allocation3 + $0x88] sm:$0xff] %vm3250_vm4, %v3189_v35  ;;  %v2805_v8 = vpop.permute.xlu0 %2804  ;;  %v3119_v35 = vld [vmem:[#allocation2 + $0x111] sm:$0xff] }
 0x2fd   : > { %2883 = vst.msk [vmem:[#allocation3 + $0x90] sm:$0xff] %vm2864_vm15, %v2805_v8  ;;  %3011 = vrot.lane.b32.xlu1 %v2922_v36, %s4614_s18 }
 0x2fe   : > { %1989 = vrot.lane.b32.xlu0 %v2921_v28, %s4610_s12 }
 0x2ff   : > { %v2614_v37 = vpop.permute.xlu1 %2613 }
 0x300   : > { %2691 = vst.msk [vmem:[#allocation3 + $0x98] sm:$0xff] %vm2671_vm14, %v2614_v37  ;;  %v2807_v40 = vpop.permute.xlu0 %2806 }
 0x301   : > { %2884 = vst.msk [vmem:[#allocation3 + $0x98] sm:$0xff] %vm2864_vm15, %v2807_v40  ;;  %1799 = vrot.lane.b32.xlu1 %v2729_v19, %s4609_s11 }
 0x302   : > { %2627 = vrot.lane.b32.xlu0 %v5740_v13, %s4613_s17 }
 0x303   : > { %v2230_v5 = vpop.permute.xlu1 %2229  ;;  %v3300_v16 = vld [vmem:[#allocation3 + $0x88] sm:$0xff] }
 0x304   : > { %2306 = vst.msk [vmem:[#allocation3 + $0xa0] sm:$0xff] %vm2285_vm12, %v2230_v5  ;;  %4505 = vmatmul.mubr.msk.f32.gmra.mxu1 %vm3327_vm5, %v3300_v16  ;;  %v1786_v41 = vpop.permute.xlu0 %1785  ;;  %v2927_v5 = vld [vmem:[#allocation2 + $0x118] sm:$0xff] }
 0x305   : > { %1859 = vst.msk [vmem:[#allocation3 + $0xb0] sm:$0xff] %vm1322_vm2, %v1786_v41  ;;  %2436 = vrot.lane.b32.xlu1 %v2922_v36, %s4612_s16  ;;  %v2735_v41 = vld [vmem:[#allocation2 + $0x11f] sm:$0xff] }
 0x306   : > { %1991 = vrot.lane.b32.xlu0 %v2922_v36, %s4610_s12 }
 0x307   : > { %v2998_v52 = vpop.permute.xlu1 %2997 }
 0x308   : > { %3076 = vst.msk [vmem:[#allocation3 + $0x90] sm:$0xff] %vm3057_vm0, %v2998_v52  ;;  %v2423_v10 = vpop.permute.xlu0 %2422 }
 0x309   : > { %2499 = vst.msk [vmem:[#allocation3 + $0xa0] sm:$0xff] %vm2478_vm13, %v2423_v10  ;;  %3204 = vrot.lane.b32.xlu1 %v5761_v53, %s4616_s20  ;;  %v3120_v10 = vld [vmem:[#allocation2 + $0x119] sm:$0xff] }
 0x30a   : > { %2820 = vrot.lane.b32.xlu0 %v2730_v45, %s4615_s19 }
 0x30b   : > { %v2232_v38 = vpop.permute.xlu1 %2231 }
 0x30c   : > { %2307 = vst.msk [vmem:[#allocation3 + $0xa8] sm:$0xff] %vm2285_vm12, %v2232_v38  ;;  %v4488_v12 = vpop.f32.mrf.mxu1  ;;  %v3191_v59 = vpop.permute.xlu0 %3190  ;;  %v2928_v38 = vld [vmem:[#allocation2 + $0x120] sm:$0xff] }
 0x30d   : > { %3269 = vst.msk [vmem:[#allocation3 + $0x90] sm:$0xff] %vm3250_vm4, %v3191_v59  ;;  %2629 = vrot.lane.b32.xlu1 %v5761_v53, %s4613_s17  ;;  %v3520_v56 = vadd.f32 %v4488_v12, %v5666_v55 }
 0x30e   : > { %v3514_v32 = vpop.f32.mrf.mxu1  ;;  %2822 = vrot.lane.b32.xlu0 %v2731_v54, %s4615_s19 }
 0x30f   : > { %v3515_v17 = vadd.f32 %v5666_v55, %v3514_v32  ;;  %v3000_v18 = vpop.permute.xlu1 %2999 }
 0x310   : > { %3077 = vst.msk [vmem:[#allocation3 + $0x98] sm:$0xff] %vm3057_vm0, %v3000_v18  ;;  %v1978_v46 = vpop.permute.xlu0 %1977 }
 0x311   : > { %2051 = vst.msk [vmem:[#allocation3 + $0xb0] sm:$0xff] %vm1483_vm3, %v1978_v46  ;;  %2245 = vrot.lane.b32.xlu1 %v2730_v45, %s4611_s15  ;;  %4536 = vmatprep.mubr.msk.f32.mxu0 %vm1322_vm2, %v3515_v17  ;;  %v3121_v17 = vld [vmem:[#allocation2 + $0x121] sm:$0xff] }
 0x312   : > { %4537 = vmatmul.mubr.msk.f32.gmra.mxu0 %vm1322_vm2, %v3520_v56  ;;  %1801 = vrot.lane.b32.xlu0 %v2730_v45, %s4609_s11  ;;  %2115 = vst.msk [vmem:[#allocation3 + $0xb0] sm:$0xff] %vm1644_vm10, %v5589_v23  ;;  %v5790_v23 = vld [vmem:[#allocation2 + $0xf9] sm:$0xff] }
 0x313   : > { %v1788_v33 = vpop.permute.xlu1 %1787 }
 0x314   : > { %1860 = vst.msk [vmem:[#allocation3 + $0xb8] sm:$0xff] %vm1322_vm2, %v1788_v33  ;;  %v2616_v57 = vpop.permute.xlu0 %2615  ;;  %v3301_v60 = vld [vmem:[#allocation3 + $0x90] sm:$0xff] }
 0x315   : > { %2692 = vst.msk [vmem:[#allocation3 + $0xa0] sm:$0xff] %vm2671_vm14, %v2616_v57  ;;  %3013 = vrot.lane.b32.xlu1 %v2923_v43, %s4614_s18  ;;  %4507 = vmatprep.mubr.msk.f32.mxu1 %vm3327_vm5, %v3301_v60 }
 0x316   : > { %2438 = vrot.lane.b32.xlu0 %v2923_v43, %s4612_s16 }
 0x317   : > { %v2425_v61 = vpop.permute.xlu1 %2424 }
 0x318   : > { %2500 = vst.msk [vmem:[#allocation3 + $0xa8] sm:$0xff] %vm2478_vm13, %v2425_v61  ;;  %v1980_v49 = vpop.permute.xlu0 %1979 }
 0x319   : > { %2052 = vst.msk [vmem:[#allocation3 + $0xb8] sm:$0xff] %vm1483_vm3, %v1980_v49  ;;  %2247 = vrot.lane.b32.xlu1 %v2731_v54, %s4611_s15 }
 0x31a   : > { %3206 = vrot.lane.b32.xlu0 %v5790_v23, %s4616_s20  ;;  %2116 = vst.msk [vmem:[#allocation3 + $0xb8] sm:$0xff] %vm1644_vm10, %v5610_v21 }
 0x31b   : > { %v3193_v1 = vpop.permute.xlu1 %3192 }
 0x31c   : > { %3270 = vst.msk [vmem:[#allocation3 + $0x98] sm:$0xff] %vm3250_vm4, %v3193_v1  ;;  %v2809_v3 = vpop.permute.xlu0 %2808 }
 0x31d   : > { %2885 = vst.msk [vmem:[#allocation3 + $0xa0] sm:$0xff] %vm2864_vm15, %v2809_v3  ;;  %3015 = vrot.lane.b32.xlu1 %v2924_v24, %s4614_s18 }
 0x31e   : > { %1993 = vrot.lane.b32.xlu0 %v2923_v43, %s4610_s12 }
 0x31f   : > { %v2618_v11 = vpop.permute.xlu1 %2617 }
 0x320   : > { %2693 = vst.msk [vmem:[#allocation3 + $0xa8] sm:$0xff] %vm2671_vm14, %v2618_v11  ;;  %v2811_v14 = vpop.permute.xlu0 %2810 }
 0x321   : > { %2886 = vst.msk [vmem:[#allocation3 + $0xa8] sm:$0xff] %vm2864_vm15, %v2811_v14  ;;  %1803 = vrot.lane.b32.xlu1 %v2731_v54, %s4609_s11 }
 0x322   : > { %2631 = vrot.lane.b32.xlu0 %v5790_v23, %s4613_s17 }
 0x323   : > { %v2234_v21 = vpop.permute.xlu1 %2233  ;;  %v3302_v50 = vld [vmem:[#allocation3 + $0x98] sm:$0xff] }
 0x324   : > { %2308 = vst.msk [vmem:[#allocation3 + $0xb0] sm:$0xff] %vm2285_vm12, %v2234_v21  ;;  %4508 = vmatmul.mubr.msk.f32.gmra.mxu1 %vm3327_vm5, %v3302_v50  ;;  %v1790_v44 = vpop.permute.xlu0 %1789 }
 0x325   : > { %1861 = vst.msk [vmem:[#allocation3 + $0xc0] sm:$0xff] %vm1322_vm2, %v1790_v44  ;;  %2440 = vrot.lane.b32.xlu1 %v2924_v24, %s4612_s16 }
 0x326   : > { %1995 = vrot.lane.b32.xlu0 %v2924_v24, %s4610_s12 }
 0x327   : > { %v3002_v9 = vpop.permute.xlu1 %3001 }
 0x328   : > { %3078 = vst.msk [vmem:[#allocation3 + $0xa0] sm:$0xff] %vm3057_vm0, %v3002_v9  ;;  %v2427_v47 = vpop.permute.xlu0 %2426 }
 0x329   : > { %2501 = vst.msk [vmem:[#allocation3 + $0xb0] sm:$0xff] %vm2478_vm13, %v2427_v47  ;;  %3208 = vrot.lane.b32.xlu1 %v5811_v62, %s4616_s20 }
 0x32a   : > { %2824 = vrot.lane.b32.xlu0 %v2732_v15, %s4615_s19 }
 0x32b   : > { %v2236_v42 = vpop.permute.xlu1 %2235 }
 0x32c   : > { %2309 = vst.msk [vmem:[#allocation3 + $0xb8] sm:$0xff] %vm2285_vm12, %v2236_v42  ;;  %v4491_v26 = vpop.f32.mrf.mxu1  ;;  %v3195_v31 = vpop.permute.xlu0 %3194 }
 0x32d   : > { %3271 = vst.msk [vmem:[#allocation3 + $0xa0] sm:$0xff] %vm3250_vm4, %v3195_v31  ;;  %2633 = vrot.lane.b32.xlu1 %v5811_v62, %s4613_s17  ;;  %v3530_v25 = vadd.f32 %v4491_v26, %v5666_v55 }
 0x32e   : > { %v3524_v51 = vpop.f32.mrf.mxu1  ;;  %2826 = vrot.lane.b32.xlu0 %v2733_v2, %s4615_s19 }
 0x32f   : > { %v3525_v30 = vadd.f32 %v5666_v55, %v3524_v51  ;;  %v3004_v19 = vpop.permute.xlu1 %3003 }
 0x330   : > { %3079 = vst.msk [vmem:[#allocation3 + $0xa8] sm:$0xff] %vm3057_vm0, %v3004_v19  ;;  %v1982_v20 = vpop.permute.xlu0 %1981 }
 0x331   : > { %2053 = vst.msk [vmem:[#allocation3 + $0xc0] sm:$0xff] %vm1483_vm3, %v1982_v20  ;;  %2249 = vrot.lane.b32.xlu1 %v2732_v15, %s4611_s15  ;;  %4539 = vmatprep.mubr.msk.f32.mxu0 %vm1322_vm2, %v3525_v30 }
 0x332   : > { %4540 = vmatmul.mubr.msk.f32.gmra.mxu0 %vm1322_vm2, %v3530_v25  ;;  %2251 = vrot.lane.b32.xlu0 %v2733_v2, %s4611_s15  ;;  %2117 = vst.msk [vmem:[#allocation3 + $0xc0] sm:$0xff] %vm1644_vm10, %v5635_v0 }
 0x333   : > { %v1792_v29 = vpop.permute.xlu1 %1791 }
 0x334   : > { %1862 = vst.msk [vmem:[#allocation3 + $0xc8] sm:$0xff] %vm1322_vm2, %v1792_v29  ;;  %v2620_v7 = vpop.permute.xlu0 %2619  ;;  %v3303_v27 = vld [vmem:[#allocation3 + $0xa0] sm:$0xff] }
 0x335   : > { %2694 = vst.msk [vmem:[#allocation3 + $0xb0] sm:$0xff] %vm2671_vm14, %v2620_v7  ;;  %3017 = vrot.lane.b32.xlu1 %v2925_v4, %s4614_s18  ;;  %4510 = vmatprep.mubr.msk.f32.mxu1 %vm3327_vm5, %v3303_v27 }
 0x336   : > { %3019 = vrot.lane.b32.xlu0 %v2926_v39, %s4614_s18 }
 0x337   : > { %v2429_v28 = vpop.permute.xlu1 %2428 }
 0x338   : > { %2502 = vst.msk [vmem:[#allocation3 + $0xb8] sm:$0xff] %vm2478_vm13, %v2429_v28  ;;  %v1984_v63 = vpop.permute.xlu0 %1983 }
 0x339   : > { %2054 = vst.msk [vmem:[#allocation3 + $0xc8] sm:$0xff] %vm1483_vm3, %v1984_v63  ;;  %2442 = vrot.lane.b32.xlu1 %v2925_v4, %s4612_s16 }
 0x33a   : > { %2444 = vrot.lane.b32.xlu0 %v2926_v39, %s4612_s16  ;;  %2118 = vst.msk [vmem:[#allocation3 + $0xc8] sm:$0xff] %vm1644_vm10, %v5656_v48  ;;  %v2734_v48 = vld [vmem:[#allocation2 + $0x117] sm:$0xff] }
 0x33b   : > { %v3197_v0 = vpop.permute.xlu1 %3196 }
 0x33c   : > { %3272 = vst.msk [vmem:[#allocation3 + $0xa8] sm:$0xff] %vm3250_vm4, %v3197_v0  ;;  %v2813_v34 = vpop.permute.xlu0 %2812 }
 0x33d   : > { %2887 = vst.msk [vmem:[#allocation3 + $0xb0] sm:$0xff] %vm2864_vm15, %v2813_v34  ;;  %3210 = vrot.lane.b32.xlu1 %v3118_v6, %s4616_s20 }
 0x33e   : > { %3212 = vrot.lane.b32.xlu0 %v3119_v35, %s4616_s20 }
 0x33f   : > { %v2622_v8 = vpop.permute.xlu1 %2621 }
 0x340   : > { %2695 = vst.msk [vmem:[#allocation3 + $0xb8] sm:$0xff] %vm2671_vm14, %v2622_v8  ;;  %v2815_v36 = vpop.permute.xlu0 %2814 }
 0x341   : > { %2888 = vst.msk [vmem:[#allocation3 + $0xb8] sm:$0xff] %vm2864_vm15, %v2815_v36  ;;  %2635 = vrot.lane.b32.xlu1 %v3118_v6, %s4613_s17 }
 0x342   : > { %2828 = vrot.lane.b32.xlu0 %v2734_v48, %s4615_s19 }
 0x343   : > { %v2238_v37 = vpop.permute.xlu1 %2237  ;;  %v3304_v40 = vld [vmem:[#allocation3 + $0xa8] sm:$0xff] }
 0x344   : > { %2310 = vst.msk [vmem:[#allocation3 + $0xc0] sm:$0xff] %vm2285_vm12, %v2238_v37  ;;  %4511 = vmatmul.mubr.msk.f32.gmra.mxu1 %vm3327_vm5, %v3304_v40  ;;  %v1794_v16 = vpop.permute.xlu0 %1793  ;;  %v5924_v40 = vld [vmem:[%s6146_s6] ss:$0 sm:$0xff] }
 0x345   : > { %1863 = vst.msk [vmem:[#allocation3 + $0xd0] sm:$0xff] %vm1322_vm2, %v1794_v16  ;;  %2637 = vrot.lane.b32.xlu1 %v3119_v35, %s4613_s17  ;;  %v3986_v16 = vld [vmem:[%s4685_s10 + $0x8] sm:$0xff]  ;;  %s5941_s17 = scalar_lea.vmem %s6147_s7, %s4312_s30 }
 0x346   : > { %3021 = vrot.lane.b32.xlu0 %v2927_v5, %s4614_s18 }
 0x347   : > { %v3006_v52 = vpop.permute.xlu1 %3005 }
 0x348   : > { %3080 = vst.msk [vmem:[#allocation3 + $0xb0] sm:$0xff] %vm3057_vm0, %v3006_v52  ;;  %v2431_v45 = vpop.permute.xlu0 %2430 }
 0x349   : > { %2503 = vst.msk [vmem:[#allocation3 + $0xc0] sm:$0xff] %vm2478_vm13, %v2431_v45  ;;  %2830 = vrot.lane.b32.xlu1 %v2735_v41, %s4615_s19  ;;  %v3985_v45 = vld [vmem:[%s4685_s10] sm:$0xff] }
 0x34a   : > { %3214 = vrot.lane.b32.xlu0 %v3120_v10, %s4616_s20 }
 0x34b   : > { %v2240_v12 = vpop.permute.xlu1 %2239 }
 0x34c   : > { %2311 = vst.msk [vmem:[#allocation3 + $0xc8] sm:$0xff] %vm2285_vm12, %v2240_v12  ;;  %v4494_v59 = vpop.f32.mrf.mxu1  ;;  %v3199_v54 = vpop.permute.xlu0 %3198 }
 0x34d   : > { %3273 = vst.msk [vmem:[#allocation3 + $0xb0] sm:$0xff] %vm3250_vm4, %v3199_v54  ;;  %3023 = vrot.lane.b32.xlu1 %v2928_v38, %s4614_s18  ;;  %v3540_v46 = vadd.f32 %v4494_v59, %v5666_v55 }
 0x34e   : > { %v3534_v32 = vpop.f32.mrf.mxu1 }
 0x34f   : > { %v3535_v18 = vadd.f32 %v5666_v55, %v3534_v32  ;;  %v3008_v56 = vpop.permute.xlu1 %3007 }
 0x350   : > { %3081 = vst.msk [vmem:[#allocation3 + $0xb8] sm:$0xff] %vm3057_vm0, %v3008_v56  ;;  %v1986_v33 = vpop.permute.xlu0 %1985 }
 0x351   : > { %2055 = vst.msk [vmem:[#allocation3 + $0xd0] sm:$0xff] %vm1483_vm3, %v1986_v33  ;;  %3216 = vrot.lane.b32.xlu1 %v3121_v17, %s4616_s20  ;;  %4542 = vmatprep.mubr.msk.f32.mxu0 %vm1322_vm2, %v3535_v18 }
 0x352   : > { %4543 = vmatmul.mubr.msk.f32.gmra.mxu0 %vm1322_vm2, %v3540_v46  ;;  %2119 = vst.msk [vmem:[#allocation3 + $0xd0] sm:$0xff] %vm1644_vm10, %v5690_v22 }
 0x353   : > { %v1796_v57 = vpop.permute.xlu1 %1795 }
 0x354   : > { %1864 = vst.msk [vmem:[#allocation3 + $0xd8] sm:$0xff] %vm1322_vm2, %v1796_v57  ;;  %v2624_v43 = vpop.permute.xlu0 %2623  ;;  %v3305_v60 = vld [vmem:[#allocation3 + $0xb0] sm:$0xff] }
 0x355   : > { %2696 = vst.msk [vmem:[#allocation3 + $0xc0] sm:$0xff] %vm2671_vm14, %v2624_v43  ;;  %4513 = vmatprep.mubr.msk.f32.mxu1 %vm3327_vm5, %v3305_v60 }
 0x357   : > { %v2433_v61 = vpop.permute.xlu1 %2432 }
 0x358   : > { %2504 = vst.msk [vmem:[#allocation3 + $0xc8] sm:$0xff] %vm2478_vm13, %v2433_v61  ;;  %v1988_v49 = vpop.permute.xlu0 %1987 }
 0x359   : > { %2056 = vst.msk [vmem:[#allocation3 + $0xd8] sm:$0xff] %vm1483_vm3, %v1988_v49 }
 0x35a   : > { %2120 = vst.msk [vmem:[#allocation3 + $0xd8] sm:$0xff] %vm1644_vm10, %v5711_v58 }
 0x35b   : > { %v3201_v1 = vpop.permute.xlu1 %3200 }
 0x35c   : > { %3274 = vst.msk [vmem:[#allocation3 + $0xb8] sm:$0xff] %vm3250_vm4, %v3201_v1  ;;  %v2817_v22 = vpop.permute.xlu0 %2816 }
 0x35d   : > { %2889 = vst.msk [vmem:[#allocation3 + $0xc0] sm:$0xff] %vm2864_vm15, %v2817_v22 }
 0x35f   : > { %v2626_v3 = vpop.permute.xlu1 %2625 }
 0x360   : > { %2697 = vst.msk [vmem:[#allocation3 + $0xc8] sm:$0xff] %vm2671_vm14, %v2626_v3  ;;  %v2819_v24 = vpop.permute.xlu0 %2818 }
 0x361   : > { %2890 = vst.msk [vmem:[#allocation3 + $0xc8] sm:$0xff] %vm2864_vm15, %v2819_v24 }
 0x363   : > { %v2242_v11 = vpop.permute.xlu1 %2241  ;;  %v3306_v14 = vld [vmem:[#allocation3 + $0xb8] sm:$0xff] }
 0x364   : > { %2312 = vst.msk [vmem:[#allocation3 + $0xd0] sm:$0xff] %vm2285_vm12, %v2242_v11  ;;  %v4497_v21 = vpop.f32.mrf.mxu1  ;;  %4514 = vmatmul.mubr.msk.f32.gmra.mxu1 %vm3327_vm5, %v3306_v14  ;;  %v1798_v58 = vpop.permute.xlu0 %1797 }
 0x365   : > { %1865 = vst.msk [vmem:[#allocation3 + $0xe0] sm:$0xff] %vm1322_vm2, %v1798_v58  ;;  %v3550_v47 = vadd.f32 %v4497_v21, %v5666_v55 }
 0x366   : > { %v3544_v50 = vpop.f32.mrf.mxu1 }
 0x367   : > { %v3545_v44 = vadd.f32 %v5666_v55, %v3544_v50  ;;  %v3010_v9 = vpop.permute.xlu1 %3009 }
 0x368   : > { %3082 = vst.msk [vmem:[#allocation3 + $0xc0] sm:$0xff] %vm3057_vm0, %v3010_v9  ;;  %v2435_v15 = vpop.permute.xlu0 %2434  ;;  %v3988_v9 = vld [vmem:[%s4685_s10 + $0x18] sm:$0xff] }
 0x369   : > { %2505 = vst.msk [vmem:[#allocation3 + $0xd0] sm:$0xff] %vm2478_vm13, %v2435_v15  ;;  %4545 = vmatprep.mubr.msk.f32.mxu0 %vm1322_vm2, %v3545_v44 }
 0x36a   : > { %4546 = vmatmul.mubr.msk.f32.gmra.mxu0 %vm1322_vm2, %v3550_v47 }
 0x36b   : > { %v2244_v42 = vpop.permute.xlu1 %2243 }
 0x36c   : > { %2313 = vst.msk [vmem:[#allocation3 + $0xd8] sm:$0xff] %vm2285_vm12, %v2244_v42  ;;  %v3203_v26 = vpop.permute.xlu0 %3202 }
 0x36d   : > { %3275 = vst.msk [vmem:[#allocation3 + $0xc0] sm:$0xff] %vm3250_vm4, %v3203_v26  ;;  %v3987_v26 = vld [vmem:[%s4685_s10 + $0x10] sm:$0xff] }
 0x36f   : > { %v3012_v31 = vpop.permute.xlu1 %3011 }
 0x370   : > { %3083 = vst.msk [vmem:[#allocation3 + $0xc8] sm:$0xff] %vm3057_vm0, %v3012_v31  ;;  %v1990_v2 = vpop.permute.xlu0 %1989 }
 0x371   : > { %2057 = vst.msk [vmem:[#allocation3 + $0xe0] sm:$0xff] %vm1483_vm3, %v1990_v2 }
 0x372   : > { %2121 = vst.msk [vmem:[#allocation3 + $0xe0] sm:$0xff] %vm1644_vm10, %v5740_v13 }
 0x373   : > { %v1800_v51 = vpop.permute.xlu1 %1799 }
 0x374   : > { %1866 = vst.msk [vmem:[#allocation3 + $0xe8] sm:$0xff] %vm1322_vm2, %v1800_v51  ;;  %v2628_v30 = vpop.permute.xlu0 %2627  ;;  %v3307_v19 = vld [vmem:[#allocation3 + $0xc0] sm:$0xff] }
 0x375   : > { %2698 = vst.msk [vmem:[#allocation3 + $0xd0] sm:$0xff] %vm2671_vm14, %v2628_v30  ;;  %4516 = vmatprep.mubr.msk.f32.mxu1 %vm3327_vm5, %v3307_v19 }
 0x377   : > { %v2437_v25 = vpop.permute.xlu1 %2436 }
 0x378   : > { %2506 = vst.msk [vmem:[#allocation3 + $0xd8] sm:$0xff] %vm2478_vm13, %v2437_v25  ;;  %v1992_v20 = vpop.permute.xlu0 %1991 }
 0x379   : > { %2058 = vst.msk [vmem:[#allocation3 + $0xe8] sm:$0xff] %vm1483_vm3, %v1992_v20 }
 0x37a   : > { %2122 = vst.msk [vmem:[#allocation3 + $0xe8] sm:$0xff] %vm1644_vm10, %v5761_v53 }
 0x37b   : > { %v3205_v29 = vpop.permute.xlu1 %3204 }
 0x37c   : > { %3276 = vst.msk [vmem:[#allocation3 + $0xc8] sm:$0xff] %vm3250_vm4, %v3205_v29  ;;  %v2821_v13 = vpop.permute.xlu0 %2820 }
 0x37d   : > { %2891 = vst.msk [vmem:[#allocation3 + $0xd0] sm:$0xff] %vm2864_vm15, %v2821_v13 }
 0x37f   : > { %v2630_v7 = vpop.permute.xlu1 %2629 }
 0x380   : > { %2699 = vst.msk [vmem:[#allocation3 + $0xd8] sm:$0xff] %vm2671_vm14, %v2630_v7  ;;  %v2823_v4 = vpop.permute.xlu0 %2822 }
 0x381   : > { %2892 = vst.msk [vmem:[#allocation3 + $0xd8] sm:$0xff] %vm2864_vm15, %v2823_v4 }
 0x383   : > { %v2246_v27 = vpop.permute.xlu1 %2245  ;;  %v3308_v39 = vld [vmem:[#allocation3 + $0xc8] sm:$0xff] }
 0x384   : > { %2314 = vst.msk [vmem:[#allocation3 + $0xe0] sm:$0xff] %vm2285_vm12, %v2246_v27  ;;  %v4500_v28 = vpop.f32.mrf.mxu1  ;;  %4517 = vmatmul.mubr.msk.f32.gmra.mxu1 %vm3327_vm5, %v3308_v39  ;;  %v1802_v53 = vpop.permute.xlu0 %1801 }
 0x385   : > { %1867 = vst.msk [vmem:[#allocation3 + $0xf0] sm:$0xff] %vm1322_vm2, %v1802_v53  ;;  %v3560_v6 = vadd.f32 %v4500_v28, %v5666_v55 }
 0x386   : > { %v3554_v63 = vpop.f32.mrf.mxu1 }
 0x387   : > { %v3555_v0 = vadd.f32 %v5666_v55, %v3554_v63  ;;  %v3014_v34 = vpop.permute.xlu1 %3013 }
 0x388   : > { %3084 = vst.msk [vmem:[#allocation3 + $0xd0] sm:$0xff] %vm3057_vm0, %v3014_v34  ;;  %v2439_v35 = vpop.permute.xlu0 %2438 }
 0x389   : > { %2507 = vst.msk [vmem:[#allocation3 + $0xe0] sm:$0xff] %vm2478_vm13, %v2439_v35  ;;  %4548 = vmatprep.mubr.msk.f32.mxu0 %vm1322_vm2, %v3555_v0 }
 0x38a   : > { %4549 = vmatmul.mubr.msk.f32.gmra.mxu0 %vm1322_vm2, %v3560_v6 }
 0x38b   : > { %v2248_v8 = vpop.permute.xlu1 %2247 }
 0x38c   : > { %2315 = vst.msk [vmem:[#allocation3 + $0xe8] sm:$0xff] %vm2285_vm12, %v2248_v8  ;;  %v3207_v36 = vpop.permute.xlu0 %3206 }
 0x38d   : > { %3277 = vst.msk [vmem:[#allocation3 + $0xd0] sm:$0xff] %vm3250_vm4, %v3207_v36  ;;  %v3990_v36 = vld [vmem:[%s4685_s10 + $0x28] sm:$0xff] }
 0x38f   : > { %v3016_v48 = vpop.permute.xlu1 %3015 }
 0x390   : > { %3085 = vst.msk [vmem:[#allocation3 + $0xd8] sm:$0xff] %vm3057_vm0, %v3016_v48  ;;  %v1994_v37 = vpop.permute.xlu0 %1993 }
 0x391   : > { %2059 = vst.msk [vmem:[#allocation3 + $0xf0] sm:$0xff] %vm1483_vm3, %v1994_v37 }
 0x392   : > { %v4532_v5 = vpop.f32.mrf.mxu0  ;;  %2123 = vst.msk [vmem:[#allocation3 + $0xf0] sm:$0xff] %vm1644_vm10, %v5790_v23 }
 0x393   : > { %v3832_v41 = vadd.f32 %v4532_v5, %v5924_v40  ;;  %v1804_v52 = vpop.permute.xlu1 %1803  ;;  %v3989_v5 = vld [vmem:[%s4685_s10 + $0x20] sm:$0xff] }
 0x394   : > { %1868 = vst.msk [vmem:[#allocation3 + $0xf8] sm:$0xff] %vm1322_vm2, %v1804_v52  ;;  %v3826_v10 = vpop.f32.mrf.mxu0  ;;  %v2632_v38 = vpop.permute.xlu0 %2631  ;;  %v3309_v12 = vld [vmem:[#allocation3 + $0xd0] sm:$0xff] }
 0x395   : > { %v4018_v59 = vadd.f32 %v3986_v16, %v3832_v41  ;;  %v3827_v54 = vadd.f32 %v5924_v40, %v3826_v10  ;;  %2700 = vst.msk [vmem:[#allocation3 + $0xe0] sm:$0xff] %vm2671_vm14, %v2632_v38  ;;  %4519 = vmatprep.mubr.msk.f32.mxu1 %vm3327_vm5, %v3309_v12 }
 0x397   : > { %v4050_v23 = vmax.f32 %v4018_v59, 0.0  ;;  %v4017_v32 = vadd.f32 %v3985_v45, %v3827_v54  ;;  %v2441_v17 = vpop.permute.xlu1 %2440 }
 0x398   : > { %2508 = vst.msk [vmem:[#allocation3 + $0xe8] sm:$0xff] %vm2478_vm13, %v2441_v17  ;;  %v1996_v18 = vpop.permute.xlu0 %1995 }
 0x399   : > { %4082 = vst.msk [vmem:[%s5941_s17 + $0x8] sm:$0xff] %vm320_vm1, %v4050_v23  ;;  %v4049_v56 = vmax.f32 %v4017_v32, 0.0  ;;  %v3992_v32 = vld [vmem:[%s4685_s10 + $0x38] sm:$0xff] }
 0x39a   : > { %2060 = vst.msk [vmem:[#allocation3 + $0xf8] sm:$0xff] %vm1483_vm3, %v1996_v18 }
 0x39b   : > { %2124 = vst.msk [vmem:[#allocation3 + $0xf8] sm:$0xff] %vm1644_vm10, %v5811_v62  ;;  %v3209_v46 = vpop.permute.xlu1 %3208 }
 0x39c   : > { %4081 = vst.msk [vmem:[%s5941_s17] sm:$0xff] %vm320_vm1, %v4049_v56  ;;  %v2825_v33 = vpop.permute.xlu0 %2824  ;;  %v3991_v56 = vld [vmem:[%s4685_s10 + $0x30] sm:$0xff] }
 0x39d   : > { %3278 = vst.msk [vmem:[#allocation3 + $0xd8] sm:$0xff] %vm3250_vm4, %v3209_v46 }
 0x39e   : > { %2893 = vst.msk [vmem:[#allocation3 + $0xe0] sm:$0xff] %vm2864_vm15, %v2825_v33 }
 0x39f   : > { %v2634_v57 = vpop.permute.xlu1 %2633 }
 0x3a0   : > { %2701 = vst.msk [vmem:[#allocation3 + $0xe8] sm:$0xff] %vm2671_vm14, %v2634_v57  ;;  %v2827_v43 = vpop.permute.xlu0 %2826 }
 0x3a1   : > { %2894 = vst.msk [vmem:[#allocation3 + $0xe8] sm:$0xff] %vm2864_vm15, %v2827_v43 }
 0x3a3   : > { %v2250_v60 = vpop.permute.xlu1 %2249 }
 0x3a4   : > { %v3310_v61 = vld [vmem:[#allocation3 + $0xd8] sm:$0xff]  ;;  %2316 = vst.msk [vmem:[#allocation3 + $0xf0] sm:$0xff] %vm2285_vm12, %v2250_v60  ;;  %v4503_v49 = vpop.f32.mrf.mxu1  ;;  %v2252_v62 = vpop.permute.xlu0 %2251 }
 0x3a5   : > { %4520 = vmatmul.mubr.msk.f32.gmra.mxu1 %vm3327_vm5, %v3310_v61  ;;  %2317 = vst.msk [vmem:[#allocation3 + $0xf8] sm:$0xff] %vm2285_vm12, %v2252_v62  ;;  %v3570_v24 = vadd.f32 %v4503_v49, %v5666_v55 }
 0x3a6   : > { %v3564_v1 = vpop.f32.mrf.mxu1 }
 0x3a7   : > { %v3565_v22 = vadd.f32 %v5666_v55, %v3564_v1  ;;  %v3018_v3 = vpop.permute.xlu1 %3017 }
 0x3a8   : > { %3086 = vst.msk [vmem:[#allocation3 + $0xe0] sm:$0xff] %vm3057_vm0, %v3018_v3  ;;  %v3020_v11 = vpop.permute.xlu0 %3019  ;;  %v3994_v3 = vld [vmem:[%s4685_s10 + $0x48] sm:$0xff] }
 0x3a9   : > { %3087 = vst.msk [vmem:[#allocation3 + $0xe8] sm:$0xff] %vm3057_vm0, %v3020_v11  ;;  %4551 = vmatprep.mubr.msk.f32.mxu0 %vm1322_vm2, %v3565_v22 }
 0x3aa   : > { %4552 = vmatmul.mubr.msk.f32.gmra.mxu0 %vm1322_vm2, %v3570_v24 }
 0x3ab   : > { %v2443_v14 = vpop.permute.xlu1 %2442 }
 0x3ac   : > { %2509 = vst.msk [vmem:[#allocation3 + $0xf0] sm:$0xff] %vm2478_vm13, %v2443_v14  ;;  %v2445_v21 = vpop.permute.xlu0 %2444  ;;  %v3993_v14 = vld [vmem:[%s4685_s10 + $0x40] sm:$0xff] }
 0x3ad   : > { %2510 = vst.msk [vmem:[#allocation3 + $0xf8] sm:$0xff] %vm2478_vm13, %v2445_v21 }
 0x3af   : > { %v3211_v58 = vpop.permute.xlu1 %3210 }
 0x3b0   : > { %3279 = vst.msk [vmem:[#allocation3 + $0xe0] sm:$0xff] %vm3250_vm4, %v3211_v58  ;;  %v3213_v50 = vpop.permute.xlu0 %3212 }
 0x3b1   : > { %3280 = vst.msk [vmem:[#allocation3 + $0xe8] sm:$0xff] %vm3250_vm4, %v3213_v50 }
 0x3b2   : > { %v4535_v44 = vpop.f32.mrf.mxu0 }
 0x3b3   : > { %v3842_v47 = vadd.f32 %v4535_v44, %v5924_v40  ;;  %v2636_v15 = vpop.permute.xlu1 %2635 }
 0x3b4   : > { %2702 = vst.msk [vmem:[#allocation3 + $0xf0] sm:$0xff] %vm2671_vm14, %v2636_v15  ;;  %v3836_v42 = vpop.f32.mrf.mxu0  ;;  %v2829_v31 = vpop.permute.xlu0 %2828  ;;  %v6027_v15 = vld [vmem:[%s6145_s5] ss:$0 sm:$0xff] }
 0x3b5   : > { %v4020_v2 = vadd.f32 %v3988_v9, %v3842_v47  ;;  %v3837_v51 = vadd.f32 %v5924_v40, %v3836_v42  ;;  %2895 = vst.msk [vmem:[#allocation3 + $0xf0] sm:$0xff] %vm2864_vm15, %v2829_v31 }
 0x3b7   : > { %v4052_v30 = vmax.f32 %v4020_v2, 0.0  ;;  %v4019_v19 = vadd.f32 %v3987_v26, %v3837_v51  ;;  %v2638_v25 = vpop.permute.xlu1 %2637  ;;  %v3311_v20 = vld [vmem:[#allocation3 + $0xe0] sm:$0xff]  ;;  %v3996_v2 = vld [vmem:[%s4685_s10 + $0x58] sm:$0xff] }
 0x3b8   : > { %2703 = vst.msk [vmem:[#allocation3 + $0xf8] sm:$0xff] %vm2671_vm14, %v2638_v25  ;;  %4522 = vmatprep.mubr.msk.f32.mxu1 %vm3327_vm5, %v3311_v20  ;;  %v3312_v29 = vld [vmem:[#allocation3 + $0xe8] sm:$0xff]  ;;  %v3022_v13 = vpop.permute.xlu0 %3021 }
 0x3b9   : > { %4084 = vst.msk [vmem:[%s5941_s17 + $0x18] sm:$0xff] %vm320_vm1, %v4052_v30  ;;  %v4051_v7 = vmax.f32 %v4019_v19, 0.0  ;;  %4523 = vmatmul.mubr.msk.f32.gmra.mxu1 %vm3327_vm5, %v3312_v29  ;;  %v3995_v19 = vld [vmem:[%s4685_s10 + $0x50] sm:$0xff] }
 0x3ba   : > { %3088 = vst.msk [vmem:[#allocation3 + $0xf0] sm:$0xff] %vm3057_vm0, %v3022_v13 }
 0x3bb   : > { %4083 = vst.msk [vmem:[%s5941_s17 + $0x10] sm:$0xff] %vm320_vm1, %v4051_v7  ;;  %v2831_v4 = vpop.permute.xlu1 %2830 }
 0x3bc   : > { %2896 = vst.msk [vmem:[#allocation3 + $0xf8] sm:$0xff] %vm2864_vm15, %v2831_v4  ;;  %v3215_v27 = vpop.permute.xlu0 %3214 }
 0x3bd   : > { %3281 = vst.msk [vmem:[#allocation3 + $0xf0] sm:$0xff] %vm3250_vm4, %v3215_v27 }
 0x3bf   : > { %v3024_v39 = vpop.permute.xlu1 %3023 }
 0x3c0   : > { %3089 = vst.msk [vmem:[#allocation3 + $0xf8] sm:$0xff] %vm3057_vm0, %v3024_v39 }
 0x3c3   : > { %v3217_v28 = vpop.permute.xlu1 %3216 }
 0x3c4   : > { %3282 = vst.msk [vmem:[#allocation3 + $0xf8] sm:$0xff] %vm3250_vm4, %v3217_v28  ;;  %v4506_v53 = vpop.f32.mrf.mxu1  ;;  %v3313_v63 = vld [vmem:[#allocation3 + $0xf0] sm:$0xff] }
 0x3c5   : > { %4525 = vmatprep.mubr.msk.f32.mxu1 %vm3327_vm5, %v3313_v63  ;;  %v3580_v6 = vadd.f32 %v4506_v53, %v5666_v55  ;;  %v3998_v63 = vld [vmem:[%s4685_s10 + $0x68] sm:$0xff] }
 0x3c6   : > { %v3574_v0 = vpop.f32.mrf.mxu1 }
 0x3c7   : > { %v3575_v34 = vadd.f32 %v5666_v55, %v3574_v0 }
 0x3c9   : > { %4554 = vmatprep.mubr.msk.f32.mxu0 %vm1322_vm2, %v3575_v34 }
 0x3ca   : > { %4555 = vmatmul.mubr.msk.f32.gmra.mxu0 %vm1322_vm2, %v3580_v6  ;;  %v3997_v6 = vld [vmem:[%s4685_s10 + $0x60] sm:$0xff] }
 0x3cb   : > { %v3314_v35 = vld [vmem:[#allocation3 + $0xf8] sm:$0xff] }
 0x3cc   : > { %4526 = vmatmul.mubr.msk.f32.gmra.mxu1 %vm3327_vm5, %v3314_v35 }
 0x3d2   : > { %v4538_v8 = vpop.f32.mrf.mxu0 }
 0x3d3   : > { %v3852_v48 = vadd.f32 %v4538_v8, %v5924_v40 }
 0x3d4   : > { %v3846_v37 = vpop.f32.mrf.mxu0 }
 0x3d5   : > { %v4022_v16 = vadd.f32 %v3990_v36, %v3852_v48  ;;  %v3847_v41 = vadd.f32 %v5924_v40, %v3846_v37 }
 0x3d7   : > { %v4054_v52 = vmax.f32 %v4022_v16, 0.0  ;;  %v4021_v10 = vadd.f32 %v3989_v5, %v3847_v41 }
 0x3d9   : > { %4086 = vst.msk [vmem:[%s5941_s17 + $0x28] sm:$0xff] %vm320_vm1, %v4054_v52  ;;  %v4053_v45 = vmax.f32 %v4021_v10, 0.0 }
 0x3db   : > { %4085 = vst.msk [vmem:[%s5941_s17 + $0x20] sm:$0xff] %vm320_vm1, %v4053_v45  ;;  %v4000_v45 = vld [vmem:[%s4685_s10 + $0x78] sm:$0xff] }
 0x3e4   : > { %v4509_v38 = vpop.f32.mrf.mxu1 }
 0x3e5   : > { %v3590_v54 = vadd.f32 %v4509_v38, %v5666_v55 }
 0x3e6   : > { %v3584_v12 = vpop.f32.mrf.mxu1 }
 0x3e7   : > { %v3585_v59 = vadd.f32 %v5666_v55, %v3584_v12 }
 0x3e9   : > { %4557 = vmatprep.mubr.msk.f32.mxu0 %vm1322_vm2, %v3585_v59  ;;  %v3999_v59 = vld [vmem:[%s4685_s10 + $0x70] sm:$0xff] }
 0x3ea   : > { %4558 = vmatmul.mubr.msk.f32.gmra.mxu0 %vm1322_vm2, %v3590_v54 }
 0x3f2   : > { %v4541_v23 = vpop.f32.mrf.mxu0 }
 0x3f3   : > { %v3862_v17 = vadd.f32 %v4541_v23, %v5924_v40 }
 0x3f4   : > { %v3856_v18 = vpop.f32.mrf.mxu0 }
 0x3f5   : > { %v4024_v46 = vadd.f32 %v3992_v32, %v3862_v17  ;;  %v3857_v33 = vadd.f32 %v5924_v40, %v3856_v18 }
 0x3f7   : > { %v4056_v57 = vmax.f32 %v4024_v46, 0.0  ;;  %v4023_v43 = vadd.f32 %v3991_v56, %v3857_v33 }
 0x3f9   : > { %4088 = vst.msk [vmem:[%s5941_s17 + $0x38] sm:$0xff] %vm320_vm1, %v4056_v57  ;;  %v4055_v60 = vmax.f32 %v4023_v43, 0.0 }
 0x3fb   : > { %4087 = vst.msk [vmem:[%s5941_s17 + $0x30] sm:$0xff] %vm320_vm1, %v4055_v60  ;;  %v4002_v60 = vld [vmem:[%s4685_s10 + $0x88] sm:$0xff] }
 0x404   : > { %v4512_v61 = vpop.f32.mrf.mxu1 }
 0x405   : > { %v3600_v1 = vadd.f32 %v4512_v61, %v5666_v55 }
 0x406   : > { %v3594_v49 = vpop.f32.mrf.mxu1 }
 0x407   : > { %v3595_v62 = vadd.f32 %v5666_v55, %v3594_v49 }
 0x409   : > { %4560 = vmatprep.mubr.msk.f32.mxu0 %vm1322_vm2, %v3595_v62 }
 0x40a   : > { %4561 = vmatmul.mubr.msk.f32.gmra.mxu0 %vm1322_vm2, %v3600_v1  ;;  %v4001_v1 = vld [vmem:[%s4685_s10 + $0x80] sm:$0xff] }
 0x412   : > { %v4544_v22 = vpop.f32.mrf.mxu0 }
 0x413   : > { %v3872_v24 = vadd.f32 %v4544_v22, %v5924_v40 }
 0x414   : > { %v3866_v11 = vpop.f32.mrf.mxu0 }
 0x415   : > { %v4026_v21 = vadd.f32 %v3994_v3, %v3872_v24  ;;  %v3867_v58 = vadd.f32 %v5924_v40, %v3866_v11 }
 0x417   : > { %v4058_v50 = vmax.f32 %v4026_v21, 0.0  ;;  %v4025_v44 = vadd.f32 %v3993_v14, %v3867_v58 }
 0x419   : > { %4090 = vst.msk [vmem:[%s5941_s17 + $0x48] sm:$0xff] %vm320_vm1, %v4058_v50  ;;  %v4057_v55 = vmax.f32 %v4025_v44, 0.0 }
 0x41b   : > { %4089 = vst.msk [vmem:[%s5941_s17 + $0x40] sm:$0xff] %vm320_vm1, %v4057_v55  ;;  %v4004_v55 = vld [vmem:[%s4685_s10 + $0x98] sm:$0xff] }
 0x424   : > { %v4515_v9 = vpop.f32.mrf.mxu1 }
 0x425   : > { %v3610_v26 = vadd.f32 %v6027_v15, %v4515_v9 }
 0x426   : > { %v3604_v47 = vpop.f32.mrf.mxu1 }
 0x427   : > { %v3605_v42 = vadd.f32 %v6027_v15, %v3604_v47 }
 0x429   : > { %4563 = vmatprep.mubr.msk.f32.mxu0 %vm1322_vm2, %v3605_v42  ;;  %v4003_v42 = vld [vmem:[%s4685_s10 + $0x90] sm:$0xff] }
 0x42a   : > { %v4547_v31 = vpop.f32.mrf.mxu0  ;;  %4564 = vmatmul.mubr.msk.f32.gmra.mxu0 %vm1322_vm2, %v3610_v26 }
 0x42b   : > { %v3882_v51 = vadd.f32 %v4547_v31, %v5924_v40 }
 0x42c   : > { %v3876_v30 = vpop.f32.mrf.mxu0 }
 0x42d   : > { %v4028_v25 = vadd.f32 %v3996_v2, %v3882_v51  ;;  %v3877_v20 = vadd.f32 %v5924_v40, %v3876_v30 }
 0x42f   : > { %v4060_v29 = vmax.f32 %v4028_v25, 0.0  ;;  %v4027_v13 = vadd.f32 %v3995_v19, %v3877_v20  ;;  %v4006_v19 = vld [vmem:[%s4685_s10 + $0xa8] sm:$0xff] }
 0x431   : > { %4092 = vst.msk [vmem:[%s5941_s17 + $0x58] sm:$0xff] %vm320_vm1, %v4060_v29  ;;  %v4059_v7 = vmax.f32 %v4027_v13, 0.0  ;;  %v4005_v29 = vld [vmem:[%s4685_s10 + $0xa0] sm:$0xff] }
 0x433   : > { %4091 = vst.msk [vmem:[%s5941_s17 + $0x50] sm:$0xff] %vm320_vm1, %v4059_v7 }
 0x444   : > { %v4518_v4 = vpop.f32.mrf.mxu1 }
 0x445   : > { %v3620_v28 = vadd.f32 %v6027_v15, %v4518_v4 }
 0x446   : > { %v3614_v27 = vpop.f32.mrf.mxu1 }
 0x447   : > { %v3615_v39 = vadd.f32 %v6027_v15, %v3614_v27 }
 0x449   : > { %4566 = vmatprep.mubr.msk.f32.mxu0 %vm1322_vm2, %v3615_v39 }
 0x44a   : > { %v4550_v53 = vpop.f32.mrf.mxu0  ;;  %4567 = vmatmul.mubr.msk.f32.gmra.mxu0 %vm1322_vm2, %v3620_v28 }
 0x44b   : > { %v3892_v0 = vadd.f32 %v4550_v53, %v5924_v40  ;;  %v4008_v53 = vld [vmem:[%s4685_s10 + $0xb8] sm:$0xff] }
 0x44c   : > { %v3886_v34 = vpop.f32.mrf.mxu0 }
 0x44d   : > { %v4030_v35 = vadd.f32 %v3998_v63, %v3892_v0  ;;  %v3887_v8 = vadd.f32 %v5924_v40, %v3886_v34  ;;  %v4007_v34 = vld [vmem:[%s4685_s10 + $0xb0] sm:$0xff] }
 0x44f   : > { %v4062_v36 = vmax.f32 %v4030_v35, 0.0  ;;  %v4029_v48 = vadd.f32 %v3997_v6, %v3887_v8 }
 0x451   : > { %4094 = vst.msk [vmem:[%s5941_s17 + $0x68] sm:$0xff] %vm320_vm1, %v4062_v36  ;;  %v4061_v37 = vmax.f32 %v4029_v48, 0.0 }
 0x453   : > { %4093 = vst.msk [vmem:[%s5941_s17 + $0x60] sm:$0xff] %vm320_vm1, %v4061_v37 }
 0x465   : > { %v4521_v5 = vpop.f32.mrf.mxu1 }
 0x466   : > { %v3630_v52 = vadd.f32 %v6027_v15, %v4521_v5  ;;  %v4010_v5 = vld [vmem:[%s4685_s10 + $0xc8] sm:$0xff] }
 0x467   : > { %v3624_v16 = vpop.f32.mrf.mxu1 }
 0x468   : > { %v3625_v41 = vadd.f32 %v6027_v15, %v3624_v16 }
 0x46a   : > { %4569 = vmatprep.mubr.msk.f32.mxu0 %vm1322_vm2, %v3625_v41  ;;  %v4553_v10 = vpop.f32.mrf.mxu0 }
 0x46b   : > { %4570 = vmatmul.mubr.msk.f32.gmra.mxu0 %vm1322_vm2, %v3630_v52  ;;  %v3902_v38 = vadd.f32 %v4553_v10, %v5924_v40  ;;  %v4009_v52 = vld [vmem:[%s4685_s10 + $0xc0] sm:$0xff] }
 0x46c   : > { %v3896_v12 = vpop.f32.mrf.mxu0 }
 0x46d   : > { %v4032_v54 = vadd.f32 %v4000_v45, %v3902_v38  ;;  %v3897_v23 = vadd.f32 %v5924_v40, %v3896_v12 }
 0x46f   : > { %v4064_v32 = vmax.f32 %v4032_v54, 0.0  ;;  %v4031_v17 = vadd.f32 %v3999_v59, %v3897_v23  ;;  %v4012_v23 = vld [vmem:[%s4685_s10 + $0xd8] sm:$0xff] }
 0x471   : > { %4096 = vst.msk [vmem:[%s5941_s17 + $0x78] sm:$0xff] %vm320_vm1, %v4064_v32  ;;  %v4063_v18 = vmax.f32 %v4031_v17, 0.0 }
 0x473   : > { %4095 = vst.msk [vmem:[%s5941_s17 + $0x70] sm:$0xff] %vm320_vm1, %v4063_v18  ;;  %v4011_v18 = vld [vmem:[%s4685_s10 + $0xd0] sm:$0xff] }
 0x479   : > { %v4524_v56 = vpop.f32.mrf.mxu1 }
 0x47a   : > { %v3640_v57 = vadd.f32 %v6027_v15, %v4524_v56 }
 0x47b   : > { %v3634_v46 = vpop.f32.mrf.mxu1 }
 0x47c   : > { %v3635_v33 = vadd.f32 %v6027_v15, %v3634_v46 }
 0x47e   : > { %4572 = vmatprep.mubr.msk.f32.mxu0 %vm1322_vm2, %v3635_v33 }
 0x47f   : > { %4573 = vmatmul.mubr.msk.f32.gmra.mxu0 %vm1322_vm2, %v3640_v57 }
 0x48a   : > { %v4556_v43 = vpop.f32.mrf.mxu0 }
 0x48b   : > { %v3912_v61 = vadd.f32 %v4556_v43, %v5924_v40 }
 0x48c   : > { %v4527_v49 = vpop.f32.mrf.mxu1  ;;  %v3906_v62 = vpop.f32.mrf.mxu0 }
 0x48d   : > { %v4034_v22 = vadd.f32 %v4002_v60, %v3912_v61  ;;  %v3907_v3 = vadd.f32 %v5924_v40, %v3906_v62  ;;  %v3650_v58 = vadd.f32 %v6027_v15, %v4527_v49  ;;  %v4014_v61 = vld [vmem:[%s4685_s10 + $0xe8] sm:$0xff] }
 0x48e   : > { %v3644_v24 = vpop.f32.mrf.mxu1 }
 0x48f   : > { %v4066_v11 = vmax.f32 %v4034_v22, 0.0  ;;  %v4033_v14 = vadd.f32 %v4001_v1, %v3907_v3  ;;  %v3645_v21 = vadd.f32 %v6027_v15, %v3644_v24  ;;  %v4013_v1 = vld [vmem:[%s4685_s10 + $0xe0] sm:$0xff] }
 0x491   : > { %4098 = vst.msk [vmem:[%s5941_s17 + $0x88] sm:$0xff] %vm320_vm1, %v4066_v11  ;;  %v4065_v50 = vmax.f32 %v4033_v14, 0.0  ;;  %4575 = vmatprep.mubr.msk.f32.mxu0 %vm1322_vm2, %v3645_v21 }
 0x492   : > { %4576 = vmatmul.mubr.msk.f32.gmra.mxu0 %vm1322_vm2, %v3650_v58  ;;  %v4016_v58 = vld [vmem:[%s4685_s10 + $0xf8] sm:$0xff] }
 0x493   : > { %4097 = vst.msk [vmem:[%s5941_s17 + $0x80] sm:$0xff] %vm320_vm1, %v4065_v50 }
 0x4aa   : > { %v4559_v44 = vpop.f32.mrf.mxu0 }
 0x4ab   : > { %v3922_v9 = vadd.f32 %v4559_v44, %v5924_v40 }
 0x4ac   : > { %v3916_v47 = vpop.f32.mrf.mxu0 }
 0x4ad   : > { %v4036_v26 = vadd.f32 %v4004_v55, %v3922_v9  ;;  %v3917_v15 = vadd.f32 %v5924_v40, %v3916_v47  ;;  %v4015_v55 = vld [vmem:[%s4685_s10 + $0xf0] sm:$0xff] }
 0x4af   : > { %v4068_v31 = vmax.f32 %v4036_v26, 0.0  ;;  %v4035_v2 = vadd.f32 %v4003_v42, %v3917_v15 }
 0x4b1   : > { %4100 = vst.msk [vmem:[%s5941_s17 + $0x98] sm:$0xff] %vm320_vm1, %v4068_v31  ;;  %v4067_v51 = vmax.f32 %v4035_v2, 0.0 }
 0x4b3   : > { %4099 = vst.msk [vmem:[%s5941_s17 + $0x90] sm:$0xff] %vm320_vm1, %v4067_v51 }
 0x4ca   : > { %v4562_v30 = vpop.f32.mrf.mxu0 }
 0x4cb   : > { %v3932_v25 = vadd.f32 %v4562_v30, %v5924_v40 }
 0x4cc   : > { %v3926_v20 = vpop.f32.mrf.mxu0 }
 0x4cd   : > { %v4038_v13 = vadd.f32 %v4006_v19, %v3932_v25  ;;  %v3927_v7 = vadd.f32 %v5924_v40, %v3926_v20 }
 0x4cf   : > { %v4070_v4 = vmax.f32 %v4038_v13, 0.0  ;;  %v4037_v27 = vadd.f32 %v4005_v29, %v3927_v7 }
 0x4d1   : > { %4102 = vst.msk [vmem:[%s5941_s17 + $0xa8] sm:$0xff] %vm320_vm1, %v4070_v4  ;;  %v4069_v39 = vmax.f32 %v4037_v27, 0.0 }
 0x4d3   : > { %4101 = vst.msk [vmem:[%s5941_s17 + $0xa0] sm:$0xff] %vm320_vm1, %v4069_v39 }
 0x4ea   : > { %v4565_v28 = vpop.f32.mrf.mxu0 }
 0x4eb   : > { %v3942_v63 = vadd.f32 %v4565_v28, %v5924_v40 }
 0x4ec   : > { %v3936_v0 = vpop.f32.mrf.mxu0 }
 0x4ed   : > { %v4040_v6 = vadd.f32 %v4008_v53, %v3942_v63  ;;  %v3937_v35 = vadd.f32 %v5924_v40, %v3936_v0 }
 0x4ef   : > { %v4072_v8 = vmax.f32 %v4040_v6, 0.0  ;;  %v4039_v36 = vadd.f32 %v4007_v34, %v3937_v35 }
 0x4f1   : > { %4104 = vst.msk [vmem:[%s5941_s17 + $0xb8] sm:$0xff] %vm320_vm1, %v4072_v8  ;;  %v4071_v48 = vmax.f32 %v4039_v36, 0.0 }
 0x4f3   : > { %4103 = vst.msk [vmem:[%s5941_s17 + $0xb0] sm:$0xff] %vm320_vm1, %v4071_v48 }
 0x50a   : > { %v4568_v37 = vpop.f32.mrf.mxu0 }
 0x50b   : > { %v3952_v16 = vadd.f32 %v4568_v37, %v5924_v40 }
 0x50c   : > { %v3946_v41 = vpop.f32.mrf.mxu0 }
 0x50d   : > { %v4042_v10 = vadd.f32 %v4010_v5, %v3952_v16  ;;  %v3947_v45 = vadd.f32 %v5924_v40, %v3946_v41 }
 0x50f   : > { %v4074_v38 = vmax.f32 %v4042_v10, 0.0  ;;  %v4041_v12 = vadd.f32 %v4009_v52, %v3947_v45 }
 0x511   : > { %4106 = vst.msk [vmem:[%s5941_s17 + $0xc8] sm:$0xff] %vm320_vm1, %v4074_v38  ;;  %v4073_v59 = vmax.f32 %v4041_v12, 0.0 }
 0x513   : > { %4105 = vst.msk [vmem:[%s5941_s17 + $0xc0] sm:$0xff] %vm320_vm1, %v4073_v59 }
 0x52b   : > { %v4571_v54 = vpop.f32.mrf.mxu0 }
 0x52c   : > { %v3962_v32 = vadd.f32 %v4571_v54, %v5924_v40 }
 0x52d   : > { %v3956_v17 = vpop.f32.mrf.mxu0 }
 0x52e   : > { %v4044_v56 = vadd.f32 %v4012_v23, %v3962_v32  ;;  %v3957_v46 = vadd.f32 %v5924_v40, %v3956_v17 }
 0x530   : > { %v4076_v33 = vmax.f32 %v4044_v56, 0.0  ;;  %v4043_v57 = vadd.f32 %v4011_v18, %v3957_v46 }
 0x532   : > { %4108 = vst.msk [vmem:[%s5941_s17 + $0xd8] sm:$0xff] %vm320_vm1, %v4076_v33  ;;  %v4075_v43 = vmax.f32 %v4043_v57, 0.0 }
 0x534   : > { %4107 = vst.msk [vmem:[%s5941_s17 + $0xd0] sm:$0xff] %vm320_vm1, %v4075_v43 }
 0x53f   : > { %v4574_v60 = vpop.f32.mrf.mxu0 }
 0x540   : > { %v3972_v49 = vadd.f32 %v4574_v60, %v5924_v40 }
 0x541   : > { %v3966_v62 = vpop.f32.mrf.mxu0 }
 0x542   : > { %v4046_v22 = vadd.f32 %v4014_v61, %v3972_v49  ;;  %v3967_v3 = vadd.f32 %v5924_v40, %v3966_v62 }
 0x544   : > { %v4078_v24 = vmax.f32 %v4046_v22, 0.0  ;;  %v4045_v11 = vadd.f32 %v4013_v1, %v3967_v3 }
 0x546   : > { %4110 = vst.msk [vmem:[%s5941_s17 + $0xe8] sm:$0xff] %vm320_vm1, %v4078_v24  ;;  %v4077_v14 = vmax.f32 %v4045_v11, 0.0 }
 0x548   : > { %4109 = vst.msk [vmem:[%s5941_s17 + $0xe0] sm:$0xff] %vm320_vm1, %v4077_v14 }
 0x552   : > { %v4577_v21 = vpop.f32.mrf.mxu0 }
 0x553   : > { %v3982_v50 = vadd.f32 %v4577_v21, %v5924_v40 }
 0x554   : > { %v3976_v44 = vpop.f32.mrf.mxu0 }
 0x555   : > { %v4048_v9 = vadd.f32 %v4016_v58, %v3982_v50  ;;  %v3977_v47 = vadd.f32 %v5924_v40, %v3976_v44 }
 0x557   : > { %v4080_v42 = vmax.f32 %v4048_v9, 0.0  ;;  %v4047_v26 = vadd.f32 %v4015_v55, %v3977_v47 }
 0x559   : > { %4112 = vst.msk [vmem:[%s5941_s17 + $0xf8] sm:$0xff] %vm320_vm1, %v4080_v42  ;;  %v4079_v15 = vmax.f32 %v4047_v26, 0.0 }
 0x55b   : > { %4111 = vst.msk [vmem:[%s5941_s17 + $0xf0] sm:$0xff] %vm320_vm1, %v4079_v15 }
 0x55c PF: > { %s17_s24 = sadd.s32 1, %s4606_s24  }
 0x55d   : > { %p14_p4 = scmp.ge.s32.totalorder %s17_s24, 4  }
 0x55f   :  { %16 = sbr.rel (!%p14_p4) target bundleno = 1 (0x1), region = 78 }

</bundles_post_ra>
